<compile_context>
chip_gen: v6e
topology: v6e:2x2x1
jax: 0.10.0
libtpu: 0.0.40
codegen_flags: <defaults>
</compile_context>

<pallas_src>
import functools

import jax
import jax.numpy as jnp
from jax.experimental import pallas as pl
from jax.experimental.pallas import tpu as pltpu

_EPS = 1e-5
_ARB = pltpu.CompilerParams(dimension_semantics=("arbitrary",))


# --------------------------------------------------------------------------- #
# Kernel 1: softmax-embed + 1x1 ConvTranspose GEMM + BatchNorm + ReLU (fused)
# --------------------------------------------------------------------------- #

def _layer1_kernel(a_ref, z_ref, we_ref, wz_ref, wemb_ref, g_ref, b_ref, o_ref,
                   *, c1, inv_count, eps):
    # softmax(annot) @ W_embed   (f32)
    a = a_ref[...]
    a = a - jnp.max(a, axis=1, keepdims=True)
    e = jnp.exp(a)
    p = e / jnp.sum(e, axis=1, keepdims=True)
    emb = jnp.dot(p, we_ref[...], preferred_element_type=jnp.float32)   # (B, 40)

    # 1x1 ConvTranspose as one lane-dense GEMM; concat(z, emb) is expressed as
    # a K-split (two GEMMs summed) to avoid an in-kernel concat.
    y = (jnp.dot(z_ref[...].astype(jnp.bfloat16), wz_ref[...],
                 preferred_element_type=jnp.float32) +
         jnp.dot(emb.astype(jnp.bfloat16), wemb_ref[...],
                 preferred_element_type=jnp.float32))                   # (B, 16*c1)

    # BatchNorm (batch statistics) over channel c: columns are ordered
    # (spatial s in 0..15, channel c), so channel-c columns sit at s*c1 + c.
    cs = jnp.sum(y, axis=0, keepdims=True)                              # (1, 16*c1)
    cq = jnp.sum(y * y, axis=0, keepdims=True)
    s = None
    q = None
    for sp in range(16):                                                # static slices
        s_part = cs[:, sp * c1:(sp + 1) * c1]
        q_part = cq[:, sp * c1:(sp + 1) * c1]
        s = s_part if s is None else s + s_part
        q = q_part if q is None else q + q_part
    mean = s * inv_count                                                # (1, c1)
    var = jnp.maximum(q * inv_count - mean * mean, 0.0)
    scale = g_ref[...] * jax.lax.rsqrt(var + eps)
    shift = b_ref[...] - mean * scale
    scale_f = jnp.concatenate([scale] * 16, axis=1)                     # (1, 16*c1)
    shift_f = jnp.concatenate([shift] * 16, axis=1)
    o_ref[...] = jnp.maximum(y * scale_f + shift_f, 0.0).astype(o_ref.dtype)


def layer1_fused(annot, z2, embed_w, w1z, w1e, g1, b1, *, eps=_EPS):
    B = annot.shape[0]
    N = w1z.shape[1]                     # 16 * C1
    c1 = N // 16
    kern = functools.partial(_layer1_kernel, c1=c1,
                             inv_count=1.0 / float(16 * B), eps=eps)
    return pl.pallas_call(
        kern,
        out_shape=jax.ShapeDtypeStruct((B, N), jnp.bfloat16),
        grid=(1,),
        in_specs=[pl.BlockSpec(annot.shape, lambda i: (0, 0)),
                  pl.BlockSpec(z2.shape, lambda i: (0, 0)),
                  pl.BlockSpec(embed_w.shape, lambda i: (0, 0)),
                  pl.BlockSpec(w1z.shape, lambda i: (0, 0)),
                  pl.BlockSpec(w1e.shape, lambda i: (0, 0)),
                  pl.BlockSpec((1, c1), lambda i: (0, 0)),
                  pl.BlockSpec((1, c1), lambda i: (0, 0))],
        out_specs=pl.BlockSpec((B, N), lambda i: (0, 0)),
        compiler_params=_ARB,
    )(annot, z2, embed_w, w1z, w1e, g1, b1)


# --------------------------------------------------------------------------- #
# Kernel 2: merged-phase ConvTranspose GEMM + BatchNorm + ReLU (fused)
# --------------------------------------------------------------------------- #

def _convt_bn_relu_kernel(w_ref, p_ref, g_ref, b_ref, o_ref,
                          *, cout, inv_count, eps):
    # (4*Cout, 9*Cin) @ (9*Cin, M) with f32 MXU accumulation.
    acc = jnp.dot(w_ref[...], p_ref[...], preferred_element_type=jnp.float32)

    # Per-BN-channel stats: sum over M (lanes) and over the 4 phase row-groups
    # (static, sublane-aligned slices -> no cross-lane shuffles needed).
    s = None
    q = None
    for ph in range(4):
        blk = acc[ph * cout:(ph + 1) * cout, :]
        bs = jnp.sum(blk, axis=1, keepdims=True)
        bq = jnp.sum(blk * blk, axis=1, keepdims=True)
        s = bs if s is None else s + bs
        q = bq if q is None else q + bq
    mean = s * inv_count                                                 # (Cout, 1)
    var = jnp.maximum(q * inv_count - mean * mean, 0.0)
    scale = g_ref[...] * jax.lax.rsqrt(var + eps)
    shift = b_ref[...] - mean * scale

    # Normalize + ReLU the same f32 accumulator the stats came from.
    for ph in range(4):
        blk = acc[ph * cout:(ph + 1) * cout, :]
        o_ref[ph * cout:(ph + 1) * cout, :] = jnp.maximum(
            blk * scale + shift, 0.0).astype(o_ref.dtype)


def convt_bn_relu(w_m, patches, gamma, beta, *, eps=_EPS):
    R, K = w_m.shape                     # R = 4 * Cout
    K2, M = patches.shape
    assert K2 == K
    cout = R // 4
    kern = functools.partial(_convt_bn_relu_kernel, cout=cout,
                             inv_count=1.0 / float(4 * M), eps=eps)
    # TODO(synk): for much larger batches, tile M (two-pass grid) instead of a
    # single full-array block; at these sizes everything fits one VMEM block.
    return pl.pallas_call(
        kern,
        out_shape=jax.ShapeDtypeStruct((R, M), jnp.bfloat16),
        grid=(1,),
        in_specs=[pl.BlockSpec((R, K), lambda i: (0, 0)),
                  pl.BlockSpec((K, M), lambda i: (0, 0)),
                  pl.BlockSpec((cout, 1), lambda i: (0, 0)),
                  pl.BlockSpec((cout, 1), lambda i: (0, 0))],
        out_specs=pl.BlockSpec((R, M), lambda i: (0, 0)),
        compiler_params=_ARB,
    )(w_m, patches, gamma, beta)


# --------------------------------------------------------------------------- #
# Kernel 3: merged-phase ConvTranspose GEMM + tanh (final layer)
# --------------------------------------------------------------------------- #

def _convt_tanh_kernel(w_ref, p_ref, o_ref):
    acc = jnp.dot(w_ref[...], p_ref[...], preferred_element_type=jnp.float32)
    o_ref[...] = jnp.tanh(acc)


def convt_tanh(w_m, patches):
    R, K = w_m.shape
    _, M = patches.shape
    return pl.pallas_call(
        _convt_tanh_kernel,
        out_shape=jax.ShapeDtypeStruct((R, M), jnp.float32),
        grid=(1,),
        in_specs=[pl.BlockSpec((R, K), lambda i: (0, 0)),
                  pl.BlockSpec((K, M), lambda i: (0, 0))],
        out_specs=pl.BlockSpec((R, M), lambda i: (0, 0)),
        compiler_params=_ARB,
    )(w_m, patches)


# --------------------------------------------------------------------------- #
# JAX glue: im2col (3x3 tap union), pixel shuffle, weight packing (init-time)
# --------------------------------------------------------------------------- #

def convt_s2_patches9(x_cm):
    """x_cm: (C, B, H, W) channel-major -> (9*C, B*H*W) 3x3-tap patch matrix
    of the 1-padded input (covers all 4 output phases of the k=4,s=2,p=1
    transposed conv)."""
    C, B, H, W = x_cm.shape
    xp = jnp.pad(x_cm, ((0, 0), (0, 0), (1, 1), (1, 1)))
    taps = [xp[:, :, dy:dy + H, dx:dx + W] for dy in range(3) for dx in range(3)]
    return jnp.concatenate(taps, axis=0).reshape(9 * C, B * H * W)


def pixel_shuffle(y, cout, B, H, W):
    """(4*Cout, B*H*W) GEMM output, rows ordered (py, px, cout), columns
    (b, iy, ix)  ->  (Cout, B, 2H, 2W) channel-major."""
    y = y.reshape(2, 2, cout, B, H, W)
    y = y.transpose(2, 3, 4, 0, 5, 1)          # (c, b, iy, py, ix, px)
    return y.reshape(cout, B, 2 * H, 2 * W)


def pack_convt_s2_weight_merged(w):
    """(Cin, Cout, 4, 4) ConvTranspose2d weight -> merged (4*Cout, 9*Cin)
    matrix over the 3x3-tap union, zeros on taps a phase does not use."""
    cin, cout = w.shape[0], w.shape[1]
    # (phase_component, padded tap offset) -> kernel index; missing => unused.
    kmap = {(0, 0): 3, (0, 1): 1, (1, 1): 2, (1, 2): 0}
    rows = []
    for py in (0, 1):
        for px in (0, 1):
            blocks = []
            for dy in (0, 1, 2):
                for dx in (0, 1, 2):
                    if (py, dy) in kmap and (px, dx) in kmap:
                        blocks.append(w[:, :, kmap[(py, dy)], kmap[(px, dx)]].T)
                    else:
                        blocks.append(jnp.zeros((cout, cin), w.dtype))
            rows.append(jnp.concatenate(blocks, axis=1))     # (Cout, 9*Cin)
    return jnp.concatenate(rows, axis=0)                     # (4*Cout, 9*Cin)


def init_params(key, ngf, nz, embed_dims=40):
    """PyTorch-equivalent init; all GEMM weights pre-packed + bf16-cast ONCE."""
    ks = jax.random.split(key, 10)
    params = {}

    # nn.Linear(40, 40, bias=False), weight ~ N(0, 1); y = x @ W.T
    w_lin = jax.random.normal(ks[0], (embed_dims, 40), jnp.float32)
    params["embed_w"] = w_lin.T                                        # (40, 40)

    chans = [(nz + embed_dims, ngf * 8), (ngf * 8, ngf * 4),
             (ngf * 4, ngf * 2), (ngf * 2, ngf), (ngf, 3)]

    # Layer 1: ConvT(k=4, s=1, p=0) on a 1x1 input -> (Cin, 16*C1),
    # columns ordered (ky*4+kx, cout); split along K to avoid in-kernel concat.
    cin0, c1 = chans[0]
    w = 0.02 * jax.random.normal(ks[1], (cin0, c1, 4, 4), jnp.float32)
    w1 = w.transpose(0, 2, 3, 1).reshape(cin0, 16 * c1)
    params["w1z"] = w1[:nz].astype(jnp.bfloat16)
    params["w1e"] = w1[nz:].astype(jnp.bfloat16)
    g = 1.0 + 0.02 * jax.random.normal(ks[6], (c1,), jnp.float32)
    params["g1"] = g.reshape(1, c1)
    params["b1"] = jnp.zeros((1, c1), jnp.float32)

    # Layers 2-5: merged 3x3-tap phase-union weights.
    w_merged, bn = [], []
    for i, (cin, cout) in enumerate(chans[1:], start=1):
        w = 0.02 * jax.random.normal(ks[1 + i], (cin, cout, 4, 4), jnp.float32)
        w_merged.append(pack_convt_s2_weight_merged(w).astype(jnp.bfloat16))
        if i < 4:   # BatchNorm after layers 2-4 only
            g = 1.0 + 0.02 * jax.random.normal(ks[6 + i], (cout,), jnp.float32)
            bn.append((g.reshape(cout, 1), jnp.zeros((cout, 1), jnp.float32)))
    params["w_merged"] = w_merged
    params["bn"] = bn
    return params


# --------------------------------------------------------------------------- #
# Forward pass
# --------------------------------------------------------------------------- #

def cond_generator_forward(z, annot, params):
    """z: (B, nz, 1, 1), annot: (B, 40)  ->  (B, 3, 64, 64) float32."""
    B = z.shape[0]
    nz = z.shape[1]
    z2 = z.reshape(B, nz).astype(jnp.float32)
    a = annot.astype(jnp.float32)

    # Layer 1: embed + ConvT(4,1,0) + BN + ReLU, fully fused.
    y1 = layer1_fused(a, z2, params["embed_w"], params["w1z"], params["w1e"],
                      params["g1"], params["b1"])                   # (B, 16*C1)
    c1 = params["w1z"].shape[1] // 16
    x = y1.reshape(B, 4, 4, c1).transpose(3, 0, 1, 2)               # (C1, B, 4, 4)

    # Layers 2-4: merged-phase ConvT(4,2,1) + BN + ReLU, fused per layer.
    for li in range(3):
        C, Bc, H, W = x.shape
        patches = convt_s2_patches9(x)                              # (9C, B*H*W)
        g, b_ = params["bn"][li]
        y = convt_bn_relu(params["w_merged"][li], patches, g, b_)   # (4*Cout, M)
        cout = params["w_merged"][li].shape[0] // 4
        x = pixel_shuffle(y, cout, Bc, H, W)                        # (Cout,B,2H,2W)

    # Layer 5: merged-phase ConvT(4,2,1) + tanh (no BN).
    C, Bc, H, W = x.shape
    patches = convt_s2_patches9(x)
    y = convt_tanh(params["w_merged"][3], patches)                  # (12, M) f32
    out_cm = pixel_shuffle(y, 3, Bc, H, W)                          # (3, B, 64, 64)

    # TODO(synk): BatchNorm running-mean/var buffer updates (training-mode side
    # effect) are not modeled; normalization uses batch statistics, matching
    # PyTorch's train-mode forward value.
    return out_cm.transpose(1, 0, 2, 3)                             # (B, 3, 64, 64)


# --------------------------------------------------------------------------- #
# main
# --------------------------------------------------------------------------- #

if __name__ == "__main__":
    ngf, nz, B = 8, 16, 2
    key = jax.random.PRNGKey(0)
    k_params, k_z, k_a = jax.random.split(key, 3)

    params = init_params(k_params, ngf, nz)
    z = jax.random.normal(k_z, (B, nz, 1, 1), jnp.float32)
    annot = jax.random.normal(k_a, (B, 40), jnp.float32)

    fwd = jax.jit(cond_generator_forward)
    out = jax.block_until_ready(fwd(z, annot, params))

    assert out.shape == (B, 3, 64, 64), out.shape
    assert bool(jnp.all(jnp.isfinite(out)))
    print("KERNEL_OK")
</pallas_src>

<mosaic_0001>
module attributes {stable_mosaic.version = 11 : i64} {
  func.func @_layer1_kernel(%arg0: i32, %arg1: memref<2x40xf32, #tpu.memory_space<vmem>>, %arg2: memref<2x16xf32, #tpu.memory_space<vmem>>, %arg3: memref<40x40xf32, #tpu.memory_space<vmem>>, %arg4: memref<16x1024xbf16, #tpu.memory_space<vmem>>, %arg5: memref<40x1024xbf16, #tpu.memory_space<vmem>>, %arg6: memref<1x64xf32, #tpu.memory_space<vmem>>, %arg7: memref<1x64xf32, #tpu.memory_space<vmem>>, %arg8: memref<2x1024xbf16, #tpu.memory_space<vmem>>) attributes {dimension_semantics = [#tpu.dimension_semantics<arbitrary>], iteration_bounds = array<i64: 1>, scalar_prefetch = 0 : i64, scratch_operands = 0 : i64, tpu.core_type = #tpu.core_type<tc>, window_params = [{pipeline_mode = #tpu.pipeline_mode<synchronous>, transform_indices = @transform_0, window_bounds = array<i64: 2, 40>}, {pipeline_mode = #tpu.pipeline_mode<synchronous>, transform_indices = @transform_1, window_bounds = array<i64: 2, 16>}, {pipeline_mode = #tpu.pipeline_mode<synchronous>, transform_indices = @transform_2, window_bounds = array<i64: 40, 40>}, {pipeline_mode = #tpu.pipeline_mode<synchronous>, transform_indices = @transform_3, window_bounds = array<i64: 16, 1024>}, {pipeline_mode = #tpu.pipeline_mode<synchronous>, transform_indices = @transform_4, window_bounds = array<i64: 40, 1024>}, {pipeline_mode = #tpu.pipeline_mode<synchronous>, transform_indices = @transform_5, window_bounds = array<i64: 1, 64>}, {pipeline_mode = #tpu.pipeline_mode<synchronous>, transform_indices = @transform_6, window_bounds = array<i64: 1, 64>}, {pipeline_mode = #tpu.pipeline_mode<synchronous>, transform_indices = @transform_7, window_bounds = array<i64: 2, 1024>}]} {
    %c0 = arith.constant 0 : index
    %c0_0 = arith.constant 0 : index
    %0 = vector.load %arg1[%c0, %c0_0] : memref<2x40xf32, #tpu.memory_space<vmem>>, vector<2x40xf32>
    %cst = arith.constant dense<0xFF800000> : vector<2xf32>
    %1 = vector.multi_reduction <maximumf>, %0, %cst [1] : vector<2x40xf32> to vector<2xf32>
    %2 = vector.shape_cast %1 : vector<2xf32> to vector<2x1xf32>
    %3 = vector.broadcast %2 : vector<2x1xf32> to vector<2x40xf32>
    %4 = arith.subf %0, %3 : vector<2x40xf32>
    %5 = math.exp %4 : vector<2x40xf32>
    %cst_1 = arith.constant dense<0.000000e+00> : vector<2xf32>
    %6 = vector.multi_reduction <add>, %5, %cst_1 [1] : vector<2x40xf32> to vector<2xf32>
    %7 = vector.shape_cast %6 : vector<2xf32> to vector<2x1xf32>
    %8 = vector.broadcast %7 : vector<2x1xf32> to vector<2x40xf32>
    %9 = arith.divf %5, %8 : vector<2x40xf32>
    %c0_2 = arith.constant 0 : index
    %c0_3 = arith.constant 0 : index
    %10 = vector.load %arg3[%c0_2, %c0_3] : memref<40x40xf32, #tpu.memory_space<vmem>>, vector<40x40xf32>
    %cst_4 = arith.constant dense<0.000000e+00> : vector<2x40xf32>
    %11 = tpu.matmul %9, %10, %cst_4 {dimension_numbers = #tpu.dot_dimension_numbers<[1], [0], [0], [1], [0, 0, 1, 1], [], []>} : vector<2x40xf32>, vector<40x40xf32>, vector<2x40xf32> -> vector<2x40xf32>
    %c0_5 = arith.constant 0 : index
    %c0_6 = arith.constant 0 : index
    %12 = vector.load %arg2[%c0_5, %c0_6] : memref<2x16xf32, #tpu.memory_space<vmem>>, vector<2x16xf32>
    %13 = arith.truncf %12 : vector<2x16xf32> to vector<2x16xbf16>
    %c0_7 = arith.constant 0 : index
    %c0_8 = arith.constant 0 : index
    %14 = vector.load %arg4[%c0_7, %c0_8] : memref<16x1024xbf16, #tpu.memory_space<vmem>>, vector<16x1024xbf16>
    %cst_9 = arith.constant dense<0.000000e+00> : vector<2x1024xf32>
    %15 = tpu.matmul %13, %14, %cst_9 {dimension_numbers = #tpu.dot_dimension_numbers<[1], [0], [0], [1], [0, 0, 1, 1], [], []>} : vector<2x16xbf16>, vector<16x1024xbf16>, vector<2x1024xf32> -> vector<2x1024xf32>
    %16 = arith.truncf %11 : vector<2x40xf32> to vector<2x40xbf16>
    %c0_10 = arith.constant 0 : index
    %c0_11 = arith.constant 0 : index
    %17 = vector.load %arg5[%c0_10, %c0_11] : memref<40x1024xbf16, #tpu.memory_space<vmem>>, vector<40x1024xbf16>
    %cst_12 = arith.constant dense<0.000000e+00> : vector<2x1024xf32>
    %18 = tpu.matmul %16, %17, %cst_12 {dimension_numbers = #tpu.dot_dimension_numbers<[1], [0], [0], [1], [0, 0, 1, 1], [], []>} : vector<2x40xbf16>, vector<40x1024xbf16>, vector<2x1024xf32> -> vector<2x1024xf32>
    %19 = arith.addf %15, %18 : vector<2x1024xf32>
    %cst_13 = arith.constant dense<0.000000e+00> : vector<1024xf32>
    %20 = vector.multi_reduction <add>, %19, %cst_13 [0] : vector<2x1024xf32> to vector<1024xf32>
    %21 = vector.shape_cast %20 : vector<1024xf32> to vector<1x1024xf32>
    %22 = arith.mulf %19, %19 : vector<2x1024xf32>
    %cst_14 = arith.constant dense<0.000000e+00> : vector<1024xf32>
    %23 = vector.multi_reduction <add>, %22, %cst_14 [0] : vector<2x1024xf32> to vector<1024xf32>
    %24 = vector.shape_cast %23 : vector<1024xf32> to vector<1x1024xf32>
    %25 = vector.extract_strided_slice %21 {offsets = [0, 0], sizes = [1, 64], strides = [1, 1]} : vector<1x1024xf32> to vector<1x64xf32>
    %26 = vector.extract_strided_slice %24 {offsets = [0, 0], sizes = [1, 64], strides = [1, 1]} : vector<1x1024xf32> to vector<1x64xf32>
    %27 = vector.extract_strided_slice %21 {offsets = [0, 64], sizes = [1, 64], strides = [1, 1]} : vector<1x1024xf32> to vector<1x64xf32>
    %28 = vector.extract_strided_slice %24 {offsets = [0, 64], sizes = [1, 64], strides = [1, 1]} : vector<1x1024xf32> to vector<1x64xf32>
    %29 = arith.addf %25, %27 : vector<1x64xf32>
    %30 = arith.addf %26, %28 : vector<1x64xf32>
    %31 = vector.extract_strided_slice %21 {offsets = [0, 128], sizes = [1, 64], strides = [1, 1]} : vector<1x1024xf32> to vector<1x64xf32>
    %32 = vector.extract_strided_slice %24 {offsets = [0, 128], sizes = [1, 64], strides = [1, 1]} : vector<1x1024xf32> to vector<1x64xf32>
    %33 = arith.addf %29, %31 : vector<1x64xf32>
    %34 = arith.addf %30, %32 : vector<1x64xf32>
    %35 = vector.extract_strided_slice %21 {offsets = [0, 192], sizes = [1, 64], strides = [1, 1]} : vector<1x1024xf32> to vector<1x64xf32>
    %36 = vector.extract_strided_slice %24 {offsets = [0, 192], sizes = [1, 64], strides = [1, 1]} : vector<1x1024xf32> to vector<1x64xf32>
    %37 = arith.addf %33, %35 : vector<1x64xf32>
    %38 = arith.addf %34, %36 : vector<1x64xf32>
    %39 = vector.extract_strided_slice %21 {offsets = [0, 256], sizes = [1, 64], strides = [1, 1]} : vector<1x1024xf32> to vector<1x64xf32>
    %40 = vector.extract_strided_slice %24 {offsets = [0, 256], sizes = [1, 64], strides = [1, 1]} : vector<1x1024xf32> to vector<1x64xf32>
    %41 = arith.addf %37, %39 : vector<1x64xf32>
    %42 = arith.addf %38, %40 : vector<1x64xf32>
    %43 = vector.extract_strided_slice %21 {offsets = [0, 320], sizes = [1, 64], strides = [1, 1]} : vector<1x1024xf32> to vector<1x64xf32>
    %44 = vector.extract_strided_slice %24 {offsets = [0, 320], sizes = [1, 64], strides = [1, 1]} : vector<1x1024xf32> to vector<1x64xf32>
    %45 = arith.addf %41, %43 : vector<1x64xf32>
    %46 = arith.addf %42, %44 : vector<1x64xf32>
    %47 = vector.extract_strided_slice %21 {offsets = [0, 384], sizes = [1, 64], strides = [1, 1]} : vector<1x1024xf32> to vector<1x64xf32>
    %48 = vector.extract_strided_slice %24 {offsets = [0, 384], sizes = [1, 64], strides = [1, 1]} : vector<1x1024xf32> to vector<1x64xf32>
    %49 = arith.addf %45, %47 : vector<1x64xf32>
    %50 = arith.addf %46, %48 : vector<1x64xf32>
    %51 = vector.extract_strided_slice %21 {offsets = [0, 448], sizes = [1, 64], strides = [1, 1]} : vector<1x1024xf32> to vector<1x64xf32>
    %52 = vector.extract_strided_slice %24 {offsets = [0, 448], sizes = [1, 64], strides = [1, 1]} : vector<1x1024xf32> to vector<1x64xf32>
    %53 = arith.addf %49, %51 : vector<1x64xf32>
    %54 = arith.addf %50, %52 : vector<1x64xf32>
    %55 = vector.extract_strided_slice %21 {offsets = [0, 512], sizes = [1, 64], strides = [1, 1]} : vector<1x1024xf32> to vector<1x64xf32>
    %56 = vector.extract_strided_slice %24 {offsets = [0, 512], sizes = [1, 64], strides = [1, 1]} : vector<1x1024xf32> to vector<1x64xf32>
    %57 = arith.addf %53, %55 : vector<1x64xf32>
    %58 = arith.addf %54, %56 : vector<1x64xf32>
    %59 = vector.extract_strided_slice %21 {offsets = [0, 576], sizes = [1, 64], strides = [1, 1]} : vector<1x1024xf32> to vector<1x64xf32>
    %60 = vector.extract_strided_slice %24 {offsets = [0, 576], sizes = [1, 64], strides = [1, 1]} : vector<1x1024xf32> to vector<1x64xf32>
    %61 = arith.addf %57, %59 : vector<1x64xf32>
    %62 = arith.addf %58, %60 : vector<1x64xf32>
    %63 = vector.extract_strided_slice %21 {offsets = [0, 640], sizes = [1, 64], strides = [1, 1]} : vector<1x1024xf32> to vector<1x64xf32>
    %64 = vector.extract_strided_slice %24 {offsets = [0, 640], sizes = [1, 64], strides = [1, 1]} : vector<1x1024xf32> to vector<1x64xf32>
    %65 = arith.addf %61, %63 : vector<1x64xf32>
    %66 = arith.addf %62, %64 : vector<1x64xf32>
    %67 = vector.extract_strided_slice %21 {offsets = [0, 704], sizes = [1, 64], strides = [1, 1]} : vector<1x1024xf32> to vector<1x64xf32>
    %68 = vector.extract_strided_slice %24 {offsets = [0, 704], sizes = [1, 64], strides = [1, 1]} : vector<1x1024xf32> to vector<1x64xf32>
    %69 = arith.addf %65, %67 : vector<1x64xf32>
    %70 = arith.addf %66, %68 : vector<1x64xf32>
    %71 = vector.extract_strided_slice %21 {offsets = [0, 768], sizes = [1, 64], strides = [1, 1]} : vector<1x1024xf32> to vector<1x64xf32>
    %72 = vector.extract_strided_slice %24 {offsets = [0, 768], sizes = [1, 64], strides = [1, 1]} : vector<1x1024xf32> to vector<1x64xf32>
    %73 = arith.addf %69, %71 : vector<1x64xf32>
    %74 = arith.addf %70, %72 : vector<1x64xf32>
    %75 = vector.extract_strided_slice %21 {offsets = [0, 832], sizes = [1, 64], strides = [1, 1]} : vector<1x1024xf32> to vector<1x64xf32>
    %76 = vector.extract_strided_slice %24 {offsets = [0, 832], sizes = [1, 64], strides = [1, 1]} : vector<1x1024xf32> to vector<1x64xf32>
    %77 = arith.addf %73, %75 : vector<1x64xf32>
    %78 = arith.addf %74, %76 : vector<1x64xf32>
    %79 = vector.extract_strided_slice %21 {offsets = [0, 896], sizes = [1, 64], strides = [1, 1]} : vector<1x1024xf32> to vector<1x64xf32>
    %80 = vector.extract_strided_slice %24 {offsets = [0, 896], sizes = [1, 64], strides = [1, 1]} : vector<1x1024xf32> to vector<1x64xf32>
    %81 = arith.addf %77, %79 : vector<1x64xf32>
    %82 = arith.addf %78, %80 : vector<1x64xf32>
    %83 = vector.extract_strided_slice %21 {offsets = [0, 960], sizes = [1, 64], strides = [1, 1]} : vector<1x1024xf32> to vector<1x64xf32>
    %84 = vector.extract_strided_slice %24 {offsets = [0, 960], sizes = [1, 64], strides = [1, 1]} : vector<1x1024xf32> to vector<1x64xf32>
    %85 = arith.addf %81, %83 : vector<1x64xf32>
    %86 = arith.addf %82, %84 : vector<1x64xf32>
    %cst_15 = arith.constant 3.125000e-02 : f32
    %87 = vector.broadcast %cst_15 : f32 to vector<1x64xf32>
    %88 = arith.mulf %85, %87 : vector<1x64xf32>
    %cst_16 = arith.constant 3.125000e-02 : f32
    %89 = vector.broadcast %cst_16 : f32 to vector<1x64xf32>
    %90 = arith.mulf %86, %89 : vector<1x64xf32>
    %91 = arith.mulf %88, %88 : vector<1x64xf32>
    %92 = arith.subf %90, %91 : vector<1x64xf32>
    %cst_17 = arith.constant 0.000000e+00 : f32
    %93 = vector.broadcast %cst_17 : f32 to vector<1x64xf32>
    %94 = arith.maximumf %92, %93 : vector<1x64xf32>
    %c0_18 = arith.constant 0 : index
    %c0_19 = arith.constant 0 : index
    %95 = vector.load %arg6[%c0_18, %c0_19] : memref<1x64xf32, #tpu.memory_space<vmem>>, vector<1x64xf32>
    %cst_20 = arith.constant 9.99999974E-6 : f32
    %96 = vector.broadcast %cst_20 : f32 to vector<1x64xf32>
    %97 = arith.addf %94, %96 : vector<1x64xf32>
    %98 = math.rsqrt %97 : vector<1x64xf32>
    %99 = arith.mulf %95, %98 : vector<1x64xf32>
    %c0_21 = arith.constant 0 : index
    %c0_22 = arith.constant 0 : index
    %100 = vector.load %arg7[%c0_21, %c0_22] : memref<1x64xf32, #tpu.memory_space<vmem>>, vector<1x64xf32>
    %101 = arith.mulf %88, %99 : vector<1x64xf32>
    %102 = arith.subf %100, %101 : vector<1x64xf32>
    %103 = tpu.concatenate %99, %99, %99, %99, %99, %99, %99, %99, %99, %99, %99, %99, %99, %99, %99, %99 in 1 : vector<1x64xf32>, vector<1x64xf32>, vector<1x64xf32>, vector<1x64xf32>, vector<1x64xf32>, vector<1x64xf32>, vector<1x64xf32>, vector<1x64xf32>, vector<1x64xf32>, vector<1x64xf32>, vector<1x64xf32>, vector<1x64xf32>, vector<1x64xf32>, vector<1x64xf32>, vector<1x64xf32>, vector<1x64xf32> -> vector<1x1024xf32>
    %104 = tpu.concatenate %102, %102, %102, %102, %102, %102, %102, %102, %102, %102, %102, %102, %102, %102, %102, %102 in 1 : vector<1x64xf32>, vector<1x64xf32>, vector<1x64xf32>, vector<1x64xf32>, vector<1x64xf32>, vector<1x64xf32>, vector<1x64xf32>, vector<1x64xf32>, vector<1x64xf32>, vector<1x64xf32>, vector<1x64xf32>, vector<1x64xf32>, vector<1x64xf32>, vector<1x64xf32>, vector<1x64xf32>, vector<1x64xf32> -> vector<1x1024xf32>
    %105 = vector.broadcast %103 : vector<1x1024xf32> to vector<2x1024xf32>
    %106 = arith.mulf %19, %105 : vector<2x1024xf32>
    %107 = vector.broadcast %104 : vector<1x1024xf32> to vector<2x1024xf32>
    %108 = arith.addf %106, %107 : vector<2x1024xf32>
    %cst_23 = arith.constant 0.000000e+00 : f32
    %109 = vector.broadcast %cst_23 : f32 to vector<2x1024xf32>
    %110 = arith.maximumf %108, %109 : vector<2x1024xf32>
    %111 = arith.truncf %110 : vector<2x1024xf32> to vector<2x1024xbf16>
    %c0_24 = arith.constant 0 : index
    %c0_25 = arith.constant 0 : index
    %112 = vector.load %arg8[%c0_24, %c0_25] : memref<2x1024xbf16, #tpu.memory_space<vmem>>, vector<2x1024xbf16>
    tpu.vector_store %arg8[%c0_24, %c0_25], %111 {strides = array<i32>} : memref<2x1024xbf16, #tpu.memory_space<vmem>>, vector<2x1024xbf16>,
    return
  }
  func.func @transform_0(%arg0: i32) -> (i32, i32) {
    %c0_i32 = arith.constant 0 : i32
    %c0_i32_0 = arith.constant 0 : i32
    %c0_i32_1 = arith.constant 0 : i32
    return %c0_i32, %c0_i32_0 : i32, i32
  }
  func.func @transform_1(%arg0: i32) -> (i32, i32) {
    %c0_i32 = arith.constant 0 : i32
    %c0_i32_0 = arith.constant 0 : i32
    %c0_i32_1 = arith.constant 0 : i32
    return %c0_i32, %c0_i32_0 : i32, i32
  }
  func.func @transform_2(%arg0: i32) -> (i32, i32) {
    %c0_i32 = arith.constant 0 : i32
    %c0_i32_0 = arith.constant 0 : i32
    %c0_i32_1 = arith.constant 0 : i32
    return %c0_i32, %c0_i32_0 : i32, i32
  }
  func.func @transform_3(%arg0: i32) -> (i32, i32) {
    %c0_i32 = arith.constant 0 : i32
    %c0_i32_0 = arith.constant 0 : i32
    %c0_i32_1 = arith.constant 0 : i32
    return %c0_i32, %c0_i32_0 : i32, i32
  }
  func.func @transform_4(%arg0: i32) -> (i32, i32) {
    %c0_i32 = arith.constant 0 : i32
    %c0_i32_0 = arith.constant 0 : i32
    %c0_i32_1 = arith.constant 0 : i32
    return %c0_i32, %c0_i32_0 : i32, i32
  }
  func.func @transform_5(%arg0: i32) -> (i32, i32) {
    %c0_i32 = arith.constant 0 : i32
    %c0_i32_0 = arith.constant 0 : i32
    %c0_i32_1 = arith.constant 0 : i32
    return %c0_i32, %c0_i32_0 : i32, i32
  }
  func.func @transform_6(%arg0: i32) -> (i32, i32) {
    %c0_i32 = arith.constant 0 : i32
    %c0_i32_0 = arith.constant 0 : i32
    %c0_i32_1 = arith.constant 0 : i32
    return %c0_i32, %c0_i32_0 : i32, i32
  }
  func.func @transform_7(%arg0: i32) -> (i32, i32) {
    %c0_i32 = arith.constant 0 : i32
    %c0_i32_0 = arith.constant 0 : i32
    %c0_i32_1 = arith.constant 0 : i32
    return %c0_i32, %c0_i32_0 : i32, i32
  }
}

module attributes {stable_mosaic.version = 11 : i64} {
  func.func @_convt_bn_relu_kernel(%arg0: i32, %arg1: memref<128x576xbf16, #tpu.memory_space<vmem>>, %arg2: memref<576x32xbf16, #tpu.memory_space<vmem>>, %arg3: memref<32x1xf32, #tpu.memory_space<vmem>>, %arg4: memref<32x1xf32, #tpu.memory_space<vmem>>, %arg5: memref<128x32xbf16, #tpu.memory_space<vmem>>) attributes {dimension_semantics = [#tpu.dimension_semantics<arbitrary>], iteration_bounds = array<i64: 1>, scalar_prefetch = 0 : i64, scratch_operands = 0 : i64, tpu.core_type = #tpu.core_type<tc>, window_params = [{pipeline_mode = #tpu.pipeline_mode<synchronous>, transform_indices = @transform_0, window_bounds = array<i64: 128, 576>}, {pipeline_mode = #tpu.pipeline_mode<synchronous>, transform_indices = @transform_1, window_bounds = array<i64: 576, 32>}, {pipeline_mode = #tpu.pipeline_mode<synchronous>, transform_indices = @transform_2, window_bounds = array<i64: 32, 1>}, {pipeline_mode = #tpu.pipeline_mode<synchronous>, transform_indices = @transform_3, window_bounds = array<i64: 32, 1>}, {pipeline_mode = #tpu.pipeline_mode<synchronous>, transform_indices = @transform_4, window_bounds = array<i64: 128, 32>}]} {
    %c0 = arith.constant 0 : index
    %c0_0 = arith.constant 0 : index
    %0 = vector.load %arg1[%c0, %c0_0] : memref<128x576xbf16, #tpu.memory_space<vmem>>, vector<128x576xbf16>
    %c0_1 = arith.constant 0 : index
    %c0_2 = arith.constant 0 : index
    %1 = vector.load %arg2[%c0_1, %c0_2] : memref<576x32xbf16, #tpu.memory_space<vmem>>, vector<576x32xbf16>
    %cst = arith.constant dense<0.000000e+00> : vector<128x32xf32>
    %2 = tpu.matmul %0, %1, %cst {dimension_numbers = #tpu.dot_dimension_numbers<[1], [0], [0], [1], [0, 0, 1, 1], [], []>} : vector<128x576xbf16>, vector<576x32xbf16>, vector<128x32xf32> -> vector<128x32xf32>
    %3 = vector.extract_strided_slice %2 {offsets = [0, 0], sizes = [32, 32], strides = [1, 1]} : vector<128x32xf32> to vector<32x32xf32>
    %cst_3 = arith.constant dense<0.000000e+00> : vector<32xf32>
    %4 = vector.multi_reduction <add>, %3, %cst_3 [1] : vector<32x32xf32> to vector<32xf32>
    %5 = vector.shape_cast %4 : vector<32xf32> to vector<32x1xf32>
    %6 = arith.mulf %3, %3 : vector<32x32xf32>
    %cst_4 = arith.constant dense<0.000000e+00> : vector<32xf32>
    %7 = vector.multi_reduction <add>, %6, %cst_4 [1] : vector<32x32xf32> to vector<32xf32>
    %8 = vector.shape_cast %7 : vector<32xf32> to vector<32x1xf32>
    %9 = vector.extract_strided_slice %2 {offsets = [32, 0], sizes = [32, 32], strides = [1, 1]} : vector<128x32xf32> to vector<32x32xf32>
    %cst_5 = arith.constant dense<0.000000e+00> : vector<32xf32>
    %10 = vector.multi_reduction <add>, %9, %cst_5 [1] : vector<32x32xf32> to vector<32xf32>
    %11 = vector.shape_cast %10 : vector<32xf32> to vector<32x1xf32>
    %12 = arith.mulf %9, %9 : vector<32x32xf32>
    %cst_6 = arith.constant dense<0.000000e+00> : vector<32xf32>
    %13 = vector.multi_reduction <add>, %12, %cst_6 [1] : vector<32x32xf32> to vector<32xf32>
    %14 = vector.shape_cast %13 : vector<32xf32> to vector<32x1xf32>
    %15 = arith.addf %5, %11 : vector<32x1xf32>
    %16 = arith.addf %8, %14 : vector<32x1xf32>
    %17 = vector.extract_strided_slice %2 {offsets = [64, 0], sizes = [32, 32], strides = [1, 1]} : vector<128x32xf32> to vector<32x32xf32>
    %cst_7 = arith.constant dense<0.000000e+00> : vector<32xf32>
    %18 = vector.multi_reduction <add>, %17, %cst_7 [1] : vector<32x32xf32> to vector<32xf32>
    %19 = vector.shape_cast %18 : vector<32xf32> to vector<32x1xf32>
    %20 = arith.mulf %17, %17 : vector<32x32xf32>
    %cst_8 = arith.constant dense<0.000000e+00> : vector<32xf32>
    %21 = vector.multi_reduction <add>, %20, %cst_8 [1] : vector<32x32xf32> to vector<32xf32>
    %22 = vector.shape_cast %21 : vector<32xf32> to vector<32x1xf32>
    %23 = arith.addf %15, %19 : vector<32x1xf32>
    %24 = arith.addf %16, %22 : vector<32x1xf32>
    %25 = vector.extract_strided_slice %2 {offsets = [96, 0], sizes = [32, 32], strides = [1, 1]} : vector<128x32xf32> to vector<32x32xf32>
    %cst_9 = arith.constant dense<0.000000e+00> : vector<32xf32>
    %26 = vector.multi_reduction <add>, %25, %cst_9 [1] : vector<32x32xf32> to vector<32xf32>
    %27 = vector.shape_cast %26 : vector<32xf32> to vector<32x1xf32>
    %28 = arith.mulf %25, %25 : vector<32x32xf32>
    %cst_10 = arith.constant dense<0.000000e+00> : vector<32xf32>
    %29 = vector.multi_reduction <add>, %28, %cst_10 [1] : vector<32x32xf32> to vector<32xf32>
    %30 = vector.shape_cast %29 : vector<32xf32> to vector<32x1xf32>
    %31 = arith.addf %23, %27 : vector<32x1xf32>
    %32 = arith.addf %24, %30 : vector<32x1xf32>
    %cst_11 = arith.constant 7.812500e-03 : f32
    %33 = vector.broadcast %cst_11 : f32 to vector<32x1xf32>
    %34 = arith.mulf %31, %33 : vector<32x1xf32>
    %cst_12 = arith.constant 7.812500e-03 : f32
    %35 = vector.broadcast %cst_12 : f32 to vector<32x1xf32>
    %36 = arith.mulf %32, %35 : vector<32x1xf32>
    %37 = arith.mulf %34, %34 : vector<32x1xf32>
    %38 = arith.subf %36, %37 : vector<32x1xf32>
    %cst_13 = arith.constant 0.000000e+00 : f32
    %39 = vector.broadcast %cst_13 : f32 to vector<32x1xf32>
    %40 = arith.maximumf %38, %39 : vector<32x1xf32>
    %c0_14 = arith.constant 0 : index
    %c0_15 = arith.constant 0 : index
    %41 = vector.load %arg3[%c0_14, %c0_15] : memref<32x1xf32, #tpu.memory_space<vmem>>, vector<32x1xf32>
    %cst_16 = arith.constant 9.99999974E-6 : f32
    %42 = vector.broadcast %cst_16 : f32 to vector<32x1xf32>
    %43 = arith.addf %40, %42 : vector<32x1xf32>
    %44 = math.rsqrt %43 : vector<32x1xf32>
    %45 = arith.mulf %41, %44 : vector<32x1xf32>
    %c0_17 = arith.constant 0 : index
    %c0_18 = arith.constant 0 : index
    %46 = vector.load %arg4[%c0_17, %c0_18] : memref<32x1xf32, #tpu.memory_space<vmem>>, vector<32x1xf32>
    %47 = arith.mulf %34, %45 : vector<32x1xf32>
    %48 = arith.subf %46, %47 : vector<32x1xf32>
    %49 = vector.extract_strided_slice %2 {offsets = [0, 0], sizes = [32, 32], strides = [1, 1]} : vector<128x32xf32> to vector<32x32xf32>
    %50 = vector.broadcast %45 : vector<32x1xf32> to vector<32x32xf32>
    %51 = arith.mulf %49, %50 : vector<32x32xf32>
    %52 = vector.broadcast %48 : vector<32x1xf32> to vector<32x32xf32>
    %53 = arith.addf %51, %52 : vector<32x32xf32>
    %cst_19 = arith.constant 0.000000e+00 : f32
    %54 = vector.broadcast %cst_19 : f32 to vector<32x32xf32>
    %55 = arith.maximumf %53, %54 : vector<32x32xf32>
    %56 = arith.truncf %55 : vector<32x32xf32> to vector<32x32xbf16>
    %c0_20 = arith.constant 0 : index
    %c0_21 = arith.constant 0 : index
    %57 = vector.load %arg5[%c0_20, %c0_21] : memref<128x32xbf16, #tpu.memory_space<vmem>>, vector<32x32xbf16>
    tpu.vector_store %arg5[%c0_20, %c0_21], %56 {strides = array<i32>} : memref<128x32xbf16, #tpu.memory_space<vmem>>, vector<32x32xbf16>,
    %58 = vector.extract_strided_slice %2 {offsets = [32, 0], sizes = [32, 32], strides = [1, 1]} : vector<128x32xf32> to vector<32x32xf32>
    %59 = vector.broadcast %45 : vector<32x1xf32> to vector<32x32xf32>
    %60 = arith.mulf %58, %59 : vector<32x32xf32>
    %61 = vector.broadcast %48 : vector<32x1xf32> to vector<32x32xf32>
    %62 = arith.addf %60, %61 : vector<32x32xf32>
    %cst_22 = arith.constant 0.000000e+00 : f32
    %63 = vector.broadcast %cst_22 : f32 to vector<32x32xf32>
    %64 = arith.maximumf %62, %63 : vector<32x32xf32>
    %65 = arith.truncf %64 : vector<32x32xf32> to vector<32x32xbf16>
    %c32 = arith.constant 32 : index
    %c0_23 = arith.constant 0 : index
    %66 = vector.load %arg5[%c32, %c0_23] : memref<128x32xbf16, #tpu.memory_space<vmem>>, vector<32x32xbf16>
    tpu.vector_store %arg5[%c32, %c0_23], %65 {strides = array<i32>} : memref<128x32xbf16, #tpu.memory_space<vmem>>, vector<32x32xbf16>,
    %67 = vector.extract_strided_slice %2 {offsets = [64, 0], sizes = [32, 32], strides = [1, 1]} : vector<128x32xf32> to vector<32x32xf32>
    %68 = vector.broadcast %45 : vector<32x1xf32> to vector<32x32xf32>
    %69 = arith.mulf %67, %68 : vector<32x32xf32>
    %70 = vector.broadcast %48 : vector<32x1xf32> to vector<32x32xf32>
    %71 = arith.addf %69, %70 : vector<32x32xf32>
    %cst_24 = arith.constant 0.000000e+00 : f32
    %72 = vector.broadcast %cst_24 : f32 to vector<32x32xf32>
    %73 = arith.maximumf %71, %72 : vector<32x32xf32>
    %74 = arith.truncf %73 : vector<32x32xf32> to vector<32x32xbf16>
    %c64 = arith.constant 64 : index
    %c0_25 = arith.constant 0 : index
    %75 = vector.load %arg5[%c64, %c0_25] : memref<128x32xbf16, #tpu.memory_space<vmem>>, vector<32x32xbf16>
    tpu.vector_store %arg5[%c64, %c0_25], %74 {strides = array<i32>} : memref<128x32xbf16, #tpu.memory_space<vmem>>, vector<32x32xbf16>,
    %76 = vector.extract_strided_slice %2 {offsets = [96, 0], sizes = [32, 32], strides = [1, 1]} : vector<128x32xf32> to vector<32x32xf32>
    %77 = vector.broadcast %45 : vector<32x1xf32> to vector<32x32xf32>
    %78 = arith.mulf %76, %77 : vector<32x32xf32>
    %79 = vector.broadcast %48 : vector<32x1xf32> to vector<32x32xf32>
    %80 = arith.addf %78, %79 : vector<32x32xf32>
    %cst_26 = arith.constant 0.000000e+00 : f32
    %81 = vector.broadcast %cst_26 : f32 to vector<32x32xf32>
    %82 = arith.maximumf %80, %81 : vector<32x32xf32>
    %83 = arith.truncf %82 : vector<32x32xf32> to vector<32x32xbf16>
    %c96 = arith.constant 96 : index
    %c0_27 = arith.constant 0 : index
    %84 = vector.load %arg5[%c96, %c0_27] : memref<128x32xbf16, #tpu.memory_space<vmem>>, vector<32x32xbf16>
    tpu.vector_store %arg5[%c96, %c0_27], %83 {strides = array<i32>} : memref<128x32xbf16, #tpu.memory_space<vmem>>, vector<32x32xbf16>,
    return
  }
  func.func @transform_0(%arg0: i32) -> (i32, i32) {
    %c0_i32 = arith.constant 0 : i32
    %c0_i32_0 = arith.constant 0 : i32
    %c0_i32_1 = arith.constant 0 : i32
    return %c0_i32, %c0_i32_0 : i32, i32
  }
  func.func @transform_1(%arg0: i32) -> (i32, i32) {
    %c0_i32 = arith.constant 0 : i32
    %c0_i32_0 = arith.constant 0 : i32
    %c0_i32_1 = arith.constant 0 : i32
    return %c0_i32, %c0_i32_0 : i32, i32
  }
  func.func @transform_2(%arg0: i32) -> (i32, i32) {
    %c0_i32 = arith.constant 0 : i32
    %c0_i32_0 = arith.constant 0 : i32
    %c0_i32_1 = arith.constant 0 : i32
    return %c0_i32, %c0_i32_0 : i32, i32
  }
  func.func @transform_3(%arg0: i32) -> (i32, i32) {
    %c0_i32 = arith.constant 0 : i32
    %c0_i32_0 = arith.constant 0 : i32
    %c0_i32_1 = arith.constant 0 : i32
    return %c0_i32, %c0_i32_0 : i32, i32
  }
  func.func @transform_4(%arg0: i32) -> (i32, i32) {
    %c0_i32 = arith.constant 0 : i32
    %c0_i32_0 = arith.constant 0 : i32
    %c0_i32_1 = arith.constant 0 : i32
    return %c0_i32, %c0_i32_0 : i32, i32
  }
}

module attributes {stable_mosaic.version = 11 : i64} {
  func.func @_convt_bn_relu_kernel(%arg0: i32, %arg1: memref<64x288xbf16, #tpu.memory_space<vmem>>, %arg2: memref<288x128xbf16, #tpu.memory_space<vmem>>, %arg3: memref<16x1xf32, #tpu.memory_space<vmem>>, %arg4: memref<16x1xf32, #tpu.memory_space<vmem>>, %arg5: memref<64x128xbf16, #tpu.memory_space<vmem>>) attributes {dimension_semantics = [#tpu.dimension_semantics<arbitrary>], iteration_bounds = array<i64: 1>, scalar_prefetch = 0 : i64, scratch_operands = 0 : i64, tpu.core_type = #tpu.core_type<tc>, window_params = [{pipeline_mode = #tpu.pipeline_mode<synchronous>, transform_indices = @transform_0, window_bounds = array<i64: 64, 288>}, {pipeline_mode = #tpu.pipeline_mode<synchronous>, transform_indices = @transform_1, window_bounds = array<i64: 288, 128>}, {pipeline_mode = #tpu.pipeline_mode<synchronous>, transform_indices = @transform_2, window_bounds = array<i64: 16, 1>}, {pipeline_mode = #tpu.pipeline_mode<synchronous>, transform_indices = @transform_3, window_bounds = array<i64: 16, 1>}, {pipeline_mode = #tpu.pipeline_mode<synchronous>, transform_indices = @transform_4, window_bounds = array<i64: 64, 128>}]} {
    %c0 = arith.constant 0 : index
    %c0_0 = arith.constant 0 : index
    %0 = vector.load %arg1[%c0, %c0_0] : memref<64x288xbf16, #tpu.memory_space<vmem>>, vector<64x288xbf16>
    %c0_1 = arith.constant 0 : index
    %c0_2 = arith.constant 0 : index
    %1 = vector.load %arg2[%c0_1, %c0_2] : memref<288x128xbf16, #tpu.memory_space<vmem>>, vector<288x128xbf16>
    %cst = arith.constant dense<0.000000e+00> : vector<64x128xf32>
    %2 = tpu.matmul %0, %1, %cst {dimension_numbers = #tpu.dot_dimension_numbers<[1], [0], [0], [1], [0, 0, 1, 1], [], []>} : vector<64x288xbf16>, vector<288x128xbf16>, vector<64x128xf32> -> vector<64x128xf32>
    %3 = vector.extract_strided_slice %2 {offsets = [0, 0], sizes = [16, 128], strides = [1, 1]} : vector<64x128xf32> to vector<16x128xf32>
    %cst_3 = arith.constant dense<0.000000e+00> : vector<16xf32>
    %4 = vector.multi_reduction <add>, %3, %cst_3 [1] : vector<16x128xf32> to vector<16xf32>
    %5 = vector.shape_cast %4 : vector<16xf32> to vector<16x1xf32>
    %6 = arith.mulf %3, %3 : vector<16x128xf32>
    %cst_4 = arith.constant dense<0.000000e+00> : vector<16xf32>
    %7 = vector.multi_reduction <add>, %6, %cst_4 [1] : vector<16x128xf32> to vector<16xf32>
    %8 = vector.shape_cast %7 : vector<16xf32> to vector<16x1xf32>
    %9 = vector.extract_strided_slice %2 {offsets = [16, 0], sizes = [16, 128], strides = [1, 1]} : vector<64x128xf32> to vector<16x128xf32>
    %cst_5 = arith.constant dense<0.000000e+00> : vector<16xf32>
    %10 = vector.multi_reduction <add>, %9, %cst_5 [1] : vector<16x128xf32> to vector<16xf32>
    %11 = vector.shape_cast %10 : vector<16xf32> to vector<16x1xf32>
    %12 = arith.mulf %9, %9 : vector<16x128xf32>
    %cst_6 = arith.constant dense<0.000000e+00> : vector<16xf32>
    %13 = vector.multi_reduction <add>, %12, %cst_6 [1] : vector<16x128xf32> to vector<16xf32>
    %14 = vector.shape_cast %13 : vector<16xf32> to vector<16x1xf32>
    %15 = arith.addf %5, %11 : vector<16x1xf32>
    %16 = arith.addf %8, %14 : vector<16x1xf32>
    %17 = vector.extract_strided_slice %2 {offsets = [32, 0], sizes = [16, 128], strides = [1, 1]} : vector<64x128xf32> to vector<16x128xf32>
    %cst_7 = arith.constant dense<0.000000e+00> : vector<16xf32>
    %18 = vector.multi_reduction <add>, %17, %cst_7 [1] : vector<16x128xf32> to vector<16xf32>
    %19 = vector.shape_cast %18 : vector<16xf32> to vector<16x1xf32>
    %20 = arith.mulf %17, %17 : vector<16x128xf32>
    %cst_8 = arith.constant dense<0.000000e+00> : vector<16xf32>
    %21 = vector.multi_reduction <add>, %20, %cst_8 [1] : vector<16x128xf32> to vector<16xf32>
    %22 = vector.shape_cast %21 : vector<16xf32> to vector<16x1xf32>
    %23 = arith.addf %15, %19 : vector<16x1xf32>
    %24 = arith.addf %16, %22 : vector<16x1xf32>
    %25 = vector.extract_strided_slice %2 {offsets = [48, 0], sizes = [16, 128], strides = [1, 1]} : vector<64x128xf32> to vector<16x128xf32>
    %cst_9 = arith.constant dense<0.000000e+00> : vector<16xf32>
    %26 = vector.multi_reduction <add>, %25, %cst_9 [1] : vector<16x128xf32> to vector<16xf32>
    %27 = vector.shape_cast %26 : vector<16xf32> to vector<16x1xf32>
    %28 = arith.mulf %25, %25 : vector<16x128xf32>
    %cst_10 = arith.constant dense<0.000000e+00> : vector<16xf32>
    %29 = vector.multi_reduction <add>, %28, %cst_10 [1] : vector<16x128xf32> to vector<16xf32>
    %30 = vector.shape_cast %29 : vector<16xf32> to vector<16x1xf32>
    %31 = arith.addf %23, %27 : vector<16x1xf32>
    %32 = arith.addf %24, %30 : vector<16x1xf32>
    %cst_11 = arith.constant 0.001953125 : f32
    %33 = vector.broadcast %cst_11 : f32 to vector<16x1xf32>
    %34 = arith.mulf %31, %33 : vector<16x1xf32>
    %cst_12 = arith.constant 0.001953125 : f32
    %35 = vector.broadcast %cst_12 : f32 to vector<16x1xf32>
    %36 = arith.mulf %32, %35 : vector<16x1xf32>
    %37 = arith.mulf %34, %34 : vector<16x1xf32>
    %38 = arith.subf %36, %37 : vector<16x1xf32>
    %cst_13 = arith.constant 0.000000e+00 : f32
    %39 = vector.broadcast %cst_13 : f32 to vector<16x1xf32>
    %40 = arith.maximumf %38, %39 : vector<16x1xf32>
    %c0_14 = arith.constant 0 : index
    %c0_15 = arith.constant 0 : index
    %41 = vector.load %arg3[%c0_14, %c0_15] : memref<16x1xf32, #tpu.memory_space<vmem>>, vector<16x1xf32>
    %cst_16 = arith.constant 9.99999974E-6 : f32
    %42 = vector.broadcast %cst_16 : f32 to vector<16x1xf32>
    %43 = arith.addf %40, %42 : vector<16x1xf32>
    %44 = math.rsqrt %43 : vector<16x1xf32>
    %45 = arith.mulf %41, %44 : vector<16x1xf32>
    %c0_17 = arith.constant 0 : index
    %c0_18 = arith.constant 0 : index
    %46 = vector.load %arg4[%c0_17, %c0_18] : memref<16x1xf32, #tpu.memory_space<vmem>>, vector<16x1xf32>
    %47 = arith.mulf %34, %45 : vector<16x1xf32>
    %48 = arith.subf %46, %47 : vector<16x1xf32>
    %49 = vector.extract_strided_slice %2 {offsets = [0, 0], sizes = [16, 128], strides = [1, 1]} : vector<64x128xf32> to vector<16x128xf32>
    %50 = vector.broadcast %45 : vector<16x1xf32> to vector<16x128xf32>
    %51 = arith.mulf %49, %50 : vector<16x128xf32>
    %52 = vector.broadcast %48 : vector<16x1xf32> to vector<16x128xf32>
    %53 = arith.addf %51, %52 : vector<16x128xf32>
    %cst_19 = arith.constant 0.000000e+00 : f32
    %54 = vector.broadcast %cst_19 : f32 to vector<16x128xf32>
    %55 = arith.maximumf %53, %54 : vector<16x128xf32>
    %56 = arith.truncf %55 : vector<16x128xf32> to vector<16x128xbf16>
    %c0_20 = arith.constant 0 : index
    %c0_21 = arith.constant 0 : index
    %57 = vector.load %arg5[%c0_20, %c0_21] : memref<64x128xbf16, #tpu.memory_space<vmem>>, vector<16x128xbf16>
    tpu.vector_store %arg5[%c0_20, %c0_21], %56 {strides = array<i32>} : memref<64x128xbf16, #tpu.memory_space<vmem>>, vector<16x128xbf16>,
    %58 = vector.extract_strided_slice %2 {offsets = [16, 0], sizes = [16, 128], strides = [1, 1]} : vector<64x128xf32> to vector<16x128xf32>
    %59 = vector.broadcast %45 : vector<16x1xf32> to vector<16x128xf32>
    %60 = arith.mulf %58, %59 : vector<16x128xf32>
    %61 = vector.broadcast %48 : vector<16x1xf32> to vector<16x128xf32>
    %62 = arith.addf %60, %61 : vector<16x128xf32>
    %cst_22 = arith.constant 0.000000e+00 : f32
    %63 = vector.broadcast %cst_22 : f32 to vector<16x128xf32>
    %64 = arith.maximumf %62, %63 : vector<16x128xf32>
    %65 = arith.truncf %64 : vector<16x128xf32> to vector<16x128xbf16>
    %c16 = arith.constant 16 : index
    %c0_23 = arith.constant 0 : index
    %66 = vector.load %arg5[%c16, %c0_23] : memref<64x128xbf16, #tpu.memory_space<vmem>>, vector<16x128xbf16>
    tpu.vector_store %arg5[%c16, %c0_23], %65 {strides = array<i32>} : memref<64x128xbf16, #tpu.memory_space<vmem>>, vector<16x128xbf16>,
    %67 = vector.extract_strided_slice %2 {offsets = [32, 0], sizes = [16, 128], strides = [1, 1]} : vector<64x128xf32> to vector<16x128xf32>
    %68 = vector.broadcast %45 : vector<16x1xf32> to vector<16x128xf32>
    %69 = arith.mulf %67, %68 : vector<16x128xf32>
    %70 = vector.broadcast %48 : vector<16x1xf32> to vector<16x128xf32>
    %71 = arith.addf %69, %70 : vector<16x128xf32>
    %cst_24 = arith.constant 0.000000e+00 : f32
    %72 = vector.broadcast %cst_24 : f32 to vector<16x128xf32>
    %73 = arith.maximumf %71, %72 : vector<16x128xf32>
    %74 = arith.truncf %73 : vector<16x128xf32> to vector<16x128xbf16>
    %c32 = arith.constant 32 : index
    %c0_25 = arith.constant 0 : index
    %75 = vector.load %arg5[%c32, %c0_25] : memref<64x128xbf16, #tpu.memory_space<vmem>>, vector<16x128xbf16>
    tpu.vector_store %arg5[%c32, %c0_25], %74 {strides = array<i32>} : memref<64x128xbf16, #tpu.memory_space<vmem>>, vector<16x128xbf16>,
    %76 = vector.extract_strided_slice %2 {offsets = [48, 0], sizes = [16, 128], strides = [1, 1]} : vector<64x128xf32> to vector<16x128xf32>
    %77 = vector.broadcast %45 : vector<16x1xf32> to vector<16x128xf32>
    %78 = arith.mulf %76, %77 : vector<16x128xf32>
    %79 = vector.broadcast %48 : vector<16x1xf32> to vector<16x128xf32>
    %80 = arith.addf %78, %79 : vector<16x128xf32>
    %cst_26 = arith.constant 0.000000e+00 : f32
    %81 = vector.broadcast %cst_26 : f32 to vector<16x128xf32>
    %82 = arith.maximumf %80, %81 : vector<16x128xf32>
    %83 = arith.truncf %82 : vector<16x128xf32> to vector<16x128xbf16>
    %c48 = arith.constant 48 : index
    %c0_27 = arith.constant 0 : index
    %84 = vector.load %arg5[%c48, %c0_27] : memref<64x128xbf16, #tpu.memory_space<vmem>>, vector<16x128xbf16>
    tpu.vector_store %arg5[%c48, %c0_27], %83 {strides = array<i32>} : memref<64x128xbf16, #tpu.memory_space<vmem>>, vector<16x128xbf16>,
    return
  }
  func.func @transform_0(%arg0: i32) -> (i32, i32) {
    %c0_i32 = arith.constant 0 : i32
    %c0_i32_0 = arith.constant 0 : i32
    %c0_i32_1 = arith.constant 0 : i32
    return %c0_i32, %c0_i32_0 : i32, i32
  }
  func.func @transform_1(%arg0: i32) -> (i32, i32) {
    %c0_i32 = arith.constant 0 : i32
    %c0_i32_0 = arith.constant 0 : i32
    %c0_i32_1 = arith.constant 0 : i32
    return %c0_i32, %c0_i32_0 : i32, i32
  }
  func.func @transform_2(%arg0: i32) -> (i32, i32) {
    %c0_i32 = arith.constant 0 : i32
    %c0_i32_0 = arith.constant 0 : i32
    %c0_i32_1 = arith.constant 0 : i32
    return %c0_i32, %c0_i32_0 : i32, i32
  }
  func.func @transform_3(%arg0: i32) -> (i32, i32) {
    %c0_i32 = arith.constant 0 : i32
    %c0_i32_0 = arith.constant 0 : i32
    %c0_i32_1 = arith.constant 0 : i32
    return %c0_i32, %c0_i32_0 : i32, i32
  }
  func.func @transform_4(%arg0: i32) -> (i32, i32) {
    %c0_i32 = arith.constant 0 : i32
    %c0_i32_0 = arith.constant 0 : i32
    %c0_i32_1 = arith.constant 0 : i32
    return %c0_i32, %c0_i32_0 : i32, i32
  }
}

module attributes {stable_mosaic.version = 11 : i64} {
  func.func @_convt_bn_relu_kernel(%arg0: i32, %arg1: memref<32x144xbf16, #tpu.memory_space<vmem>>, %arg2: memref<144x512xbf16, #tpu.memory_space<vmem>>, %arg3: memref<8x1xf32, #tpu.memory_space<vmem>>, %arg4: memref<8x1xf32, #tpu.memory_space<vmem>>, %arg5: memref<32x512xbf16, #tpu.memory_space<vmem>>) attributes {dimension_semantics = [#tpu.dimension_semantics<arbitrary>], iteration_bounds = array<i64: 1>, scalar_prefetch = 0 : i64, scratch_operands = 0 : i64, tpu.core_type = #tpu.core_type<tc>, window_params = [{pipeline_mode = #tpu.pipeline_mode<synchronous>, transform_indices = @transform_0, window_bounds = array<i64: 32, 144>}, {pipeline_mode = #tpu.pipeline_mode<synchronous>, transform_indices = @transform_1, window_bounds = array<i64: 144, 512>}, {pipeline_mode = #tpu.pipeline_mode<synchronous>, transform_indices = @transform_2, window_bounds = array<i64: 8, 1>}, {pipeline_mode = #tpu.pipeline_mode<synchronous>, transform_indices = @transform_3, window_bounds = array<i64: 8, 1>}, {pipeline_mode = #tpu.pipeline_mode<synchronous>, transform_indices = @transform_4, window_bounds = array<i64: 32, 512>}]} {
    %c0 = arith.constant 0 : index
    %c0_0 = arith.constant 0 : index
    %0 = vector.load %arg1[%c0, %c0_0] : memref<32x144xbf16, #tpu.memory_space<vmem>>, vector<32x144xbf16>
    %c0_1 = arith.constant 0 : index
    %c0_2 = arith.constant 0 : index
    %1 = vector.load %arg2[%c0_1, %c0_2] : memref<144x512xbf16, #tpu.memory_space<vmem>>, vector<144x512xbf16>
    %cst = arith.constant dense<0.000000e+00> : vector<32x512xf32>
    %2 = tpu.matmul %0, %1, %cst {dimension_numbers = #tpu.dot_dimension_numbers<[1], [0], [0], [1], [0, 0, 1, 1], [], []>} : vector<32x144xbf16>, vector<144x512xbf16>, vector<32x512xf32> -> vector<32x512xf32>
    %3 = vector.extract_strided_slice %2 {offsets = [0, 0], sizes = [8, 512], strides = [1, 1]} : vector<32x512xf32> to vector<8x512xf32>
    %cst_3 = arith.constant dense<0.000000e+00> : vector<8xf32>
    %4 = vector.multi_reduction <add>, %3, %cst_3 [1] : vector<8x512xf32> to vector<8xf32>
    %5 = vector.shape_cast %4 : vector<8xf32> to vector<8x1xf32>
    %6 = arith.mulf %3, %3 : vector<8x512xf32>
    %cst_4 = arith.constant dense<0.000000e+00> : vector<8xf32>
    %7 = vector.multi_reduction <add>, %6, %cst_4 [1] : vector<8x512xf32> to vector<8xf32>
    %8 = vector.shape_cast %7 : vector<8xf32> to vector<8x1xf32>
    %9 = vector.extract_strided_slice %2 {offsets = [8, 0], sizes = [8, 512], strides = [1, 1]} : vector<32x512xf32> to vector<8x512xf32>
    %cst_5 = arith.constant dense<0.000000e+00> : vector<8xf32>
    %10 = vector.multi_reduction <add>, %9, %cst_5 [1] : vector<8x512xf32> to vector<8xf32>
    %11 = vector.shape_cast %10 : vector<8xf32> to vector<8x1xf32>
    %12 = arith.mulf %9, %9 : vector<8x512xf32>
    %cst_6 = arith.constant dense<0.000000e+00> : vector<8xf32>
    %13 = vector.multi_reduction <add>, %12, %cst_6 [1] : vector<8x512xf32> to vector<8xf32>
    %14 = vector.shape_cast %13 : vector<8xf32> to vector<8x1xf32>
    %15 = arith.addf %5, %11 : vector<8x1xf32>
    %16 = arith.addf %8, %14 : vector<8x1xf32>
    %17 = vector.extract_strided_slice %2 {offsets = [16, 0], sizes = [8, 512], strides = [1, 1]} : vector<32x512xf32> to vector<8x512xf32>
    %cst_7 = arith.constant dense<0.000000e+00> : vector<8xf32>
    %18 = vector.multi_reduction <add>, %17, %cst_7 [1] : vector<8x512xf32> to vector<8xf32>
    %19 = vector.shape_cast %18 : vector<8xf32> to vector<8x1xf32>
    %20 = arith.mulf %17, %17 : vector<8x512xf32>
    %cst_8 = arith.constant dense<0.000000e+00> : vector<8xf32>
    %21 = vector.multi_reduction <add>, %20, %cst_8 [1] : vector<8x512xf32> to vector<8xf32>
    %22 = vector.shape_cast %21 : vector<8xf32> to vector<8x1xf32>
    %23 = arith.addf %15, %19 : vector<8x1xf32>
    %24 = arith.addf %16, %22 : vector<8x1xf32>
    %25 = vector.extract_strided_slice %2 {offsets = [24, 0], sizes = [8, 512], strides = [1, 1]} : vector<32x512xf32> to vector<8x512xf32>
    %cst_9 = arith.constant dense<0.000000e+00> : vector<8xf32>
    %26 = vector.multi_reduction <add>, %25, %cst_9 [1] : vector<8x512xf32> to vector<8xf32>
    %27 = vector.shape_cast %26 : vector<8xf32> to vector<8x1xf32>
    %28 = arith.mulf %25, %25 : vector<8x512xf32>
    %cst_10 = arith.constant dense<0.000000e+00> : vector<8xf32>
    %29 = vector.multi_reduction <add>, %28, %cst_10 [1] : vector<8x512xf32> to vector<8xf32>
    %30 = vector.shape_cast %29 : vector<8xf32> to vector<8x1xf32>
    %31 = arith.addf %23, %27 : vector<8x1xf32>
    %32 = arith.addf %24, %30 : vector<8x1xf32>
    %cst_11 = arith.constant 4.8828125E-4 : f32
    %33 = vector.broadcast %cst_11 : f32 to vector<8x1xf32>
    %34 = arith.mulf %31, %33 : vector<8x1xf32>
    %cst_12 = arith.constant 4.8828125E-4 : f32
    %35 = vector.broadcast %cst_12 : f32 to vector<8x1xf32>
    %36 = arith.mulf %32, %35 : vector<8x1xf32>
    %37 = arith.mulf %34, %34 : vector<8x1xf32>
    %38 = arith.subf %36, %37 : vector<8x1xf32>
    %cst_13 = arith.constant 0.000000e+00 : f32
    %39 = vector.broadcast %cst_13 : f32 to vector<8x1xf32>
    %40 = arith.maximumf %38, %39 : vector<8x1xf32>
    %c0_14 = arith.constant 0 : index
    %c0_15 = arith.constant 0 : index
    %41 = vector.load %arg3[%c0_14, %c0_15] : memref<8x1xf32, #tpu.memory_space<vmem>>, vector<8x1xf32>
    %cst_16 = arith.constant 9.99999974E-6 : f32
    %42 = vector.broadcast %cst_16 : f32 to vector<8x1xf32>
    %43 = arith.addf %40, %42 : vector<8x1xf32>
    %44 = math.rsqrt %43 : vector<8x1xf32>
    %45 = arith.mulf %41, %44 : vector<8x1xf32>
    %c0_17 = arith.constant 0 : index
    %c0_18 = arith.constant 0 : index
    %46 = vector.load %arg4[%c0_17, %c0_18] : memref<8x1xf32, #tpu.memory_space<vmem>>, vector<8x1xf32>
    %47 = arith.mulf %34, %45 : vector<8x1xf32>
    %48 = arith.subf %46, %47 : vector<8x1xf32>
    %49 = vector.extract_strided_slice %2 {offsets = [0, 0], sizes = [8, 512], strides = [1, 1]} : vector<32x512xf32> to vector<8x512xf32>
    %50 = vector.broadcast %45 : vector<8x1xf32> to vector<8x512xf32>
    %51 = arith.mulf %49, %50 : vector<8x512xf32>
    %52 = vector.broadcast %48 : vector<8x1xf32> to vector<8x512xf32>
    %53 = arith.addf %51, %52 : vector<8x512xf32>
    %cst_19 = arith.constant 0.000000e+00 : f32
    %54 = vector.broadcast %cst_19 : f32 to vector<8x512xf32>
    %55 = arith.maximumf %53, %54 : vector<8x512xf32>
    %56 = arith.truncf %55 : vector<8x512xf32> to vector<8x512xbf16>
    %c0_20 = arith.constant 0 : index
    %c0_21 = arith.constant 0 : index
    %57 = vector.load %arg5[%c0_20, %c0_21] : memref<32x512xbf16, #tpu.memory_space<vmem>>, vector<8x512xbf16>
    tpu.vector_store %arg5[%c0_20, %c0_21], %56 {strides = array<i32>} : memref<32x512xbf16, #tpu.memory_space<vmem>>, vector<8x512xbf16>,
    %58 = vector.extract_strided_slice %2 {offsets = [8, 0], sizes = [8, 512], strides = [1, 1]} : vector<32x512xf32> to vector<8x512xf32>
    %59 = vector.broadcast %45 : vector<8x1xf32> to vector<8x512xf32>
    %60 = arith.mulf %58, %59 : vector<8x512xf32>
    %61 = vector.broadcast %48 : vector<8x1xf32> to vector<8x512xf32>
    %62 = arith.addf %60, %61 : vector<8x512xf32>
    %cst_22 = arith.constant 0.000000e+00 : f32
    %63 = vector.broadcast %cst_22 : f32 to vector<8x512xf32>
    %64 = arith.maximumf %62, %63 : vector<8x512xf32>
    %65 = arith.truncf %64 : vector<8x512xf32> to vector<8x512xbf16>
    %c8 = arith.constant 8 : index
    %c0_23 = arith.constant 0 : index
    %66 = vector.load %arg5[%c8, %c0_23] : memref<32x512xbf16, #tpu.memory_space<vmem>>, vector<8x512xbf16>
    tpu.vector_store %arg5[%c8, %c0_23], %65 {strides = array<i32>} : memref<32x512xbf16, #tpu.memory_space<vmem>>, vector<8x512xbf16>,
    %67 = vector.extract_strided_slice %2 {offsets = [16, 0], sizes = [8, 512], strides = [1, 1]} : vector<32x512xf32> to vector<8x512xf32>
    %68 = vector.broadcast %45 : vector<8x1xf32> to vector<8x512xf32>
    %69 = arith.mulf %67, %68 : vector<8x512xf32>
    %70 = vector.broadcast %48 : vector<8x1xf32> to vector<8x512xf32>
    %71 = arith.addf %69, %70 : vector<8x512xf32>
    %cst_24 = arith.constant 0.000000e+00 : f32
    %72 = vector.broadcast %cst_24 : f32 to vector<8x512xf32>
    %73 = arith.maximumf %71, %72 : vector<8x512xf32>
    %74 = arith.truncf %73 : vector<8x512xf32> to vector<8x512xbf16>
    %c16 = arith.constant 16 : index
    %c0_25 = arith.constant 0 : index
    %75 = vector.load %arg5[%c16, %c0_25] : memref<32x512xbf16, #tpu.memory_space<vmem>>, vector<8x512xbf16>
    tpu.vector_store %arg5[%c16, %c0_25], %74 {strides = array<i32>} : memref<32x512xbf16, #tpu.memory_space<vmem>>, vector<8x512xbf16>,
    %76 = vector.extract_strided_slice %2 {offsets = [24, 0], sizes = [8, 512], strides = [1, 1]} : vector<32x512xf32> to vector<8x512xf32>
    %77 = vector.broadcast %45 : vector<8x1xf32> to vector<8x512xf32>
    %78 = arith.mulf %76, %77 : vector<8x512xf32>
    %79 = vector.broadcast %48 : vector<8x1xf32> to vector<8x512xf32>
    %80 = arith.addf %78, %79 : vector<8x512xf32>
    %cst_26 = arith.constant 0.000000e+00 : f32
    %81 = vector.broadcast %cst_26 : f32 to vector<8x512xf32>
    %82 = arith.maximumf %80, %81 : vector<8x512xf32>
    %83 = arith.truncf %82 : vector<8x512xf32> to vector<8x512xbf16>
    %c24 = arith.constant 24 : index
    %c0_27 = arith.constant 0 : index
    %84 = vector.load %arg5[%c24, %c0_27] : memref<32x512xbf16, #tpu.memory_space<vmem>>, vector<8x512xbf16>
    tpu.vector_store %arg5[%c24, %c0_27], %83 {strides = array<i32>} : memref<32x512xbf16, #tpu.memory_space<vmem>>, vector<8x512xbf16>,
    return
  }
  func.func @transform_0(%arg0: i32) -> (i32, i32) {
    %c0_i32 = arith.constant 0 : i32
    %c0_i32_0 = arith.constant 0 : i32
    %c0_i32_1 = arith.constant 0 : i32
    return %c0_i32, %c0_i32_0 : i32, i32
  }
  func.func @transform_1(%arg0: i32) -> (i32, i32) {
    %c0_i32 = arith.constant 0 : i32
    %c0_i32_0 = arith.constant 0 : i32
    %c0_i32_1 = arith.constant 0 : i32
    return %c0_i32, %c0_i32_0 : i32, i32
  }
  func.func @transform_2(%arg0: i32) -> (i32, i32) {
    %c0_i32 = arith.constant 0 : i32
    %c0_i32_0 = arith.constant 0 : i32
    %c0_i32_1 = arith.constant 0 : i32
    return %c0_i32, %c0_i32_0 : i32, i32
  }
  func.func @transform_3(%arg0: i32) -> (i32, i32) {
    %c0_i32 = arith.constant 0 : i32
    %c0_i32_0 = arith.constant 0 : i32
    %c0_i32_1 = arith.constant 0 : i32
    return %c0_i32, %c0_i32_0 : i32, i32
  }
  func.func @transform_4(%arg0: i32) -> (i32, i32) {
    %c0_i32 = arith.constant 0 : i32
    %c0_i32_0 = arith.constant 0 : i32
    %c0_i32_1 = arith.constant 0 : i32
    return %c0_i32, %c0_i32_0 : i32, i32
  }
}

module attributes {stable_mosaic.version = 11 : i64} {
  func.func @_convt_tanh_kernel(%arg0: i32, %arg1: memref<12x72xbf16, #tpu.memory_space<vmem>>, %arg2: memref<72x2048xbf16, #tpu.memory_space<vmem>>, %arg3: memref<12x2048xf32, #tpu.memory_space<vmem>>) attributes {dimension_semantics = [#tpu.dimension_semantics<arbitrary>], iteration_bounds = array<i64: 1>, scalar_prefetch = 0 : i64, scratch_operands = 0 : i64, tpu.core_type = #tpu.core_type<tc>, window_params = [{pipeline_mode = #tpu.pipeline_mode<synchronous>, transform_indices = @transform_0, window_bounds = array<i64: 12, 72>}, {pipeline_mode = #tpu.pipeline_mode<synchronous>, transform_indices = @transform_1, window_bounds = array<i64: 72, 2048>}, {pipeline_mode = #tpu.pipeline_mode<synchronous>, transform_indices = @transform_2, window_bounds = array<i64: 12, 2048>}]} {
    %c0 = arith.constant 0 : index
    %c0_0 = arith.constant 0 : index
    %0 = vector.load %arg1[%c0, %c0_0] : memref<12x72xbf16, #tpu.memory_space<vmem>>, vector<12x72xbf16>
    %c0_1 = arith.constant 0 : index
    %c0_2 = arith.constant 0 : index
    %1 = vector.load %arg2[%c0_1, %c0_2] : memref<72x2048xbf16, #tpu.memory_space<vmem>>, vector<72x2048xbf16>
    %cst = arith.constant dense<0.000000e+00> : vector<12x2048xf32>
    %2 = tpu.matmul %0, %1, %cst {dimension_numbers = #tpu.dot_dimension_numbers<[1], [0], [0], [1], [0, 0, 1, 1], [], []>} : vector<12x72xbf16>, vector<72x2048xbf16>, vector<12x2048xf32> -> vector<12x2048xf32>
    %3 = math.tanh %2 : vector<12x2048xf32>
    %c0_3 = arith.constant 0 : index
    %c0_4 = arith.constant 0 : index
    %4 = vector.load %arg3[%c0_3, %c0_4] : memref<12x2048xf32, #tpu.memory_space<vmem>>, vector<12x2048xf32>
    tpu.vector_store %arg3[%c0_3, %c0_4], %3 {strides = array<i32>} : memref<12x2048xf32, #tpu.memory_space<vmem>>, vector<12x2048xf32>,
    return
  }
  func.func @transform_0(%arg0: i32) -> (i32, i32) {
    %c0_i32 = arith.constant 0 : i32
    %c0_i32_0 = arith.constant 0 : i32
    %c0_i32_1 = arith.constant 0 : i32
    return %c0_i32, %c0_i32_0 : i32, i32
  }
  func.func @transform_1(%arg0: i32) -> (i32, i32) {
    %c0_i32 = arith.constant 0 : i32
    %c0_i32_0 = arith.constant 0 : i32
    %c0_i32_1 = arith.constant 0 : i32
    return %c0_i32, %c0_i32_0 : i32, i32
  }
  func.func @transform_2(%arg0: i32) -> (i32, i32) {
    %c0_i32 = arith.constant 0 : i32
    %c0_i32_0 = arith.constant 0 : i32
    %c0_i32_1 = arith.constant 0 : i32
    return %c0_i32, %c0_i32_0 : i32, i32
  }
}

</mosaic_0001>

<bundles_post_ra>
// kernel: cond_generator_forward.5
= control target key start
LH: loop header
LB: loop body
LE: loop exit
PB: predicated region body
PF: predicated region fallthrough
CT: control target
= control target key end

     0   :  { %12 = vsyncpa [#allocation3], 0  ;;  %s1563_s0 = inlined_call_operand.hbm [shape: f32[2,40], index: 0, kind: input, shape index: {}]   ;;  %s1564_s1 = inlined_call_operand.hbm [shape: f32[2,16], index: 1, kind: input, shape index: {}]   ;;  %s1565_s2 = inlined_call_operand.hbm [shape: f32[40,40], index: 2, kind: input, shape index: {}]   ;;  %s1566_s3 = inlined_call_operand.hbm [shape: bf16[16,1024], index: 3, kind: input, shape index: {}]   ;;  %s1567_s4 = inlined_call_operand.hbm [shape: bf16[40,1024], index: 4, kind: input, shape index: {}]   ;;  %s1568_s5 = inlined_call_operand.hbm [shape: f32[1,64], index: 5, kind: input, shape index: {}]   ;;  %s1569_s6 = inlined_call_operand.hbm [shape: f32[1,64], index: 6, kind: input, shape index: {}]   ;;  %s1570_s7 = inlined_call_operand.vmem [shape: bf16[2,1024], index: 7, kind: output, shape index: {}]  }
   0x1   :  { %13 = vsyncpa [#allocation5], 0 }
   0x2   :  { %14 = vsyncpa [#allocation8], 0 }
   0x3   :  { %15 = vsyncpa [#allocation11], 0  ;;  %s1336_s24 = smov [#allocation4]   ;;  %s1337_s26 = smov [#allocation7]  }
   0x4   :  { %s32_s25 = sshll.u32 %s1336_s24, 4  ;;  %s53_s27 = sshll.u32 %s1337_s26, 4  ;;  %s33_s25 = int_to_ptr.vmem [resolvable:$true] %s32_s25  ;;  %s54_s27 = int_to_ptr.vmem [resolvable:$true] %s53_s27 }
   0x5   :  { %s1196_s28 = scalar_lea.vmem %s33_s25, 32  ;;  %p1201_p1 = scmp.lt.s32.totalorder %s33_s25, %s33_s25 }
   0x6   :  { %p1197_p0 = scmp.ne.s32.totalorder %s33_s25, %s1196_s28  ;;  %p1202_p2 = scmp.lt.s32.totalorder %s1196_s28, %s1196_s28 }
   0x8   :  { %p1203_p3 = por %p1202_p2, %p1201_p1 }
   0xa   :  { %p1204_p4 = pnand %p1203_p3, %p1197_p0 }
   0xc   :  { %1207 = shalt.err (!%p1204_p4)
}
   0xd   :  { %35 = dma.hbm_to_vmem [thread:$0]  %s1564_s1, 32, %s33_s25, [#allocation5]  }
   0xe   :  { %s1216_s8 = scalar_lea.vmem %s54_s27, 1024  ;;  %p1221_p6 = scmp.lt.s32.totalorder %s54_s27, %s54_s27 }
   0xf   :  { %p1217_p5 = scmp.ne.s32.totalorder %s54_s27, %s1216_s8  ;;  %p1222_p7 = scmp.lt.s32.totalorder %s1216_s8, %s1216_s8 }
  0x11   :  { %p1223_p8 = por %p1222_p7, %p1221_p6 }
  0x13   :  { %p1224_p9 = pnand %p1223_p8, %p1217_p5 }
  0x15   :  { %1227 = shalt.err (!%p1224_p9)
}
  0x16   :  { %s1338_s9 = smov 512   ;;  %s1339_s10 = smov 32  }
  0x17   :  { %59 = dma.hbm_to_vmem [thread:$0]  %s1566_s3, 1024, %s54_s27, [#allocation8], %s1338_s9, %s1338_s9, %s1339_s10  }
  0x18   :  { %s1340_s13 = smov [#allocation10]   ;;  %s1341_s15 = smov [#allocation2]  }
  0x19   :  { %s78_s14 = sshll.u32 %s1340_s13, 4  ;;  %s22_s1 = sshll.u32 %s1341_s15, 4  ;;  %s79_s14 = int_to_ptr.vmem [resolvable:$true] %s78_s14  ;;  %s23_s1 = int_to_ptr.vmem [resolvable:$true] %s22_s1 }
  0x1a   :  { %s1236_s16 = scalar_lea.vmem %s79_s14, 16  ;;  %s1240_s17 = scalar_lea.vmem %s79_s14, 32 }
  0x1b   :  { %p1237_p10 = scmp.ne.s32.totalorder %s79_s14, %s1236_s16  ;;  %p1241_p11 = scmp.lt.s32.totalorder %s79_s14, %s79_s14 }
  0x1c   :  { %p1242_p12 = scmp.lt.s32.totalorder %s1240_s17, %s1236_s16 }
  0x1e   :  { %p1243_p13 = por %p1242_p12, %p1241_p11 }
  0x20   :  { %p1244_p0 = pnand %p1243_p13, %p1237_p10 }
  0x22   :  { %1247 = shalt.err (!%p1244_p0)
}
  0x23   :  { %81 = dma.hbm_to_vmem [thread:$0]  %s1568_s5, 16, %s79_s14, [#allocation11]  }
  0x24   :  { %s1256_s20 = scalar_lea.vmem %s23_s1, 32  ;;  %p1261_p2 = scmp.lt.s32.totalorder %s23_s1, %s23_s1 }
  0x25   :  { %p1257_p1 = scmp.ne.s32.totalorder %s23_s1, %s1256_s20  ;;  %p1262_p3 = scmp.lt.s32.totalorder %s1256_s20, %s1256_s20 }
  0x27   :  { %p1263_p4 = por %p1262_p3, %p1261_p2 }
  0x29   :  { %p1264_p5 = pnand %p1263_p4, %p1257_p1 }
  0x2b   :  { %1267 = shalt.err (!%p1264_p5)
}
  0x2c   :  { %25 = dma.hbm_to_vmem [thread:$0]  %s1563_s0, 32, %s23_s1, [#allocation3]  }
  0x2d   :  { %s1342_s22 = smov [#allocation6]  }
  0x2e   :  { %s41_s23 = sshll.u32 %s1342_s22, 4  ;;  %s42_s23 = int_to_ptr.vmem [resolvable:$true] %s41_s23 }
  0x2f   :  { %s1276_s24 = scalar_lea.vmem %s42_s23, 640  ;;  %p1281_p7 = scmp.lt.s32.totalorder %s42_s23, %s42_s23 }
  0x30   :  { %p1277_p6 = scmp.ne.s32.totalorder %s42_s23, %s1276_s24  ;;  %p1282_p8 = scmp.lt.s32.totalorder %s1276_s24, %s1276_s24 }
  0x32   :  { %p1283_p9 = por %p1282_p8, %p1281_p7 }
  0x34   :  { %p1284_p10 = pnand %p1283_p9, %p1277_p6 }
  0x36   :  { %1287 = shalt.err (!%p1284_p10)
}
  0x37   :  { %s1343_s5 = smov 128   ;;  %s1344_s25 = smov 8  }
  0x38   :  { %47 = dma.hbm_to_vmem [thread:$0]  %s1565_s2, 640, %s42_s23, [#allocation5], %s1343_s5, %s1343_s5, %s1344_s25  }
  0x39   :  { %s1345_s28 = smov [#allocation9]   ;;  %s1346_s0 = smov [#allocation12]  }
  0x3a   :  { %s65_s29 = sshll.u32 %s1345_s28, 4  ;;  %s88_s30 = sshll.u32 %s1346_s0, 4  ;;  %s66_s29 = int_to_ptr.vmem [resolvable:$true] %s65_s29  ;;  %s89_s30 = int_to_ptr.vmem [resolvable:$true] %s88_s30 }
  0x3b   :  { %s1296_s8 = scalar_lea.vmem %s66_s29, 2560  ;;  %p1301_p12 = scmp.lt.s32.totalorder %s66_s29, %s66_s29 }
  0x3c   :  { %p1297_p11 = scmp.ne.s32.totalorder %s66_s29, %s1296_s8  ;;  %p1302_p13 = scmp.lt.s32.totalorder %s1296_s8, %s1296_s8 }
  0x3e   :  { %p1303_p0 = por %p1302_p13, %p1301_p12 }
  0x40   :  { %p1304_p1 = pnand %p1303_p0, %p1297_p11 }
  0x42   :  { %1307 = shalt.err (!%p1304_p1)
}
  0x43   :  { %71 = dma.hbm_to_vmem [thread:$0]  %s1567_s4, 2560, %s66_s29, [#allocation8], %s1338_s9, %s1338_s9, %s1339_s10  }
  0x44   :  { %s1316_s2 = scalar_lea.vmem %s89_s30, 16  ;;  %s1320_s13 = scalar_lea.vmem %s89_s30, 32 }
  0x45   :  { %p1317_p2 = scmp.ne.s32.totalorder %s89_s30, %s1316_s2  ;;  %p1321_p3 = scmp.lt.s32.totalorder %s89_s30, %s89_s30 }
  0x46   :  { %p1322_p4 = scmp.lt.s32.totalorder %s1320_s13, %s1316_s2 }
  0x48   :  { %p1323_p5 = por %p1322_p4, %p1321_p3 }
  0x4a   :  { %p1324_p6 = pnand %p1323_p5, %p1317_p2 }
  0x4c   :  { %1327 = shalt.err (!%p1324_p6)
}
  0x4d   :  { %91 = dma.hbm_to_vmem [thread:$0]  %s1569_s6, 16, %s89_s30, [#allocation11]  }
  0x4e   :  { %1328 = dma.done.wait [#allocation3], 32  }
  0x4f   :  { %1329 = vsyncadd [#allocation3], 4294967264 }
  0x50   :  { %1330 = dma.done.wait [#allocation5], 672  }
  0x51   :  { %1331 = vsyncadd [#allocation5], 4294966624 }
  0x52   :  { %1332 = dma.done.wait [#allocation8], 3584  }
  0x53   :  { %1333 = vsyncadd [#allocation8], 4294963712 }
  0x54   :  { %1334 = dma.done.wait [#allocation11], 32  }
  0x55   :  { %1335 = vsyncadd [#allocation11], 4294967264  ;;  %vm115_vm0 = vcmask 320512   ;;  %v114_v0 = vld [vmem:[#allocation2] sm:$0x3]  ;;  %v131_v7 = vld [vmem:[#allocation6 + $0x20] sm:$0xff] }
  0x56   :  { %v116_v1 = vsel %vm115_vm0, %v114_v0, -inf  ;;  %v1347_v8 = vmov 0.0   ;;  %v130_v9 = vld [vmem:[#allocation6 + $0x18] sm:$0xff]  ;;  %vm1348_vm1 = vmmov 0   ;;  %v129_v10 = vld [vmem:[#allocation6 + $0x10] sm:$0xff]  ;;  %v128_v11 = vld [vmem:[#allocation6 + $0x8] sm:$0xff] }
  0x57   :  { %117 = vmax.xlane.f32.xlu0 %v116_v1  ;;  %1145 = vmatprep.subr.mxu0 %v1347_v8  ;;  %v127_v12 = vld [vmem:[#allocation6] sm:$0xff]  ;;  %v233_v13 = vld [vmem:[#allocation9 + $0x80] sm:$0xff]  ;;  %vm340_vm2 = vcmask 1043456   ;;  %v234_v14 = vld [vmem:[#allocation9 + $0x88] sm:$0xff]  ;;  %vm132_vm3 = vcmask 326656   ;;  %v1349_v44 = vmov 0  }
  0x58   :  { %1155 = vmatprep.mubr.msk.f32.mxu0 %vm1348_vm1, %v1347_v8  ;;  %1146 = vmatpush3.msra.mxu0 %v131_v7  ;;  %v1108_v15 = vcombine.high %v233_v13, %v233_v13  ;;  %v1110_v16 = vcombine.high %v234_v14, %v234_v14  ;;  %v1107_v17 = vcombine.low %v233_v13, %v233_v13  ;;  %v225_v18 = vld [vmem:[#allocation9 + $0x40] sm:$0xff]  ;;  %v226_v29 = vld [vmem:[#allocation9 + $0x48] sm:$0xff]  ;;  %v235_v40 = vld [vmem:[#allocation9 + $0x90] sm:$0xff]  ;;  %vm569_vm4 = vcmask 130048   ;;  %s1350_s4 = smov 64  }
  0x59   :  { %1147 = vmatprep.subr.mxu0 %v1347_v8  ;;  %v229_v19 = vld [vmem:[#allocation9 + $0x60] sm:$0xff]  ;;  %v1109_v28 = vcombine.low %v234_v14, %v234_v14  ;;  %v230_v30 = vld [vmem:[#allocation9 + $0x68] sm:$0xff]  ;;  %v236_v41 = vld [vmem:[#allocation9 + $0x98] sm:$0xff]  ;;  %v1112_v42 = vcombine.high %v235_v40, %v235_v40  ;;  %397 = vmatprep.mubr.bf16.mxu1 %v1349_v44  ;;  %v1111_v45 = vcombine.low %v235_v40, %v235_v40  ;;  %vm737_vm5 = vcmask 1041408  }
  0x5a   :  { %1148 = vmatpush3.msra.mxu0 %v130_v9  ;;  %v1100_v20 = vcombine.high %v225_v18, %v229_v19  ;;  %1115 = vmatprep.subr.msk.bf16.mxu1 %vm340_vm2, %v1108_v15  ;;  %v342_v21 = vsel %vm340_vm2, %v1107_v17, 0  ;;  %v1099_v22 = vcombine.low %v225_v18, %v229_v19  ;;  %v217_v23 = vld [vmem:[#allocation9] sm:$0xff]  ;;  %v1102_v34 = vcombine.high %v226_v29, %v230_v30  ;;  %v218_v35 = vld [vmem:[#allocation9 + $0x8] sm:$0xff]  ;;  %v227_v47 = vld [vmem:[#allocation9 + $0x50] sm:$0xff] }
  0x5b   :  { %1149 = vmatprep.subr.mxu0 %v1347_v8  ;;  %376 = vmatpush1.bf16.msra.mxu1 %v342_v21  ;;  %v221_v24 = vld [vmem:[#allocation9 + $0x20] sm:$0xff]  ;;  %v348_v33 = vsel %vm340_vm2, %v1109_v28, 0  ;;  %v222_v36 = vld [vmem:[#allocation9 + $0x28] sm:$0xff]  ;;  %v1101_v37 = vcombine.low %v226_v29, %v230_v30  ;;  %v1114_v43 = vcombine.high %v236_v41, %v236_v41  ;;  %v1113_v46 = vcombine.low %v236_v41, %v236_v41  ;;  %v231_v48 = vld [vmem:[#allocation9 + $0x70] sm:$0xff] }
  0x5c   :  { %1150 = vmatpush3.msra.mxu0 %v129_v10  ;;  %377 = vmatprep.subr.bf16.mxu1 %v1100_v20  ;;  %v1092_v25 = vcombine.high %v217_v23, %v221_v24  ;;  %v1091_v26 = vcombine.low %v217_v23, %v221_v24  ;;  %v1094_v38 = vcombine.high %v218_v35, %v222_v36  ;;  %v228_v49 = vld [vmem:[#allocation9 + $0x58] sm:$0xff]  ;;  %v354_v52 = vsel %vm340_vm2, %v1111_v45, 0  ;;  %v219_v57 = vld [vmem:[#allocation9 + $0x10] sm:$0xff]  ;;  %v209_v10 = vld [vmem:[#allocation7 + $0x8] sm:$0xff] }
  0x5d   :  { %1151 = vmatprep.subr.mxu0 %v1347_v8  ;;  %v1093_v39 = vcombine.low %v218_v35, %v222_v36  ;;  %v232_v50 = vld [vmem:[#allocation9 + $0x78] sm:$0xff]  ;;  %v360_v54 = vsel %vm340_vm2, %v1113_v46, 0  ;;  %v1104_v55 = vcombine.high %v227_v47, %v231_v48  ;;  %v223_v59 = vld [vmem:[#allocation9 + $0x30] sm:$0xff]  ;;  %v1103_v62 = vcombine.low %v227_v47, %v231_v48 }
  0x5e   :  { %1152 = vmatpush3.msra.mxu0 %v128_v11  ;;  %v1106_v56 = vcombine.high %v228_v49, %v232_v50  ;;  %v220_v60 = vld [vmem:[#allocation9 + $0x18] sm:$0xff]  ;;  %v1105_v63 = vcombine.low %v228_v49, %v232_v50  ;;  %v213_v11 = vld [vmem:[#allocation7 + $0x28] sm:$0xff]  ;;  %v206_v15 = vld [vmem:[#allocation4] sm:$0x3]  ;;  %vm972_vm6 = vcmask 523264  }
  0x5f   :  { %1153 = vmatprep.subr.mxu0 %v1347_v8  ;;  %378 = vmatpush1.bf16.msra.mxu1 %v1099_v22  ;;  %v224_v61 = vld [vmem:[#allocation9 + $0x38] sm:$0xff]  ;;  %v1126_v14 = vcombine.high %v209_v10, %v213_v11  ;;  %v207_v18 = vpack.c.bf16 %v206_v15, %v206_v15  ;;  %v1125_v19 = vcombine.low %v209_v10, %v213_v11 }
  0x60   :  { %1154 = vmatpush3.msra.mxu0 %v127_v12  ;;  %379 = vmatprep.subr.bf16.mxu1 %v1092_v25  ;;  %v1098_v1 = vcombine.high %v220_v60, %v224_v61  ;;  %v1097_v7 = vcombine.low %v220_v60, %v224_v61  ;;  %v215_v17 = vld [vmem:[#allocation7 + $0x38] sm:$0xff] }
  0x61   :  { %1117 = vmatprep.subr.msk.bf16.mxu0 %vm340_vm2, %v1110_v16  ;;  %v211_v16 = vld [vmem:[#allocation7 + $0x18] sm:$0xff] }
  0x62   :  { %v1130_v20 = vcombine.high %v211_v16, %v215_v17  ;;  %v1129_v21 = vcombine.low %v211_v16, %v215_v17 }
  0x63   :  { %380 = vmatpush1.bf16.msra.mxu1 %v1091_v26 }
  0x64   :  { %1119 = vmatprep.subr.msk.bf16.mxu1 %vm340_vm2, %v1112_v42 }
  0xe0   :  { %v118_v2 = vpop.xlane.xlu0 %117 }
  0xe1   :  { %v119_v3 = vsub.f32 %v114_v0, %v118_v2  ;;  %v1096_v0 = vcombine.high %v219_v57, %v223_v59  ;;  %v208_v2 = vld [vmem:[#allocation7] sm:$0xff] }
  0xe3   :  { %v120_v4 = vmul.f32 1.442695, %v119_v3  ;;  %v212_v3 = vld [vmem:[#allocation7 + $0x20] sm:$0xff] }
  0xe4   :  { %v1124_v8 = vcombine.high %v208_v2, %v212_v3  ;;  %v1123_v12 = vcombine.low %v208_v2, %v212_v3 }
  0xe5   :  { %1182 = vpow2.f32 %v120_v4  ;;  %v210_v4 = vld [vmem:[#allocation7 + $0x10] sm:$0xff] }
  0xf2   :  { %v1183_v5 = vpop.eup %1182 }
  0xf3   :  { %v122_v6 = vsel %vm115_vm0, %v1183_v5, 0.0 }
  0xf4   :  { %123 = vadd.xlane.f32.xlu0 %v122_v6  ;;  %v1095_v6 = vcombine.low %v219_v57, %v223_v59 }
 0x17d   :  { %v124_v27 = vpop.xlane.xlu0 %123 }
 0x17e   :  { %1184 = vrcp.f32 %v124_v27 }
 0x18b   :  { %v1185_v31 = vpop.eup %1184 }
 0x18c   :  { %v126_v32 = vmul.f32 %v1185_v31, %v1183_v5  ;;  %v214_v5 = vld [vmem:[#allocation7 + $0x30] sm:$0xff] }
 0x18d   :  { %v1128_v9 = vcombine.high %v210_v4, %v214_v5  ;;  %v1127_v13 = vcombine.low %v210_v4, %v214_v5 }
 0x18e   :  { %1156 = vmatmul.mubr.msk.f32.vlgmr.msra.gmra.mxu0 %vm132_vm3, %v126_v32 }
 0x18f   :  { %417 = vmatpush1.bf16.msra.mxu0 %v348_v33  ;;  %438 = vmatprep.mubr.bf16.mxu0 %v1349_v44 }
 0x190   :  { %418 = vmatprep.subr.bf16.mxu0 %v1102_v34 }
 0x193   :  { %419 = vmatpush1.bf16.msra.mxu0 %v1101_v37 }
 0x194   :  { %420 = vmatprep.subr.bf16.mxu0 %v1094_v38 }
 0x197   :  { %421 = vmatpush1.bf16.msra.mxu0 %v1093_v39 }
 0x198   :  { %1121 = vmatprep.subr.msk.bf16.mxu0 %vm340_vm2, %v1114_v43 }
 0x24e   :  { %v202_v51 = vpop.f32.mrf.mxu0 }
 0x24f   :  { %v216_v53 = vpack.c.bf16 %v202_v51, %v202_v51 }
 0x250   :  { %v1157_v58 = vpop.f32.mrf.mxu0 }
 0x251   :  { %1116 = vmatmul.mubr.msk.bf16.vlgmr.msra.gmra.mxu1 %vm132_vm3, %v216_v53  ;;  %1118 = vmatmul.mubr.msk.bf16.vlgmr.msra.gmra.mxu0 %vm132_vm3, %v216_v53 }
 0x252   :  { %458 = vmatpush1.bf16.msra.mxu1 %v354_v52  ;;  %499 = vmatpush1.bf16.msra.mxu0 %v360_v54 }
 0x253   :  { %459 = vmatprep.subr.bf16.mxu1 %v1104_v55  ;;  %500 = vmatprep.subr.bf16.mxu0 %v1106_v56 }
 0x254   :  { %479 = vmatprep.mubr.bf16.mxu1 %v1349_v44  ;;  %520 = vmatprep.mubr.bf16.mxu0 %v1349_v44 }
 0x256   :  { %460 = vmatpush1.bf16.msra.mxu1 %v1103_v62  ;;  %501 = vmatpush1.bf16.msra.mxu0 %v1105_v63 }
 0x257   :  { %461 = vmatprep.subr.bf16.mxu1 %v1096_v0  ;;  %502 = vmatprep.subr.bf16.mxu0 %v1098_v1 }
 0x25a   :  { %462 = vmatpush1.bf16.msra.mxu1 %v1095_v6  ;;  %503 = vmatpush1.bf16.msra.mxu0 %v1097_v7 }
 0x25b   :  { %587 = vmatprep.subr.bf16.mxu1 %v1124_v8  ;;  %669 = vmatprep.subr.bf16.mxu0 %v1128_v9 }
 0x25d   :  { %1120 = vmatmul.mubr.msk.bf16.vlgmr.msra.gmra.mxu1 %vm132_vm3, %v216_v53  ;;  %1122 = vmatmul.mubr.msk.bf16.vlgmr.msra.gmra.mxu0 %vm132_vm3, %v216_v53 }
 0x25e   :  { %588 = vmatpush1.bf16.msra.mxu1 %v1123_v12  ;;  %670 = vmatpush1.bf16.msra.mxu0 %v1127_v13 }
 0x25f   :  { %605 = vmatprep.mubr.bf16.mxu1 %v1349_v44  ;;  %687 = vmatprep.mubr.bf16.mxu0 %v1349_v44 }
 0x260   :  { %628 = vmatprep.subr.bf16.mxu1 %v1126_v14 }
 0x265   :  { %1131 = vmatmul.mubr.msk.bf16.vlgmr.msra.gmra.mxu1 %vm569_vm4, %v207_v18  ;;  %1133 = vmatmul.mubr.msk.bf16.vlgmr.msra.gmra.mxu0 %vm569_vm4, %v207_v18 }
 0x266   :  { %629 = vmatpush1.bf16.msra.mxu1 %v1125_v19  ;;  %646 = vmatprep.mubr.bf16.mxu1 %v1349_v44 }
 0x267   :  { %710 = vmatprep.subr.bf16.mxu1 %v1130_v20 }
 0x26d   :  { %1132 = vmatmul.mubr.msk.bf16.vlgmr.msra.gmra.mxu1 %vm569_vm4, %v207_v18 }
 0x26e   :  { %711 = vmatpush1.bf16.msra.mxu1 %v1129_v21  ;;  %728 = vmatprep.mubr.bf16.mxu1 %v1349_v44 }
 0x275   :  { %1134 = vmatmul.mubr.msk.bf16.vlgmr.msra.gmra.mxu1 %vm569_vm4, %v207_v18 }
 0x311   :  { %v399_v22 = vpop.f32.mrf.mxu1  ;;  %v440_v23 = vpop.f32.mrf.mxu0 }
 0x313   :  { %v401_v24 = vpop.f32.mrf.mxu1  ;;  %v442_v25 = vpop.f32.mrf.mxu0 }
 0x315   :  { %v403_v26 = vpop.f32.mrf.mxu1  ;;  %v444_v27 = vpop.f32.mrf.mxu0 }
 0x317   :  { %v404_v28 = vpop.f32.mrf.mxu1  ;;  %v445_v29 = vpop.f32.mrf.mxu0 }
 0x31d   :  { %v481_v30 = vpop.f32.mrf.mxu1  ;;  %v1440_v31 = vpop.f32.mrf.mxu0 }
 0x31f   :  { %v483_v32 = vpop.f32.mrf.mxu1  ;;  %v1442_v33 = vpop.f32.mrf.mxu0 }
 0x321   :  { %v485_v34 = vpop.f32.mrf.mxu1  ;;  %v526_v35 = vpop.f32.mrf.mxu0 }
 0x323   :  { %v486_v36 = vpop.f32.mrf.mxu1  ;;  %v527_v37 = vpop.f32.mrf.mxu0 }
 0x325   :  { %v607_v38 = vpop.f32.mrf.mxu1  ;;  %v689_v39 = vpop.f32.mrf.mxu0 }
 0x326   :  { %v1444_v40 = vadd.f32 %v607_v38, %v399_v22  ;;  %v1446_v41 = vadd.f32 %v689_v39, %v481_v30 }
 0x327   :  { %v609_v42 = vpop.f32.mrf.mxu1  ;;  %v691_v43 = vpop.f32.mrf.mxu0 }
 0x328   :  { %v738_v44 = vsel %vm737_vm5, %v1444_v40, 0.0  ;;  %v794_v45 = vmul.f32 %v1444_v40, %v1444_v40  ;;  %v798_v46 = vmul.f32 %v1446_v41, %v1446_v41  ;;  %v1454_v48 = vadd.f32 %v609_v42, %v401_v24 }
 0x329   :  { %v739_v47 = vrot.slane %v738_v44, 4  ;;  %v1456_v49 = vadd.f32 %v691_v43, %v483_v32  ;;  %v611_v50 = vpop.f32.mrf.mxu1  ;;  %v693_v51 = vpop.f32.mrf.mxu0  ;;  %v766_v18 = vsel %vm737_vm5, %v1446_v41, 0.0 }
 0x32a   :  { %v802_v52 = vsel %vm737_vm5, %v794_v45, 0.0  ;;  %v830_v53 = vsel %vm737_vm5, %v798_v46, 0.0  ;;  %v745_v56 = vsel %vm737_vm5, %v1454_v48, 0.0  ;;  %v795_v60 = vmul.f32 %v1454_v48, %v1454_v48 }
 0x32b   :  { %v803_v54 = vrot.slane %v802_v52, 4  ;;  %v831_v55 = vrot.slane %v830_v53, 4  ;;  %v612_v57 = vpop.f32.mrf.mxu1  ;;  %v694_v58 = vpop.f32.mrf.mxu0  ;;  %v746_v59 = vrot.slane %v745_v56, 4  ;;  %v799_v61 = vmul.f32 %v1456_v49, %v1456_v49 }
 0x32c   :  { %v740_v63 = vadd.f32 %v739_v47, %v738_v44  ;;  %v809_v3 = vsel %vm737_vm5, %v795_v60, 0.0  ;;  %v767_v43 = vrot.slane %v766_v18, 4 }
 0x32d   :  { %v648_v62 = vpop.f32.mrf.mxu1  ;;  %v804_v0 = vadd.f32 %v803_v54, %v802_v52  ;;  %v832_v1 = vadd.f32 %v831_v55, %v830_v53  ;;  %v747_v2 = vadd.f32 %v746_v59, %v745_v56  ;;  %v810_v5 = vrot.slane %v809_v3, 4 }
 0x32e   :  { %v1467_v4 = vadd.f32 %v648_v62, %v440_v23  ;;  %v837_v6 = vsel %vm737_vm5, %v799_v61, 0.0  ;;  %v741_v8 = vrot.slane %v740_v63, 2 }
 0x32f   :  { %v650_v7 = vpop.f32.mrf.mxu1  ;;  %v748_v12 = vrot.slane %v747_v2, 2  ;;  %v805_v16 = vrot.slane %v804_v0, 2  ;;  %v833_v17 = vrot.slane %v832_v1, 2  ;;  %v838_v22 = vrot.slane %v837_v6, 4 }
 0x330   :  { %v752_v9 = vsel %vm737_vm5, %v1467_v4, 0.0  ;;  %v796_v10 = vmul.f32 %v1467_v4, %v1467_v4  ;;  %v1474_v11 = vadd.f32 %v650_v7, %v442_v25  ;;  %v742_v15 = vadd.f32 %v741_v8, %v740_v63 }
 0x331   :  { %v753_v13 = vrot.slane %v752_v9, 4  ;;  %v652_v14 = vpop.f32.mrf.mxu1  ;;  %v749_v21 = vadd.f32 %v748_v12, %v747_v2  ;;  %v806_v29 = vadd.f32 %v805_v16, %v804_v0  ;;  %v834_v30 = vadd.f32 %v833_v17, %v832_v1 }
 0x332   :  { %v816_v19 = vsel %vm737_vm5, %v796_v10, 0.0  ;;  %v759_v20 = vsel %vm737_vm5, %v1474_v11, 0.0  ;;  %v797_v24 = vmul.f32 %v1474_v11, %v1474_v11  ;;  %v743_v26 = vrot.slane %v742_v15, 1 }
 0x333   :  { %v754_v23 = vadd.f32 %v753_v13, %v752_v9  ;;  %v653_v25 = vpop.f32.mrf.mxu1  ;;  %v817_v27 = vrot.slane %v816_v19, 4  ;;  %v750_v28 = vrot.slane %v749_v21, 1  ;;  %v760_v32 = vrot.slane %v759_v20, 4 }
 0x334   :  { %v1483_v35 = vadd.f32 %v743_v26, %v742_v15  ;;  %v811_v36 = vadd.f32 %v810_v5, %v809_v3  ;;  %v807_v39 = vrot.slane %v806_v29, 1  ;;  %v835_v42 = vrot.slane %v834_v30, 1 }
 0x335   :  { %v730_v34 = vpop.f32.mrf.mxu1  ;;  %v1488_v38 = vadd.f32 %v750_v28, %v749_v21  ;;  %v839_v46 = vadd.f32 %v838_v22, %v837_v6  ;;  %v755_v47 = vrot.slane %v754_v23, 2  ;;  %v823_v50 = vsel %vm737_vm5, %v797_v24, 0.0 }
 0x336   :  { %v1486_v37 = vadd.f32 %v730_v34, %v1440_v31  ;;  %859 = vrot.lane.b32.xlu1 %v1483_v35, %s1350_s4  ;;  %v812_v45 = vrot.slane %v811_v36, 2  ;;  %v818_v52 = vadd.f32 %v817_v27, %v816_v19  ;;  %v761_v53 = vadd.f32 %v760_v32, %v759_v20 }
 0x337   :  { %v732_v44 = vpop.f32.mrf.mxu1  ;;  %871 = vrot.lane.b32.xlu0 %v1488_v38, %s1350_s4  ;;  %v1500_v54 = vadd.f32 %v807_v39, %v806_v29  ;;  %v840_v56 = vrot.slane %v839_v46, 2  ;;  %v1505_v60 = vadd.f32 %v835_v42, %v834_v30  ;;  %v756_v61 = vadd.f32 %v755_v47, %v754_v23 }
 0x338   :  { %v800_v51 = vmul.f32 %v1486_v37, %v1486_v37  ;;  %v1496_v31 = vadd.f32 %v732_v44, %v1442_v33  ;;  %v813_v55 = vadd.f32 %v812_v45, %v811_v36  ;;  %v773_v33 = vsel %vm737_vm5, %v1456_v49, 0.0 }
 0x339   :  { %v734_v57 = vpop.f32.mrf.mxu1  ;;  %v824_v62 = vrot.slane %v823_v50, 4  ;;  %v841_v3 = vadd.f32 %v840_v56, %v839_v46  ;;  %v757_v5 = vrot.slane %v756_v61, 1  ;;  %v819_v6 = vrot.slane %v818_v52, 2 }
 0x33a   :  { %v844_v58 = vsel %vm737_vm5, %v800_v51, 0.0  ;;  %v801_v59 = vmul.f32 %v1496_v31, %v1496_v31  ;;  %864 = vrot.lane.b32.xlu1 %v1500_v54, %s1350_s4  ;;  %v814_v0 = vrot.slane %v813_v55, 1  ;;  %v768_v10 = vadd.f32 %v767_v43, %v766_v18 }
 0x33b   :  { %v845_v63 = vrot.slane %v844_v58, 4  ;;  %v735_v1 = vpop.f32.mrf.mxu1  ;;  %912 = vrot.lane.b32.xlu0 %v1505_v60, %s1350_s4  ;;  %v842_v12 = vrot.slane %v841_v3, 1  ;;  %v820_v13 = vadd.f32 %v819_v6, %v818_v52  ;;  %v762_v14 = vrot.slane %v761_v53, 2 }
 0x33c   :  { %v851_v2 = vsel %vm737_vm5, %v801_v59, 0.0  ;;  %v1514_v8 = vadd.f32 %v814_v0, %v813_v55  ;;  %v774_v15 = vrot.slane %v773_v33, 4  ;;  %v825_v19 = vadd.f32 %v824_v62, %v823_v50 }
 0x33d   :  { %v852_v7 = vrot.slane %v851_v2, 4  ;;  %v846_v9 = vadd.f32 %v845_v63, %v844_v58  ;;  %v780_v20 = vsel %vm737_vm5, %v1486_v37, 0.0  ;;  %v1520_v21 = vadd.f32 %v842_v12, %v841_v3 }
 0x33e   :  { %876 = vrot.lane.b32.xlu1 %v1514_v8, %s1350_s4  ;;  %v758_v22 = vadd.f32 %v757_v5, %v756_v61  ;;  %v821_v23 = vrot.slane %v820_v13, 1  ;;  %v763_v25 = vadd.f32 %v762_v14, %v761_v53  ;;  %v826_v26 = vrot.slane %v825_v19, 2 }
 0x33f   :  { %v847_v16 = vrot.slane %v846_v9, 2  ;;  %v853_v17 = vadd.f32 %v852_v7, %v851_v2  ;;  %924 = vrot.lane.b32.xlu0 %v1520_v21, %s1350_s4  ;;  %v775_v27 = vadd.f32 %v774_v15, %v773_v33  ;;  %v781_v30 = vrot.slane %v780_v20, 4 }
 0x340   :  { %v787_v32 = vsel %vm737_vm5, %v1496_v31, 0.0  ;;  %v822_v34 = vadd.f32 %v821_v23, %v820_v13  ;;  %v769_v36 = vrot.slane %v768_v10, 2  ;;  %v764_v42 = vrot.slane %v763_v25, 1 }
 0x341   :  { %v848_v24 = vadd.f32 %v847_v16, %v846_v9  ;;  %v854_v18 = vrot.slane %v853_v17, 2  ;;  %v827_v44 = vadd.f32 %v826_v26, %v825_v19  ;;  %v782_v45 = vadd.f32 %v781_v30, %v780_v20 }
 0x342   :  { %883 = vrot.lane.b32.xlu1 %v758_v22, %s1350_s4  ;;  %v788_v46 = vrot.slane %v787_v32, 4  ;;  %v776_v47 = vrot.slane %v775_v27, 2  ;;  %v765_v50 = vadd.f32 %v764_v42, %v763_v25  ;;  %v770_v53 = vadd.f32 %v769_v36, %v768_v10 }
 0x343   :  { %v849_v28 = vrot.slane %v848_v24, 1  ;;  %v855_v29 = vadd.f32 %v854_v18, %v853_v17  ;;  %v828_v52 = vrot.slane %v827_v44, 1  ;;  %v783_v59 = vrot.slane %v782_v45, 2 }
 0x344   :  { %v789_v55 = vadd.f32 %v788_v46, %v787_v32  ;;  %v771_v57 = vrot.slane %v770_v53, 1  ;;  %v777_v58 = vadd.f32 %v776_v47, %v775_v27 }
 0x345   :  { %v1527_v39 = vadd.f32 %v849_v28, %v848_v24  ;;  %v856_v43 = vrot.slane %v855_v29, 1  ;;  %v829_v56 = vadd.f32 %v828_v52, %v827_v44  ;;  %v784_v62 = vadd.f32 %v783_v59, %v782_v45 }
 0x346   :  { %888 = vrot.lane.b32.xlu1 %v822_v34, %s1350_s4  ;;  %v772_v61 = vadd.f32 %v771_v57, %v770_v53  ;;  %v778_v33 = vrot.slane %v777_v58, 1  ;;  %v790_v63 = vrot.slane %v789_v55, 2 }
 0x347   :  { %936 = vrot.lane.b32.xlu0 %v1527_v39, %s1350_s4  ;;  %v1532_v51 = vadd.f32 %v856_v43, %v855_v29  ;;  %v785_v1 = vrot.slane %v784_v62, 1 }
 0x348   :  { %v779_v0 = vadd.f32 %v778_v33, %v777_v58  ;;  %v791_v2 = vadd.f32 %v790_v63, %v789_v55 }
 0x349   :  { %v786_v3 = vadd.f32 %v785_v1, %v784_v62 }
 0x34a   :  { %895 = vrot.lane.b32.xlu1 %v765_v50, %s1350_s4  ;;  %v792_v5 = vrot.slane %v791_v2, 1 }
 0x34b   :  { %948 = vrot.lane.b32.xlu0 %v1532_v51, %s1350_s4 }
 0x34c   :  { %v793_v6 = vadd.f32 %v792_v5, %v791_v2 }
 0x34e   :  { %900 = vrot.lane.b32.xlu1 %v829_v56, %s1350_s4 }
 0x352   :  { %907 = vrot.lane.b32.xlu1 %v772_v61, %s1350_s4 }
 0x356   :  { %919 = vrot.lane.b32.xlu1 %v779_v0, %s1350_s4 }
 0x35a   :  { %931 = vrot.lane.b32.xlu1 %v786_v3, %s1350_s4 }
 0x35e   :  { %943 = vrot.lane.b32.xlu1 %v793_v6, %s1350_s4 }
 0x3a8   :  { %v860_v7 = vpop.permute.xlu1 %859 }
 0x3a9   :  { %v862_v9 = vadd.f32 %v860_v7, %v1483_v35  ;;  %v872_v16 = vpop.permute.xlu0 %871  ;;  %v965_v7 = vlaneseq }
 0x3ab   :  { %v868_v13 = vadd.f32 %v862_v9, %v1488_v38 }
 0x3ac   :  { %v865_v10 = vpop.permute.xlu1 %864 }
 0x3ad   :  { %v867_v12 = vadd.f32 %v865_v10, %v1500_v54  ;;  %v874_v17 = vadd.f32 %v872_v16, %v868_v13  ;;  %v913_v30 = vpop.permute.xlu0 %912  ;;  %v961_v13 = vld [vmem:[#allocation12] sm:$0x1]  ;;  %v1351_v16 = vmov 1966171168  }
 0x3af   :  { %v869_v15 = vadd.f32 %v867_v12, %v1514_v8  ;;  %v880_v23 = vadd.f32 %v874_v17, %v758_v22  ;;  %v1036_v17 = vunpack.c.l.s4 %v1351_v16 }
 0x3b0   :  { %v877_v14 = vpop.permute.xlu1 %876 }
 0x3b1   :  { %v879_v20 = vadd.f32 %v877_v14, %v869_v15  ;;  %v925_v44 = vpop.permute.xlu0 %924 }
 0x3b3   :  { %v881_v18 = vadd.f32 %v879_v20, %v822_v34 }
 0x3b4   :  { %v884_v19 = vpop.permute.xlu1 %883 }
 0x3b5   :  { %v886_v25 = vadd.f32 %v884_v19, %v880_v23  ;;  %v1037_v23 = vunpack.c.0.s8 %v1036_v17 }
 0x3b7   :  { %v892_v28 = vadd.f32 %v886_v25, %v765_v50 }
 0x3b8   :  { %v889_v24 = vpop.permute.xlu1 %888 }
 0x3b9   :  { %v891_v26 = vadd.f32 %v889_v24, %v881_v18  ;;  %v937_v52 = vpop.permute.xlu0 %936 }
 0x3bb   :  { %v893_v29 = vadd.f32 %v891_v26, %v829_v56 }
 0x3bc   :  { %v896_v27 = vpop.permute.xlu1 %895 }
 0x3bd   :  { %v898_v35 = vadd.f32 %v896_v27, %v892_v28  ;;  %v949_v59 = vpop.permute.xlu0 %948 }
 0x3bf   :  { %v904_v36 = vadd.f32 %v898_v35, %v772_v61 }
 0x3c0   :  { %v901_v54 = vpop.permute.xlu1 %900 }
 0x3c1   :  { %v903_v32 = vadd.f32 %v901_v54, %v893_v29 }
 0x3c3   :  { %v905_v38 = vadd.f32 %v903_v32, %v1505_v60 }
 0x3c4   :  { %v908_v8 = vpop.permute.xlu1 %907 }
 0x3c5   :  { %v915_v42 = vadd.f32 %v913_v30, %v905_v38  ;;  %v910_v43 = vadd.f32 %v908_v8, %v904_v36 }
 0x3c7   :  { %v917_v22 = vadd.f32 %v915_v42, %v1520_v21  ;;  %v916_v45 = vadd.f32 %v910_v43, %v779_v0 }
 0x3c8   :  { %v920_v46 = vpop.permute.xlu1 %919 }
 0x3c9   :  { %v927_v34 = vadd.f32 %v925_v44, %v917_v22  ;;  %v922_v47 = vadd.f32 %v920_v46, %v916_v45 }
 0x3cb   :  { %v929_v50 = vadd.f32 %v927_v34, %v1527_v39  ;;  %v928_v53 = vadd.f32 %v922_v47, %v786_v3  ;;  %v966_v39 = vshrl.u32 %v965_v7, 7  ;;  %v957_v3 = vld [vmem:[#allocation10] sm:$0x1] }
 0x3cc   :  { %v932_v55 = vpop.permute.xlu1 %931 }
 0x3cd   :  { %v934_v56 = vadd.f32 %v932_v55, %v928_v53  ;;  %v939_v57 = vadd.f32 %v937_v52, %v929_v50  ;;  %v967_v9 = vsub.s32 0, %v966_v39  ;;  %v1040_v18 = vsub.s32 %v1037_v23, %v966_v39 }
 0x3cf   :  { %v941_v60 = vadd.f32 %v939_v57, %v1532_v51  ;;  %v940_v58 = vadd.f32 %v934_v56, %v793_v6 }
 0x3d0   :  { %v944_v61 = vpop.permute.xlu1 %943 }
 0x3d1   :  { %v951_v33 = vadd.f32 %v949_v59, %v941_v60  ;;  %v946_v62 = vadd.f32 %v944_v61, %v940_v58 }
 0x3d3   :  { %v952_v63 = vmul.f32 0.03125, %v946_v62  ;;  %v953_v21 = vmul.f32 0.03125, %v951_v33 }
 0x3d5   :  { %v954_v0 = vmul.f32 %v952_v63, %v952_v63 }
 0x3d7   :  { %v955_v1 = vsub.f32 %v953_v21, %v954_v0 }
 0x3d9   :  { %v956_v2 = vmax.f32 %v955_v1, 0.0 }
 0x3db   :  { %v958_v5 = vadd.f32 1e-05, %v956_v2 }
 0x3dd   :  { %1186 = vrsqrt.f32 %v958_v5 }
 0x3ea   :  { %v1187_v10 = vpop.eup %1186 }
 0x3eb   :  { %v960_v12 = vmul.f32 %v1187_v10, %v957_v3 }
 0x3ed   :  { %v962_v51 = vmul.f32 %v960_v12, %v952_v63  ;;  %v968_v6 = vrot.slane %v960_v12, %v967_v9 }
 0x3ef   :  { %v963_v14 = vsub.f32 %v961_v13, %v962_v51  ;;  %969 = vrot.lane.b32.xlu1 %v968_v6, %s1350_s4 }
 0x3f1   :  { %v978_v15 = vrot.slane %v963_v14, %v967_v9 }
 0x3f3   :  { %979 = vrot.lane.b32.xlu0 %v978_v15, %s1350_s4 }
 0x461   :  { %v970_v19 = vpop.permute.xlu1 %969 }
 0x462   :  { %v973_v20 = vsel %vm972_vm6, %v960_v12, %v970_v19 }
 0x463   :  { %v986_v24 = vrot.slane %v973_v20, %v967_v9 }
 0x465   :  { %v980_v25 = vpop.permute.xlu0 %979  ;;  %v987_v26 = vmul.f32 %v986_v24, %v1444_v40  ;;  %v988_v28 = vmul.f32 %v986_v24, %v1454_v48  ;;  %v989_v35 = vmul.f32 %v986_v24, %v1467_v4  ;;  %v990_v29 = vmul.f32 %v986_v24, %v1474_v11 }
 0x466   :  { %v982_v27 = vsel %vm972_vm6, %v963_v14, %v980_v25  ;;  %v991_v54 = vmul.f32 %v986_v24, %v1446_v41  ;;  %v992_v32 = vmul.f32 %v986_v24, %v1456_v49  ;;  %v993_v38 = vmul.f32 %v986_v24, %v1486_v37 }
 0x467   :  { %v998_v30 = vrot.slane %v982_v27, %v967_v9  ;;  %v994_v36 = vmul.f32 %v986_v24, %v1496_v31 }
 0x469   :  { %v999_v8 = vadd.f32 %v998_v30, %v987_v26  ;;  %v1000_v42 = vadd.f32 %v998_v30, %v988_v28  ;;  %v1001_v43 = vadd.f32 %v998_v30, %v989_v35  ;;  %v1002_v40 = vadd.f32 %v998_v30, %v990_v29 }
 0x46a   :  { %v1003_v44 = vadd.f32 %v998_v30, %v991_v54  ;;  %v1004_v22 = vadd.f32 %v998_v30, %v992_v32  ;;  %v1005_v48 = vadd.f32 %v998_v30, %v993_v38  ;;  %v1006_v45 = vadd.f32 %v998_v30, %v994_v36 }
 0x46b   :  { %v1007_v4 = vmax.f32 %v999_v8, 0.0  ;;  %v1008_v46 = vmax.f32 %v1000_v42, 0.0  ;;  %v1009_v11 = vmax.f32 %v1001_v43, 0.0  ;;  %v1010_v34 = vmax.f32 %v1002_v40, 0.0 }
 0x46c   :  { %v1011_v47 = vmax.f32 %v1003_v44, 0.0  ;;  %v1012_v41 = vmax.f32 %v1004_v22, 0.0  ;;  %v1013_v52 = vmax.f32 %v1005_v48, 0.0  ;;  %v1014_v49 = vmax.f32 %v1006_v45, 0.0 }
 0x46d   :  { %v1135_v50 = vpack.c.bf16 %v1008_v46, %v1007_v4  ;;  %v1136_v37 = vpack.c.bf16 %v1010_v34, %v1009_v11 }
 0x46e   :  { %v1137_v53 = vpack.c.bf16 %v1012_v41, %v1011_v47  ;;  %v1138_v31 = vpack.c.bf16 %v1014_v49, %v1013_v52 }
 0x46f   :  { %v1041_v55 = vrot.slane %v1135_v50, %v1040_v18  ;;  %v1048_v56 = vrot.slane %v1136_v37, %v1040_v18 }
 0x470   :  { %v1055_v57 = vrot.slane %v1137_v53, %v1040_v18  ;;  %v1062_v60 = vrot.slane %v1138_v31, %v1040_v18 }
 0x471   :  { %v1063_v58 = vcombine.low %v1041_v55, %v1048_v56 }
 0x472   :  { %v1064_v59 = vcombine.low %v1055_v57, %v1062_v60 }
 0x473   :  { %v1071_v61 = vrot.slane %v1063_v58, %v1040_v18 }
 0x474   :  { %v1078_v33 = vrot.slane %v1064_v59, %v1040_v18 }
 0x476   :  { %v1079_v62 = vcombine.low %v1071_v61, %v1078_v33 }
 0x478   :  { %1081 = vst [vmem:[%s1570_s7] sm:$0xff] %v1079_v62 }
 0x479   :  { %1086 = vsyncpa [#allocation3], 1 }
 0x47a   :  { %1087 = vsyncpa [#allocation5], 1 }
 0x47b   :  { %1088 = vsyncpa [#allocation8], 1 }
 0x47c   :  { %1089 = vsyncpa [#allocation11], 1 }

// kernel: cond_generator_forward.6
= control target key start
LH: loop header
LB: loop body
LE: loop exit
PB: predicated region body
PF: predicated region fallthrough
CT: control target
= control target key end

     0   :  { %vm554_vm0 = vcmask 523264   ;;  %vm870_vm1 = vcmask 261120   ;;  %vm1123_vm2 = vcmask 257024   ;;  %s2188_s1 = inlined_call_operand.vmem [shape: bf16[576,32], index: 1, kind: input, shape index: {}]   ;;  %s2189_s0 = inlined_call_operand.vmem [shape: bf16[128,576], index: 0, kind: input, shape index: {}]   ;;  %s2190_s2 = inlined_call_operand.vmem [shape: f32[32,1], index: 2, kind: input, shape index: {}]   ;;  %s2191_s3 = inlined_call_operand.vmem [shape: f32[32,1], index: 3, kind: input, shape index: {}]   ;;  %s2192_s4 = inlined_call_operand.vmem [shape: bf16[128,32], index: 4, kind: output, shape index: {}]  }
   0x1   :  { %v1519_v0 = vld [vmem:[%s2188_s1 + $0x78] sm:$0xff]   ;;  %v1523_v4 = vld [vmem:[%s2188_s1 + $0x70] sm:$0xff]   ;;  %v1527_v8 = vld [vmem:[%s2188_s1 + $0x68] sm:$0xff]  }
   0x2   :  { %v1520_v1 = vld [vmem:[%s2188_s1 + $0xf8] sm:$0xff]   ;;  %1344 = vmatprep.subr.bf16.mxu0 %v1519_v0  ;;  %v1524_v5 = vld [vmem:[%s2188_s1 + $0xf0] sm:$0xff]   ;;  %v1528_v9 = vld [vmem:[%s2188_s1 + $0xe8] sm:$0xff]  }
   0x3   :  { %v1521_v2 = vld [vmem:[%s2188_s1 + $0x38] sm:$0xff]   ;;  %1408 = vmatprep.subr.bf16.mxu1 %v1520_v1  ;;  %v1525_v6 = vld [vmem:[%s2188_s1 + $0x30] sm:$0xff]   ;;  %v1529_v10 = vld [vmem:[%s2188_s1 + $0x28] sm:$0xff]  }
   0x4   :  { %v1522_v3 = vld [vmem:[%s2188_s1 + $0xb8] sm:$0xff]   ;;  %1345 = vmatpush3.bf16.msra.mxu0 %v1521_v2  ;;  %v1526_v7 = vld [vmem:[%s2188_s1 + $0xb0] sm:$0xff]   ;;  %v1530_v11 = vld [vmem:[%s2188_s1 + $0xa8] sm:$0xff]  }
   0x5   :  { %1409 = vmatpush3.bf16.msra.mxu1 %v1522_v3  ;;  %1346 = vmatprep.subr.bf16.mxu0 %v1523_v4  ;;  %v1531_v12 = vld [vmem:[%s2188_s1 + $0x60] sm:$0xff]   ;;  %v1535_v16 = vld [vmem:[%s2188_s1 + $0x58] sm:$0xff]   ;;  %v1539_v20 = vld [vmem:[%s2188_s1 + $0x50] sm:$0xff]  }
   0x6   :  { %1410 = vmatprep.subr.bf16.mxu1 %v1524_v5  ;;  %v1532_v13 = vld [vmem:[%s2188_s1 + $0xe0] sm:$0xff]   ;;  %v1536_v17 = vld [vmem:[%s2188_s1 + $0xd8] sm:$0xff]   ;;  %v1540_v21 = vld [vmem:[%s2188_s1 + $0xd0] sm:$0xff]  }
   0x7   :  { %v1533_v14 = vld [vmem:[%s2188_s1 + $0x20] sm:$0xff]   ;;  %v1537_v18 = vld [vmem:[%s2188_s1 + $0x18] sm:$0xff]   ;;  %v1541_v22 = vld [vmem:[%s2188_s1 + $0x10] sm:$0xff]  }
   0x8   :  { %1347 = vmatpush3.bf16.msra.mxu0 %v1525_v6  ;;  %v1534_v15 = vld [vmem:[%s2188_s1 + $0xa0] sm:$0xff]   ;;  %v1538_v19 = vld [vmem:[%s2188_s1 + $0x98] sm:$0xff]   ;;  %v1542_v23 = vld [vmem:[%s2188_s1 + $0x90] sm:$0xff]  }
   0x9   :  { %1411 = vmatpush3.bf16.msra.mxu1 %v1526_v7  ;;  %1348 = vmatprep.subr.bf16.mxu0 %v1527_v8  ;;  %v1543_v24 = vld [vmem:[%s2188_s1 + $0x48] sm:$0xff]   ;;  %v1547_v28 = vld [vmem:[%s2188_s1 + $0x40] sm:$0xff]   ;;  %v1557_v36 = vld [vmem:[%s2188_s1 + $0x118] sm:$0xff]  }
   0xa   :  { %1412 = vmatprep.subr.bf16.mxu1 %v1528_v9  ;;  %v1544_v25 = vld [vmem:[%s2188_s1 + $0xc8] sm:$0xff]   ;;  %v1548_v29 = vld [vmem:[%s2188_s1 + $0xc0] sm:$0xff]   ;;  %v1570_v42 = vld [vmem:[%s2188_s1 + $0x110] sm:$0xff]  }
   0xb   :  { %v1545_v26 = vld [vmem:[%s2188_s1 + $0x8] sm:$0xff]   ;;  %v1549_v30 = vld [vmem:[%s2188_s1] sm:$0xff]   ;;  %v1566_v43 = vld [vmem:[%s2189_s0 + $0x5c] ss:$20 sps:$4 sm:$0xff]  }
   0xc   :  { %1349 = vmatpush3.bf16.msra.mxu0 %v1529_v10  ;;  %v1546_v27 = vld [vmem:[%s2188_s1 + $0x88] sm:$0xff]   ;;  %v1550_v31 = vld [vmem:[%s2188_s1 + $0x80] sm:$0xff]   ;;  %v1571_v47 = vld [vmem:[%s2189_s0 + $0x7c] ss:$20 sps:$4 sm:$0xff]  }
   0xd   :  { %1413 = vmatpush3.bf16.msra.mxu1 %v1530_v11  ;;  %1350 = vmatprep.subr.bf16.mxu0 %v1531_v12  ;;  %v1551_v32 = vld [vmem:[%s2189_s0] ss:$20 sps:$4 sm:$0xff]   ;;  %v1553_v33 = vld [vmem:[%s2189_s0 + $0x4] ss:$20 sps:$4 sm:$0xff]   ;;  %v1554_v34 = vld [vmem:[%s2189_s0 + $0x8] ss:$20 sps:$4 sm:$0xff]  }
   0xe   :  { %1414 = vmatprep.subr.bf16.mxu1 %v1532_v13  ;;  %v1556_v35 = vld [vmem:[%s2189_s0 + $0xc] ss:$20 sps:$4 sm:$0xff]   ;;  %611 = vmatprep.mubr.bf16.mxu0 %v1553_v33  ;;  %v1560_v38 = vld [vmem:[%s2189_s0 + $0x34] ss:$20 sps:$4 sm:$0xff]   ;;  %v1563_v40 = vld [vmem:[%s2189_s0 + $0x30] ss:$20 sps:$4 sm:$0xff]  }
   0xf   :  { %708 = vmatprep.mubr.bf16.mxu1 %v1556_v35  ;;  %v1558_v37 = vld [vmem:[%s2189_s0 + $0x2c] ss:$20 sps:$4 sm:$0xff]   ;;  %v1562_v39 = vld [vmem:[%s2189_s0 + $0x28] ss:$20 sps:$4 sm:$0xff]   ;;  %v1568_v44 = vld [vmem:[%s2189_s0 + $0x50] ss:$20 sps:$4 sm:$0xff]  }
  0x10   :  { %1351 = vmatpush3.bf16.msra.mxu0 %v1533_v14  ;;  %v1564_v41 = vld [vmem:[%s2189_s0 + $0x54] ss:$20 sps:$4 sm:$0xff]   ;;  %v1569_v45 = vld [vmem:[%s2189_s0 + $0x58] ss:$20 sps:$4 sm:$0xff]   ;;  %v1596_v49 = vld [vmem:[%s2188_s1 + $0x100] sm:$0xff]  }
  0x11   :  { %1415 = vmatpush3.bf16.msra.mxu1 %v1534_v15  ;;  %1352 = vmatprep.subr.bf16.mxu0 %v1535_v16  ;;  %v1583_v46 = vld [vmem:[%s2188_s1 + $0x108] sm:$0xff]   ;;  %v1573_v48 = vld [vmem:[%s2189_s0 + $0x84] ss:$20 sps:$4 sm:$0xff]   ;;  %v1576_v51 = vld [vmem:[%s2189_s0 + $0x80] ss:$20 sps:$4 sm:$0xff]  }
  0x12   :  { %1416 = vmatprep.subr.bf16.mxu1 %v1536_v17  ;;  %v1575_v50 = vld [vmem:[%s2189_s0 + $0x78] ss:$20 sps:$4 sm:$0xff]   ;;  %v1581_v54 = vld [vmem:[%s2189_s0 + $0xa0] ss:$20 sps:$4 sm:$0xff]   ;;  %v1582_v55 = vld [vmem:[%s2189_s0 + $0xa8] ss:$20 sps:$4 sm:$0xff]  }
  0x13   :  { %v1577_v52 = vld [vmem:[%s2189_s0 + $0xa4] ss:$20 sps:$4 sm:$0xff]   ;;  %v1579_v53 = vld [vmem:[%s2189_s0 + $0xac] ss:$20 sps:$4 sm:$0xff]   ;;  %v1586_v57 = vld [vmem:[%s2189_s0 + $0xd4] ss:$20 sps:$4 sm:$0xff]  }
  0x14   :  { %1353 = vmatpush3.bf16.msra.mxu0 %v1537_v18  ;;  %v1584_v56 = vld [vmem:[%s2189_s0 + $0xcc] ss:$20 sps:$4 sm:$0xff]   ;;  %v1588_v58 = vld [vmem:[%s2189_s0 + $0xc8] ss:$20 sps:$4 sm:$0xff]   ;;  %v1589_v59 = vld [vmem:[%s2189_s0 + $0xd0] ss:$20 sps:$4 sm:$0xff]  }
  0x15   :  { %1417 = vmatpush3.bf16.msra.mxu1 %v1538_v19  ;;  %1354 = vmatprep.subr.bf16.mxu0 %v1539_v20  ;;  %v1590_v60 = vld [vmem:[%s2189_s0 + $0xf4] ss:$20 sps:$4 sm:$0xff]   ;;  %v1592_v61 = vld [vmem:[%s2189_s0 + $0xfc] ss:$20 sps:$4 sm:$0xff]   ;;  %v1595_v63 = vld [vmem:[%s2189_s0 + $0xf8] ss:$20 sps:$4 sm:$0xff]  }
  0x16   :  { %1418 = vmatprep.subr.bf16.mxu1 %v1540_v21  ;;  %v1594_v62 = vld [vmem:[%s2189_s0 + $0xf0] ss:$20 sps:$4 sm:$0xff]   ;;  %v1601_v2 = vld [vmem:[%s2189_s0 + $0x118] ss:$20 sps:$4 sm:$0xff]   ;;  %v1602_v3 = vld [vmem:[%s2189_s0 + $0x120] ss:$20 sps:$4 sm:$0xff]  }
  0x17   :  { %v1597_v0 = vld [vmem:[%s2189_s0 + $0x11c] ss:$20 sps:$4 sm:$0xff]   ;;  %v1599_v1 = vld [vmem:[%s2189_s0 + $0x124] ss:$20 sps:$4 sm:$0xff]   ;;  %v1607_v8 = vld [vmem:[%s2189_s0 + $0x60] ss:$20 sps:$4 sm:$0xff]  }
  0x18   :  { %1355 = vmatpush3.bf16.msra.mxu0 %v1541_v22  ;;  %v1603_v4 = vld [vmem:[%s2189_s0 + $0x10] ss:$20 sps:$4 sm:$0xff]   ;;  %v1605_v6 = vld [vmem:[%s2189_s0 + $0x38] ss:$20 sps:$4 sm:$0xff]   ;;  %v1608_v9 = vld [vmem:[%s2189_s0 + $0x100] ss:$20 sps:$4 sm:$0xff]  }
  0x19   :  { %1419 = vmatpush3.bf16.msra.mxu1 %v1542_v23  ;;  %1356 = vmatprep.subr.bf16.mxu0 %v1543_v24  ;;  %v1604_v5 = vld [vmem:[%s2189_s0 + $0xb0] ss:$20 sps:$4 sm:$0xff]   ;;  %v1606_v7 = vld [vmem:[%s2189_s0 + $0xd8] ss:$20 sps:$4 sm:$0xff]   ;;  %v1609_v10 = vld [vmem:[%s2189_s0 + $0x88] ss:$20 sps:$4 sm:$0xff]  }
  0x1a   :  { %1420 = vmatprep.subr.bf16.mxu1 %v1544_v25  ;;  %v1610_v11 = vld [vmem:[%s2189_s0 + $0x128] ss:$20 sps:$4 sm:$0xff]  }
  0x1c   :  { %1357 = vmatpush3.bf16.msra.mxu0 %v1545_v26 }
  0x1d   :  { %1421 = vmatpush3.bf16.msra.mxu1 %v1546_v27  ;;  %1358 = vmatprep.subr.bf16.mxu0 %v1547_v28 }
  0x1e   :  { %1422 = vmatprep.subr.bf16.mxu1 %v1548_v29 }
  0x20   :  { %1359 = vmatpush3.bf16.msra.mxu0 %v1549_v30 }
  0x21   :  { %1423 = vmatpush3.bf16.msra.mxu1 %v1550_v31  ;;  %1484 = vmatprep.subr.bf16.mxu0 %v1557_v36 }
  0x22   :  { %1508 = vmatprep.subr.bf16.mxu1 %v1557_v36 }
  0x23   :  { %612 = vmatmul.mubr.bf16.vlgmr.msra.gmra.mxu0 %v1551_v32 }
  0x24   :  { %709 = vmatmul.mubr.bf16.vlgmr.msra.gmra.mxu1 %v1554_v34  ;;  %1485 = vmatpush3.bf16.msra.mxu0 %v1557_v36 }
  0x25   :  { %1512 = vmatpush3.bf16.msra.mxu1 %v1557_v36  ;;  %619 = vmatprep.mubr.bf16.mxu0 %v1558_v37 }
  0x26   :  { %716 = vmatprep.mubr.bf16.mxu1 %v1560_v38  ;;  %1509 = vmatprep.subr.bf16.mxu1 %v1570_v42 }
  0x27   :  { %1486 = vmatprep.subr.bf16.mxu0 %v1570_v42 }
  0x28   :  { %1487 = vmatpush3.bf16.msra.mxu0 %v1570_v42 }
  0x29   :  { %1513 = vmatpush3.bf16.msra.mxu1 %v1570_v42  ;;  %1488 = vmatprep.subr.bf16.mxu0 %v1583_v46 }
  0x2a   :  { %1510 = vmatprep.subr.bf16.mxu1 %v1583_v46 }
  0x2b   :  { %620 = vmatmul.mubr.bf16.gmra.mxu0 %v1562_v39 }
  0x2c   :  { %717 = vmatmul.mubr.bf16.gmra.mxu1 %v1563_v40  ;;  %627 = vmatprep.mubr.bf16.mxu0 %v1564_v41 }
  0x2d   :  { %724 = vmatprep.mubr.bf16.mxu1 %v1566_v43  ;;  %1514 = vmatpush3.bf16.msra.mxu1 %v1583_v46 }
  0x2e   :  { %1489 = vmatpush3.bf16.msra.mxu0 %v1583_v46  ;;  %1511 = vmatprep.subr.bf16.mxu1 %v1596_v49 }
  0x2f   :  { %1490 = vmatprep.subr.bf16.mxu0 %v1596_v49 }
  0x31   :  { %1515 = vmatpush3.bf16.msra.mxu1 %v1596_v49 }
  0x32   :  { %1491 = vmatpush3.bf16.msra.mxu0 %v1596_v49 }
  0x33   :  { %628 = vmatmul.mubr.bf16.gmra.mxu0 %v1568_v44 }
  0x34   :  { %725 = vmatmul.mubr.bf16.gmra.mxu1 %v1569_v45  ;;  %635 = vmatprep.mubr.bf16.mxu0 %v1571_v47 }
  0x35   :  { %732 = vmatprep.mubr.bf16.mxu1 %v1573_v48 }
  0x3b   :  { %636 = vmatmul.mubr.bf16.gmra.mxu0 %v1575_v50 }
  0x3c   :  { %733 = vmatmul.mubr.bf16.gmra.mxu1 %v1576_v51  ;;  %643 = vmatprep.mubr.bf16.mxu0 %v1577_v52 }
  0x3d   :  { %740 = vmatprep.mubr.bf16.mxu1 %v1579_v53 }
  0x43   :  { %644 = vmatmul.mubr.bf16.gmra.mxu0 %v1581_v54 }
  0x44   :  { %741 = vmatmul.mubr.bf16.gmra.mxu1 %v1582_v55  ;;  %651 = vmatprep.mubr.bf16.mxu0 %v1584_v56 }
  0x45   :  { %748 = vmatprep.mubr.bf16.mxu1 %v1586_v57 }
  0x4b   :  { %652 = vmatmul.mubr.bf16.gmra.mxu0 %v1588_v58 }
  0x4c   :  { %749 = vmatmul.mubr.bf16.gmra.mxu1 %v1589_v59  ;;  %659 = vmatprep.mubr.bf16.mxu0 %v1590_v60 }
  0x4d   :  { %756 = vmatprep.mubr.bf16.mxu1 %v1592_v61 }
  0x53   :  { %660 = vmatmul.mubr.bf16.gmra.mxu0 %v1594_v62 }
  0x54   :  { %757 = vmatmul.mubr.bf16.gmra.mxu1 %v1595_v63  ;;  %667 = vmatprep.mubr.bf16.mxu0 %v1597_v0 }
  0x55   :  { %764 = vmatprep.mubr.bf16.mxu1 %v1599_v1 }
  0x5b   :  { %668 = vmatmul.mubr.bf16.gmra.mxu0 %v1601_v2 }
  0x5c   :  { %765 = vmatmul.mubr.bf16.gmra.mxu1 %v1602_v3  ;;  %1492 = vmatprep.mubr.msk.bf16.mxu0 %vm554_vm0, %v1603_v4 }
  0x5d   :  { %1500 = vmatprep.mubr.msk.bf16.mxu1 %vm554_vm0, %v1604_v5 }
  0x63   :  { %1493 = vmatmul.mubr.msk.bf16.vlgmr.msra.gmra.mxu0 %vm554_vm0, %v1605_v6 }
  0x64   :  { %1501 = vmatmul.mubr.msk.bf16.vlgmr.msra.gmra.mxu1 %vm554_vm0, %v1606_v7  ;;  %1496 = vmatprep.mubr.msk.bf16.mxu0 %vm554_vm0, %v1607_v8 }
  0x65   :  { %1504 = vmatprep.mubr.msk.bf16.mxu1 %vm554_vm0, %v1608_v9 }
  0x6b   :  { %1497 = vmatmul.mubr.msk.bf16.gmra.mxu0 %vm554_vm0, %v1609_v10 }
  0x6c   :  { %1505 = vmatmul.mubr.msk.bf16.gmra.mxu1 %vm554_vm0, %v1610_v11 }
  0xe3   :  { %v1360_v12 = vpop.f32.mrf.mxu0 }
  0xe4   :  { %v1424_v13 = vpop.f32.mrf.mxu1 }
  0xe5   :  { %v1361_v14 = vpop.f32.mrf.mxu0 }
  0xe6   :  { %v1362_v15 = vadd.f32 %v1361_v14, %v1360_v12  ;;  %v1425_v16 = vpop.f32.mrf.mxu1 }
  0xe7   :  { %v1426_v17 = vadd.f32 %v1425_v16, %v1424_v13  ;;  %v1363_v18 = vpop.f32.mrf.mxu0 }
  0xe8   :  { %v1427_v19 = vpop.f32.mrf.mxu1 }
  0xe9   :  { %v1364_v20 = vpop.f32.mrf.mxu0  ;;  %v1881_v21 = vadd.f32 %v1426_v17, %v1362_v15 }
  0xea   :  { %v1365_v22 = vadd.f32 %v1364_v20, %v1363_v18  ;;  %v1428_v23 = vpop.f32.mrf.mxu1 }
  0xeb   :  { %v1429_v24 = vadd.f32 %v1428_v23, %v1427_v19  ;;  %v1366_v25 = vpop.f32.mrf.mxu0 }
  0xec   :  { %v1430_v26 = vpop.f32.mrf.mxu1 }
  0xed   :  { %v1367_v27 = vpop.f32.mrf.mxu0  ;;  %v1883_v28 = vadd.f32 %v1429_v24, %v1365_v22 }
  0xee   :  { %v1431_v29 = vpop.f32.mrf.mxu1  ;;  %v1368_v23 = vadd.f32 %v1367_v27, %v1366_v25 }
  0xef   :  { %v1885_v30 = vpop.f32.mrf.mxu0  ;;  %v1432_v24 = vadd.f32 %v1431_v29, %v1430_v26 }
  0xf0   :  { %v1887_v31 = vpop.f32.mrf.mxu1 }
  0xf1   :  { %v1370_v32 = vpop.f32.mrf.mxu0 }
  0xf2   :  { %v1434_v33 = vpop.f32.mrf.mxu1 }
  0xf3   :  { %v1372_v34 = vpop.f32.mrf.mxu0 }
  0xf4   :  { %v1436_v35 = vpop.f32.mrf.mxu1 }
  0xf5   :  { %v1373_v36 = vpop.f32.mrf.mxu0 }
  0xf6   :  { %v1374_v37 = vadd.f32 %v1373_v36, %v1372_v34  ;;  %v1437_v38 = vpop.f32.mrf.mxu1 }
  0xf7   :  { %v1438_v39 = vadd.f32 %v1437_v38, %v1436_v35  ;;  %v1375_v40 = vpop.f32.mrf.mxu0 }
  0xf8   :  { %v1439_v41 = vpop.f32.mrf.mxu1 }
  0xf9   :  { %v1376_v42 = vpop.f32.mrf.mxu0  ;;  %v1889_v43 = vadd.f32 %v1438_v39, %v1374_v37 }
  0xfa   :  { %v1377_v44 = vadd.f32 %v1376_v42, %v1375_v40  ;;  %v1440_v45 = vpop.f32.mrf.mxu1  ;;  %v1371_v40 = vadd.f32 %v1370_v32, %v1885_v30 }
  0xfb   :  { %v1441_v46 = vadd.f32 %v1440_v45, %v1439_v41  ;;  %v1378_v47 = vpop.f32.mrf.mxu0  ;;  %v1435_v41 = vadd.f32 %v1434_v33, %v1887_v31 }
  0xfc   :  { %v1442_v48 = vpop.f32.mrf.mxu1 }
  0xfd   :  { %v1379_v49 = vpop.f32.mrf.mxu0  ;;  %v1891_v50 = vadd.f32 %v1441_v46, %v1377_v44  ;;  %v719_v44 = vadd.f32 %v1432_v24, %v1368_v23 }
  0xfe   :  { %v1380_v51 = vadd.f32 %v1379_v49, %v1378_v47  ;;  %v1443_v52 = vpop.f32.mrf.mxu1 }
  0xff   :  { %v1444_v53 = vadd.f32 %v1443_v52, %v1442_v48  ;;  %v1893_v54 = vpop.f32.mrf.mxu0 }
 0x100   :  { %v1895_v55 = vpop.f32.mrf.mxu1 }
 0x101   :  { %v1897_v56 = vpop.f32.mrf.mxu0  ;;  %v1899_v57 = vadd.f32 %v1444_v53, %v1380_v51  ;;  %v722_v51 = vadd.f32 %v1435_v41, %v1371_v40 }
 0x102   :  { %v1901_v58 = vpop.f32.mrf.mxu1 }
 0x103   :  { %v1384_v59 = vpop.f32.mrf.mxu0 }
 0x104   :  { %v1448_v60 = vpop.f32.mrf.mxu1 }
 0x105   :  { %v1385_v61 = vpop.f32.mrf.mxu0 }
 0x106   :  { %v1449_v62 = vpop.f32.mrf.mxu1 }
 0x107   :  { %v1387_v63 = vpop.f32.mrf.mxu0 }
 0x108   :  { %v1451_v0 = vpop.f32.mrf.mxu1 }
 0x109   :  { %v1388_v1 = vpop.f32.mrf.mxu0 }
 0x10a   :  { %v1452_v2 = vpop.f32.mrf.mxu1 }
 0x10b   :  { %v1390_v3 = vpop.f32.mrf.mxu0 }
 0x10c   :  { %v1454_v4 = vpop.f32.mrf.mxu1 }
 0x10d   :  { %v1391_v5 = vpop.f32.mrf.mxu0 }
 0x10e   :  { %v1455_v6 = vpop.f32.mrf.mxu1  ;;  %v1392_v35 = vadd.f32 %v1391_v5, %v1390_v3  ;;  %v1450_v5 = vadd.f32 %v1449_v62, %v1448_v60 }
 0x10f   :  { %v1393_v7 = vpop.f32.mrf.mxu0  ;;  %v1456_v36 = vadd.f32 %v1455_v6, %v1454_v4  ;;  %v1386_v4 = vadd.f32 %v1385_v61, %v1384_v59 }
 0x110   :  { %v1457_v8 = vpop.f32.mrf.mxu1 }
 0x111   :  { %v1394_v9 = vpop.f32.mrf.mxu0  ;;  %v751_v25 = vadd.f32 %v1456_v36, %v1392_v35  ;;  %v743_v23 = vadd.f32 %v1450_v5, %v1386_v4 }
 0x112   :  { %v1458_v10 = vpop.f32.mrf.mxu1  ;;  %v1395_v26 = vadd.f32 %v1394_v9, %v1393_v7  ;;  %v1389_v9 = vadd.f32 %v1388_v1, %v1387_v63 }
 0x113   :  { %v1903_v11 = vpop.f32.mrf.mxu0  ;;  %v1459_v27 = vadd.f32 %v1458_v10, %v1457_v8  ;;  %v1453_v10 = vadd.f32 %v1452_v2, %v1451_v0 }
 0x114   :  { %v1905_v12 = vpop.f32.mrf.mxu1 }
 0x115   :  { %v1907_v13 = vpop.f32.mrf.mxu0  ;;  %v754_v53 = vadd.f32 %v1459_v27, %v1395_v26  ;;  %v746_v35 = vadd.f32 %v1453_v10, %v1389_v9 }
 0x116   :  { %v1909_v14 = vpop.f32.mrf.mxu1 }
 0x117   :  { %v1911_v15 = vpop.f32.mrf.mxu0 }
 0x118   :  { %v1913_v16 = vpop.f32.mrf.mxu1 }
 0x119   :  { %v1915_v17 = vpop.f32.mrf.mxu0 }
 0x11a   :  { %v1917_v18 = vpop.f32.mrf.mxu1 }
 0x11b   :  { %v1919_v19 = vpop.f32.mrf.mxu0 }
 0x11c   :  { %v1921_v20 = vpop.f32.mrf.mxu1 }
 0x11d   :  { %v1923_v22 = vpop.f32.mrf.mxu0 }
 0x11e   :  { %v1925_v34 = vpop.f32.mrf.mxu1 }
 0x11f   :  { %v1927_v37 = vpop.f32.mrf.mxu0 }
 0x120   :  { %v1929_v38 = vpop.f32.mrf.mxu1 }
 0x121   :  { %v1931_v39 = vpop.f32.mrf.mxu0 }
 0x122   :  { %v1935_v42 = vpop.f32.mrf.mxu1 }
 0x123   :  { %v1494_v45 = vpop.f32.mrf.mxu0 }
 0x124   :  { %v1937_v29 = vadd.f32 %v1494_v45, %v719_v44  ;;  %v1502_v46 = vpop.f32.mrf.mxu1 }
 0x125   :  { %v1939_v47 = vadd.f32 %v1502_v46, %v751_v25  ;;  %v807_v48 = vpop.f32.mrf.mxu0 }
 0x126   :  { %v839_v49 = vpop.f32.mrf.mxu1  ;;  %v877_v30 = vsel %vm870_vm1, %v1937_v29, 0.0  ;;  %v1944_v31 = vadd.f32 %v807_v48, %v1881_v21  ;;  %v885_v8 = vmul.f32 %v1937_v29, %v1937_v29 }
 0x127   :  { %v1495_v32 = vpop.f32.mrf.mxu0  ;;  %v941_v33 = vsel %vm870_vm1, %v1939_v47, 0.0  ;;  %878 = vadd.xlane.f32.xlu1 %v877_v30  ;;  %v1962_v61 = vadd.f32 %v839_v49, %v743_v23  ;;  %v949_v2 = vmul.f32 %v1939_v47, %v1939_v47  ;;  %v1383_v30 = vadd.f32 %v1897_v56, %v1893_v54 }
 0x128   :  { %v1948_v52 = vadd.f32 %v1495_v32, %v722_v51  ;;  %v1503_v3 = vpop.f32.mrf.mxu1  ;;  %942 = vadd.xlane.f32.xlu0 %v941_v33  ;;  %v871_v21 = vsel %vm870_vm1, %v1944_v31, 0.0  ;;  %v893_v24 = vsel %vm870_vm1, %v885_v8, 0.0  ;;  %v883_v26 = vmul.f32 %v1944_v31, %v1944_v31 }
 0x129   :  { %v1950_v6 = vadd.f32 %v1503_v3, %v754_v53  ;;  %v810_v0 = vpop.f32.mrf.mxu0  ;;  %v935_v1 = vsel %vm870_vm1, %v1962_v61, 0.0  ;;  %v957_v25 = vsel %vm870_vm1, %v949_v2, 0.0  ;;  %v947_v51 = vmul.f32 %v1962_v61, %v1962_v61 }
 0x12a   :  { %v880_v7 = vsel %vm870_vm1, %v1948_v52, 0.0  ;;  %v886_v60 = vmul.f32 %v1948_v52, %v1948_v52  ;;  %v842_v62 = vpop.f32.mrf.mxu1  ;;  %v1973_v40 = vadd.f32 %v810_v0, %v1883_v28  ;;  %v887_v49 = vsel %vm870_vm1, %v883_v26, 0.0 }
 0x12b   :  { %881 = vadd.xlane.f32.xlu1 %v880_v7  ;;  %v944_v59 = vsel %vm870_vm1, %v1950_v6, 0.0  ;;  %v1965_v36 = vadd.f32 %v842_v62, %v746_v35  ;;  %v950_v44 = vmul.f32 %v1950_v6, %v1950_v6  ;;  %v1498_v45 = vpop.f32.mrf.mxu0  ;;  %v1447_v32 = vadd.f32 %v1901_v58, %v1895_v55 }
 0x12c   :  { %872 = vadd.xlane.f32.xlu0 %v871_v21  ;;  %v896_v63 = vsel %vm870_vm1, %v886_v60, 0.0  ;;  %v884_v28 = vmul.f32 %v1973_v40, %v1973_v40  ;;  %v1506_v46 = vpop.f32.mrf.mxu1  ;;  %v951_v5 = vsel %vm870_vm1, %v947_v51, 0.0  ;;  %v1407_v7 = vadd.f32 %v1931_v39, %v1927_v37 }
 0x12d   :  { %v938_v41 = vsel %vm870_vm1, %v1965_v36, 0.0  ;;  %v960_v27 = vsel %vm870_vm1, %v950_v44, 0.0  ;;  %v823_v48 = vpop.f32.mrf.mxu0  ;;  %v948_v53 = vmul.f32 %v1965_v36, %v1965_v36  ;;  %v1471_v54 = vadd.f32 %v1935_v42, %v1929_v38 }
 0x12e   :  { %v890_v33 = vsel %vm870_vm1, %v884_v28, 0.0  ;;  %v855_v3 = vpop.f32.mrf.mxu1  ;;  %v738_v56 = vadd.f32 %v1447_v32, %v1383_v30  ;;  %v1404_v55 = vadd.f32 %v1923_v22, %v1919_v19  ;;  %v1468_v58 = vadd.f32 %v1925_v34, %v1921_v20 }
 0x12f   :  { %945 = vadd.xlane.f32.xlu1 %v944_v59  ;;  %v1499_v4 = vpop.f32.mrf.mxu0  ;;  %v954_v8 = vsel %vm870_vm1, %v948_v53, 0.0  ;;  %v2008_v9 = vadd.f32 %v1498_v45, %v1899_v57  ;;  %v874_v37 = vsel %vm870_vm1, %v1973_v40, 0.0  ;;  %v770_v38 = vadd.f32 %v1471_v54, %v1407_v7 }
 0x130   :  { %894 = vadd.xlane.f32.xlu0 %v893_v24  ;;  %v2004_v21 = vadd.f32 %v1499_v4, %v738_v56  ;;  %v1507_v10 = vpop.f32.mrf.mxu1  ;;  %v767_v39 = vadd.f32 %v1468_v58, %v1404_v55  ;;  %v2026_v59 = vadd.f32 %v823_v48, %v1889_v43  ;;  %v1401_v62 = vadd.f32 %v1915_v17, %v1911_v15 }
 0x131   :  { %v2012_v42 = vadd.f32 %v1507_v10, %v770_v38  ;;  %v826_v22 = vpop.f32.mrf.mxu0  ;;  %v905_v57 = vsel %vm870_vm1, %v2008_v9, 0.0  ;;  %v1465_v24 = vadd.f32 %v1917_v18, %v1913_v16  ;;  %v1462_v35 = vadd.f32 %v1909_v14, %v1905_v12 }
 0x132   :  { %v908_v19 = vsel %vm870_vm1, %v2004_v21, 0.0  ;;  %v2016_v20 = vadd.f32 %v1506_v46, %v767_v39  ;;  %v2021_v34 = vadd.f32 %v826_v22, %v1891_v50  ;;  %v1398_v50 = vadd.f32 %v1907_v13, %v1903_v11  ;;  %v858_v0 = vpop.f32.mrf.mxu1 }
 0x133   :  { %897 = vadd.xlane.f32.xlu1 %v896_v63  ;;  %v980_v23 = vsel %vm870_vm1, %v2012_v42, 0.0  ;;  %v914_v63 = vmul.f32 %v2004_v21, %v2004_v21  ;;  %v899_v15 = vsel %vm870_vm1, %v2026_v59, 0.0  ;;  %v913_v16 = vmul.f32 %v2008_v9, %v2008_v9 }
 0x134   :  { %936 = vadd.xlane.f32.xlu0 %v935_v1  ;;  %v977_v60 = vsel %vm870_vm1, %v2016_v20, 0.0  ;;  %v902_v43 = vsel %vm870_vm1, %v2021_v34, 0.0  ;;  %v762_v17 = vadd.f32 %v1465_v24, %v1401_v62  ;;  %v759_v11 = vadd.f32 %v1462_v35, %v1398_v50 }
 0x135   :  { %v924_v12 = vsel %vm870_vm1, %v914_v63, 0.0  ;;  %v921_v18 = vsel %vm870_vm1, %v913_v16, 0.0  ;;  %v912_v2 = vmul.f32 %v2021_v34, %v2021_v34  ;;  %v911_v44 = vmul.f32 %v2026_v59, %v2026_v59 }
 0x136   :  { %v2046_v13 = vadd.f32 %v858_v0, %v762_v17  ;;  %v2049_v14 = vadd.f32 %v855_v3, %v759_v11  ;;  %v986_v46 = vmul.f32 %v2012_v42, %v2012_v42  ;;  %v1619_v32 = vmov 0  }
 0x137   :  { %939 = vadd.xlane.f32.xlu1 %v938_v41  ;;  %v918_v45 = vsel %vm870_vm1, %v912_v2, 0.0  ;;  %v915_v26 = vsel %vm870_vm1, %v911_v44, 0.0  ;;  %1517 = vset.pattern.permute.xlu0 %v1619_v32 }
 0x138   :  { %958 = vadd.xlane.f32.xlu0 %v957_v25  ;;  %v974_v1 = vsel %vm870_vm1, %v2046_v13, 0.0  ;;  %v971_v41 = vsel %vm870_vm1, %v2049_v14, 0.0  ;;  %v984_v25 = vmul.f32 %v2046_v13, %v2046_v13  ;;  %v996_v51 = vsel %vm870_vm1, %v986_v46, 0.0  ;;  %1518 = vset.pattern.permute.xlu1 %v1619_v32 }
 0x13a   :  { %v990_v28 = vsel %vm870_vm1, %v984_v25, 0.0 }
 0x13b   :  { %961 = vadd.xlane.f32.xlu1 %v960_v27  ;;  %v983_v27 = vmul.f32 %v2049_v14, %v2049_v14 }
 0x13c   :  { %888 = vadd.xlane.f32.xlu0 %v887_v49  ;;  %v985_v49 = vmul.f32 %v2016_v20, %v2016_v20 }
 0x13d   :  { %v987_v48 = vsel %vm870_vm1, %v983_v27, 0.0 }
 0x13e   :  { %v993_v30 = vsel %vm870_vm1, %v985_v49, 0.0 }
 0x13f   :  { %891 = vadd.xlane.f32.xlu1 %v890_v33 }
 0x140   :  { %952 = vadd.xlane.f32.xlu0 %v951_v5 }
 0x143   :  { %955 = vadd.xlane.f32.xlu1 %v954_v8 }
 0x144   :  { %875 = vadd.xlane.f32.xlu0 %v874_v37 }
 0x147   :  { %909 = vadd.xlane.f32.xlu1 %v908_v19 }
 0x148   :  { %906 = vadd.xlane.f32.xlu0 %v905_v57 }
 0x14b   :  { %981 = vadd.xlane.f32.xlu1 %v980_v23 }
 0x14c   :  { %978 = vadd.xlane.f32.xlu0 %v977_v60 }
 0x14f   :  { %903 = vadd.xlane.f32.xlu1 %v902_v43 }
 0x150   :  { %900 = vadd.xlane.f32.xlu0 %v899_v15 }
 0x153   :  { %925 = vadd.xlane.f32.xlu1 %v924_v12 }
 0x154   :  { %922 = vadd.xlane.f32.xlu0 %v921_v18 }
 0x157   :  { %975 = vadd.xlane.f32.xlu1 %v974_v1 }
 0x158   :  { %972 = vadd.xlane.f32.xlu0 %v971_v41 }
 0x15b   :  { %919 = vadd.xlane.f32.xlu1 %v918_v45 }
 0x15c   :  { %916 = vadd.xlane.f32.xlu0 %v915_v26 }
 0x15f   :  { %991 = vadd.xlane.f32.xlu1 %v990_v28 }
 0x160   :  { %988 = vadd.xlane.f32.xlu0 %v987_v48 }
 0x163   :  { %997 = vadd.xlane.f32.xlu1 %v996_v51 }
 0x164   :  { %994 = vadd.xlane.f32.xlu0 %v993_v30 }
 0x1b0   :  { %v879_v33 = vpop.xlane.xlu1 %878 }
 0x1b1   :  { %v943_v53 = vpop.xlane.xlu0 %942 }
 0x1b4   :  { %v882_v3 = vpop.xlane.xlu1 %881 }
 0x1b5   :  { %v873_v4 = vpop.xlane.xlu0 %872 }
 0x1b8   :  { %v946_v5 = vpop.xlane.xlu1 %945 }
 0x1b9   :  { %v895_v7 = vpop.xlane.xlu0 %894 }
 0x1bc   :  { %v898_v54 = vpop.xlane.xlu1 %897 }
 0x1bd   :  { %v937_v56 = vpop.xlane.xlu0 %936 }
 0x1c0   :  { %v940_v55 = vpop.xlane.xlu1 %939 }
 0x1c1   :  { %v959_v58 = vpop.xlane.xlu0 %958 }
 0x1c4   :  { %v962_v8 = vpop.xlane.xlu1 %961 }
 0x1c5   :  { %v889_v10 = vpop.xlane.xlu0 %888 }
 0x1c8   :  { %v892_v37 = vpop.xlane.xlu1 %891 }
 0x1c9   :  { %v953_v38 = vpop.xlane.xlu0 %952 }
 0x1cc   :  { %v956_v39 = vpop.xlane.xlu1 %955 }
 0x1cd   :  { %v876_v19 = vpop.xlane.xlu0 %875 }
 0x1d0   :  { %v910_v22 = vpop.xlane.xlu1 %909 }
 0x1d1   :  { %v907_v57 = vpop.xlane.xlu0 %906  ;;  %v930_v63 = vadd.f32 %v910_v22, %v882_v3 }
 0x1d2   :  { %v929_v0 = vadd.f32 %v907_v57, %v879_v33 }
 0x1d3   :  { %v966_v11 = vadd.f32 %v946_v5, %v930_v63 }
 0x1d4   :  { %v982_v23 = vpop.xlane.xlu1 %981  ;;  %v965_v12 = vadd.f32 %v943_v53, %v929_v0 }
 0x1d5   :  { %v979_v60 = vpop.xlane.xlu0 %978  ;;  %v1002_v25 = vadd.f32 %v982_v23, %v966_v11 }
 0x1d6   :  { %v1001_v26 = vadd.f32 %v979_v60, %v965_v12 }
 0x1d7   :  { %v2076_v3 = vmul.f32 0.0078125, %v1002_v25 }
 0x1d8   :  { %v904_v62 = vpop.xlane.xlu1 %903  ;;  %v1009_v53 = vmul.f32 0.0078125, %v1001_v26  ;;  %v1030_v26 = vld [vmem:[%s2190_s2 + $0x18] sm:$0xff] }
 0x1d9   :  { %v901_v24 = vpop.xlane.xlu0 %900  ;;  %v928_v41 = vadd.f32 %v904_v62, %v876_v19 }
 0x1da   :  { %v927_v43 = vadd.f32 %v901_v24, %v873_v4  ;;  %v1017_v23 = vmul.f32 %v1009_v53, %v1009_v53 }
 0x1db   :  { %v964_v30 = vadd.f32 %v940_v55, %v928_v41  ;;  %v1018_v55 = vmul.f32 %v2076_v3, %v2076_v3  ;;  %v1029_v41 = vld [vmem:[%s2190_s2 + $0x10] sm:$0xff] }
 0x1dc   :  { %v926_v50 = vpop.xlane.xlu1 %925  ;;  %v963_v17 = vadd.f32 %v937_v56, %v927_v43 }
 0x1dd   :  { %v923_v35 = vpop.xlane.xlu0 %922  ;;  %v934_v27 = vadd.f32 %v926_v50, %v898_v54 }
 0x1de   :  { %v933_v28 = vadd.f32 %v923_v35, %v895_v7 }
 0x1df   :  { %v970_v4 = vadd.f32 %v962_v8, %v934_v27 }
 0x1e0   :  { %v976_v15 = vpop.xlane.xlu1 %975  ;;  %v969_v54 = vadd.f32 %v959_v58, %v933_v28 }
 0x1e1   :  { %v973_v16 = vpop.xlane.xlu0 %972  ;;  %v1000_v5 = vadd.f32 %v976_v15, %v964_v30  ;;  %v1028_v30 = vld [vmem:[%s2190_s2 + $0x8] sm:$0xff] }
 0x1e2   :  { %v999_v18 = vadd.f32 %v973_v16, %v963_v17 }
 0x1e3   :  { %v1008_v60 = vmul.f32 0.0078125, %v1000_v5 }
 0x1e4   :  { %v920_v1 = vpop.xlane.xlu1 %919  ;;  %v2074_v46 = vmul.f32 0.0078125, %v999_v18  ;;  %v1027_v18 = vld [vmem:[%s2190_s2] sm:$0xff] }
 0x1e5   :  { %v917_v2 = vpop.xlane.xlu0 %916  ;;  %v932_v44 = vadd.f32 %v920_v1, %v892_v37  ;;  %v1016_v0 = vmul.f32 %v1008_v60, %v1008_v60 }
 0x1e6   :  { %v931_v45 = vadd.f32 %v917_v2, %v889_v10  ;;  %v1015_v56 = vmul.f32 %v2074_v46, %v2074_v46 }
 0x1e7   :  { %v968_v32 = vadd.f32 %v956_v39, %v932_v44 }
 0x1e8   :  { %v992_v48 = vpop.xlane.xlu1 %991  ;;  %v967_v49 = vadd.f32 %v953_v38, %v931_v45 }
 0x1e9   :  { %v989_v51 = vpop.xlane.xlu0 %988  ;;  %v1004_v22 = vadd.f32 %v992_v48, %v968_v32  ;;  %v1045_v48 = vld [vmem:[%s2191_s3 + $0x10] sm:$0xff] }
 0x1ea   :  { %v1003_v33 = vadd.f32 %v989_v51, %v967_v49 }
 0x1eb   :  { %v1012_v50 = vmul.f32 0.0078125, %v1004_v22 }
 0x1ec   :  { %v1011_v10 = vmul.f32 0.0078125, %v1003_v33  ;;  %v998_v37 = vpop.xlane.xlu1 %997 }
 0x1ed   :  { %v1006_v7 = vadd.f32 %v998_v37, %v970_v4  ;;  %v995_v19 = vpop.xlane.xlu0 %994  ;;  %v1020_v15 = vsub.f32 %v1012_v50, %v1016_v0  ;;  %v1043_v4 = vld [vmem:[%s2191_s3] sm:$0xff] }
 0x1ee   :  { %v1019_v57 = vsub.f32 %v1011_v10, %v1015_v56  ;;  %v1005_v38 = vadd.f32 %v995_v19, %v969_v54  ;;  %v1044_v56 = vld [vmem:[%s2191_s3 + $0x8] sm:$0xff]  ;;  %v1046_v54 = vld [vmem:[%s2191_s3 + $0x18] sm:$0xff] }
 0x1ef   :  { %v1014_v39 = vmul.f32 0.0078125, %v1006_v7  ;;  %v1024_v11 = vmax.f32 %v1020_v15, 0.0 }
 0x1f0   :  { %v1023_v62 = vmax.f32 %v1019_v57, 0.0  ;;  %v1013_v8 = vmul.f32 0.0078125, %v1005_v38 }
 0x1f1   :  { %v1022_v24 = vsub.f32 %v1014_v39, %v1018_v55  ;;  %v1032_v12 = vadd.f32 1e-05, %v1024_v11 }
 0x1f2   :  { %v1031_v35 = vadd.f32 1e-05, %v1023_v62  ;;  %v1021_v43 = vsub.f32 %v1013_v8, %v1017_v23 }
 0x1f3   :  { %v1026_v63 = vmax.f32 %v1022_v24, 0.0 }
 0x1f4   :  { %1611 = vrsqrt.f32 %v1031_v35  ;;  %v1025_v58 = vmax.f32 %v1021_v43, 0.0 }
 0x1f5   :  { %v1034_v16 = vadd.f32 1e-05, %v1026_v63 }
 0x1f6   :  { %v1033_v17 = vadd.f32 1e-05, %v1025_v58 }
 0x1f8   :  { %1613 = vrsqrt.f32 %v1033_v17 }
 0x1f9   :  { %1615 = vrsqrt.f32 %v1034_v16 }
 0x1fa   :  { %1617 = vrsqrt.f32 %v1032_v12 }
 0x201   :  { %v1612_v1 = vpop.eup %1611 }
 0x202   :  { %v1039_v2 = vmul.f32 %v1612_v1, %v1027_v18 }
 0x204   :  { %1057 = vperm.xlu0 %1517, %v1039_v2   ;;  %v1047_v33 = vmul.f32 %v1039_v2, %v2074_v46 }
 0x205   :  { %v1614_v44 = vpop.eup %1613 }
 0x206   :  { %v1041_v45 = vmul.f32 %v1614_v44, %v1029_v41  ;;  %v1616_v25 = vpop.eup %1615 }
 0x207   :  { %v1042_v27 = vmul.f32 %v1616_v25, %v1030_v26  ;;  %v1618_v51 = vpop.eup %1617 }
 0x208   :  { %1067 = vperm.xlu1 %1518, %v1041_v45   ;;  %v1049_v28 = vmul.f32 %v1041_v45, %v1009_v53  ;;  %v1040_v32 = vmul.f32 %v1618_v51, %v1028_v30  ;;  %v1051_v53 = vsub.f32 %v1043_v4, %v1047_v33 }
 0x209   :  { %v1050_v37 = vmul.f32 %v1042_v27, %v2076_v3 }
 0x20a   :  { %v1053_v49 = vsub.f32 %v1045_v48, %v1049_v28  ;;  %v1048_v5 = vmul.f32 %v1040_v32, %v1008_v60 }
 0x20b   :  { %v1054_v46 = vsub.f32 %v1046_v54, %v1050_v37 }
 0x20c   :  { %1072 = vperm.xlu1 %1518, %v1042_v27   ;;  %v1052_v10 = vsub.f32 %v1044_v56, %v1048_v5 }
 0x210   :  { %1091 = vperm.xlu1 %1518, %v1053_v49  }
 0x214   :  { %1062 = vperm.xlu1 %1518, %v1040_v32  }
 0x218   :  { %1081 = vperm.xlu1 %1518, %v1051_v53  }
 0x21c   :  { %1086 = vperm.xlu1 %1518, %v1052_v10  }
 0x220   :  { %1096 = vperm.xlu1 %1518, %v1054_v46  }
 0x27f   :  { %v1058_v43 = vpop.permute.xlu0 %1057 }
 0x280   :  { %v1160_v15 = vmul.f32 %v1058_v43, %v1962_v61  ;;  %v1192_v16 = vmul.f32 %v1058_v43, %v2049_v14 }
 0x283   :  { %v1068_v7 = vpop.permute.xlu1 %1067 }
 0x284   :  { %v1077_v22 = vmul.f32 %v1068_v7, %v1937_v29  ;;  %v1130_v57 = vmul.f32 %v1068_v7, %v2008_v9  ;;  %v1162_v38 = vmul.f32 %v1068_v7, %v1939_v47  ;;  %v1194_v55 = vmul.f32 %v1068_v7, %v2016_v20 }
 0x285   :  { %v1075_v47 = vmul.f32 %v1058_v43, %v1944_v31  ;;  %v1128_v20 = vmul.f32 %v1058_v43, %v2026_v59 }
 0x287   :  { %v1073_v19 = vpop.permute.xlu1 %1072 }
 0x28b   :  { %v1092_v39 = vpop.permute.xlu1 %1091 }
 0x28c   :  { %v1101_v23 = vadd.f32 %v1092_v39, %v1077_v22  ;;  %v1134_v3 = vadd.f32 %v1130_v57, %v1092_v39  ;;  %v1166_v60 = vadd.f32 %v1162_v38, %v1092_v39  ;;  %v1198_v62 = vadd.f32 %v1194_v55, %v1092_v39 }
 0x28e   :  { %v1105_v8 = vmax.f32 %v1101_v23, 0.0  ;;  %v1138_v24 = vmax.f32 %v1134_v3, 0.0  ;;  %v1170_v50 = vmax.f32 %v1166_v60, 0.0  ;;  %v1202_v35 = vmax.f32 %v1198_v62, 0.0 }
 0x28f   :  { %v1063_v63 = vpop.permute.xlu1 %1062 }
 0x290   :  { %v1330_v0 = vpack.c.bf16 %v1105_v8, %v1105_v8  ;;  %v1334_v29 = vpack.c.bf16 %v1138_v24, %v1138_v24  ;;  %v1338_v58 = vpack.c.bf16 %v1170_v50, %v1170_v50  ;;  %v1342_v9 = vpack.c.bf16 %v1202_v35, %v1202_v35 }
 0x291   :  { %v1076_v2 = vmul.f32 %v1063_v63, %v1973_v40  ;;  %v1129_v41 = vmul.f32 %v1063_v63, %v2021_v34  ;;  %v1161_v44 = vmul.f32 %v1063_v63, %v1965_v36  ;;  %v1193_v45 = vmul.f32 %v1063_v63, %v2046_v13 }
 0x292   :  { %1126 = vst.msk [vmem:[%s2192_s4 + $0x8] sm:$0xf] %vm1123_vm2, %v1330_v0  ;;  %1158 = vst.msk [vmem:[%s2192_s4 + $0x18] sm:$0xf] %vm1123_vm2, %v1334_v29  ;;  %v1078_v36 = vmul.f32 %v1073_v19, %v1948_v52  ;;  %v1131_v40 = vmul.f32 %v1073_v19, %v2004_v21  ;;  %v1163_v34 = vmul.f32 %v1073_v19, %v1950_v6 }
 0x293   :  { %1190 = vst.msk [vmem:[%s2192_s4 + $0x28] sm:$0xf] %vm1123_vm2, %v1338_v58  ;;  %1222 = vst.msk [vmem:[%s2192_s4 + $0x38] sm:$0xf] %vm1123_vm2, %v1342_v9  ;;  %v1082_v31 = vpop.permute.xlu1 %1081  ;;  %v1195_v13 = vmul.f32 %v1073_v19, %v2012_v42 }
 0x294   :  { %v1099_v61 = vadd.f32 %v1082_v31, %v1075_v47  ;;  %v1132_v59 = vadd.f32 %v1128_v20, %v1082_v31  ;;  %v1164_v14 = vadd.f32 %v1160_v15, %v1082_v31  ;;  %v1196_v17 = vadd.f32 %v1192_v16, %v1082_v31 }
 0x296   :  { %v1103_v11 = vmax.f32 %v1099_v61, 0.0  ;;  %v1136_v12 = vmax.f32 %v1132_v59, 0.0  ;;  %v1168_v18 = vmax.f32 %v1164_v14, 0.0  ;;  %v1200_v1 = vmax.f32 %v1196_v17, 0.0 }
 0x297   :  { %v1087_v25 = vpop.permute.xlu1 %1086 }
 0x298   :  { %v1328_v26 = vpack.c.bf16 %v1103_v11, %v1103_v11  ;;  %v1332_v27 = vpack.c.bf16 %v1136_v12, %v1136_v12  ;;  %v1336_v28 = vpack.c.bf16 %v1168_v18, %v1168_v18  ;;  %v1340_v48 = vpack.c.bf16 %v1200_v1, %v1200_v1 }
 0x299   :  { %v1100_v49 = vadd.f32 %v1087_v25, %v1076_v2  ;;  %v1133_v51 = vadd.f32 %v1129_v41, %v1087_v25  ;;  %v1165_v30 = vadd.f32 %v1161_v44, %v1087_v25  ;;  %v1197_v32 = vadd.f32 %v1193_v45, %v1087_v25 }
 0x29a   :  { %1124 = vst.msk [vmem:[%s2192_s4] sm:$0xf] %vm1123_vm2, %v1328_v26  ;;  %1156 = vst.msk [vmem:[%s2192_s4 + $0x10] sm:$0xf] %vm1123_vm2, %v1332_v27 }
 0x29b   :  { %1188 = vst.msk [vmem:[%s2192_s4 + $0x20] sm:$0xf] %vm1123_vm2, %v1336_v28  ;;  %1220 = vst.msk [vmem:[%s2192_s4 + $0x30] sm:$0xf] %vm1123_vm2, %v1340_v48  ;;  %v1104_v33 = vmax.f32 %v1100_v49, 0.0  ;;  %v1137_v4 = vmax.f32 %v1133_v51, 0.0  ;;  %v1097_v56 = vpop.permute.xlu1 %1096 }
 0x29c   :  { %v1169_v53 = vmax.f32 %v1165_v30, 0.0  ;;  %v1201_v5 = vmax.f32 %v1197_v32, 0.0  ;;  %v1102_v10 = vadd.f32 %v1097_v56, %v1078_v36  ;;  %v1135_v37 = vadd.f32 %v1131_v40, %v1097_v56 }
 0x29d   :  { %v1167_v54 = vadd.f32 %v1163_v34, %v1097_v56  ;;  %v1199_v46 = vadd.f32 %v1195_v13, %v1097_v56  ;;  %v1329_v7 = vpack.c.bf16 %v1104_v33, %v1104_v33  ;;  %v1333_v22 = vpack.c.bf16 %v1137_v4, %v1137_v4 }
 0x29e   :  { %v1337_v57 = vpack.c.bf16 %v1169_v53, %v1169_v53  ;;  %v1341_v38 = vpack.c.bf16 %v1201_v5, %v1201_v5  ;;  %v1106_v52 = vmax.f32 %v1102_v10, 0.0  ;;  %v1139_v55 = vmax.f32 %v1135_v37, 0.0 }
 0x29f   :  { %v1171_v21 = vmax.f32 %v1167_v54, 0.0  ;;  %v1203_v39 = vmax.f32 %v1199_v46, 0.0  ;;  %1125 = vst.msk [vmem:[%s2192_s4 + $0x4] sm:$0xf] %vm1123_vm2, %v1329_v7  ;;  %1157 = vst.msk [vmem:[%s2192_s4 + $0x14] sm:$0xf] %vm1123_vm2, %v1333_v22 }
 0x2a0   :  { %1189 = vst.msk [vmem:[%s2192_s4 + $0x24] sm:$0xf] %vm1123_vm2, %v1337_v57  ;;  %1221 = vst.msk [vmem:[%s2192_s4 + $0x34] sm:$0xf] %vm1123_vm2, %v1341_v38  ;;  %v1331_v6 = vpack.c.bf16 %v1106_v52, %v1106_v52  ;;  %v1335_v42 = vpack.c.bf16 %v1139_v55, %v1139_v55 }
 0x2a1   :  { %v1339_v19 = vpack.c.bf16 %v1171_v21, %v1171_v21  ;;  %v1343_v23 = vpack.c.bf16 %v1203_v39, %v1203_v39 }
 0x2a2   :  { %1127 = vst.msk [vmem:[%s2192_s4 + $0xc] sm:$0xf] %vm1123_vm2, %v1331_v6  ;;  %1159 = vst.msk [vmem:[%s2192_s4 + $0x1c] sm:$0xf] %vm1123_vm2, %v1335_v42 }
 0x2a3   :  { %1191 = vst.msk [vmem:[%s2192_s4 + $0x2c] sm:$0xf] %vm1123_vm2, %v1339_v19  ;;  %1223 = vst.msk [vmem:[%s2192_s4 + $0x3c] sm:$0xf] %vm1123_vm2, %v1343_v23 }

// kernel: cond_generator_forward.7
= control target key start
LH: loop header
LB: loop body
LE: loop exit
PB: predicated region body
PF: predicated region fallthrough
CT: control target
= control target key end

     0   :  { %9 = vsyncpa [#allocation3], 0  ;;  %s773_s15 = smov [#allocation2]   ;;  %s935_s0 = inlined_call_operand.hbm [shape: bf16[64,288], index: 0, kind: input, shape index: {}]   ;;  %s936_s1 = inlined_call_operand.vmem [shape: bf16[288,128], index: 1, kind: input, shape index: {}]   ;;  %s937_s2 = inlined_call_operand.vmem [shape: f32[16,1], index: 2, kind: input, shape index: {}]   ;;  %s938_s3 = inlined_call_operand.vmem [shape: f32[16,1], index: 3, kind: input, shape index: {}]   ;;  %s939_s4 = inlined_call_operand.vmem [shape: bf16[64,128], index: 4, kind: output, shape index: {}]  }
   0x1   :  { %s15_s16 = sshll.u32 %s773_s15, 4  ;;  %s16_s16 = int_to_ptr.vmem [resolvable:$true] %s15_s16 }
   0x2   :  { %s759_s17 = scalar_lea.vmem %s16_s16, 1536  ;;  %p764_p1 = scmp.lt.s32.totalorder %s16_s16, %s16_s16 }
   0x3   :  { %p760_p0 = scmp.ne.s32.totalorder %s16_s16, %s759_s17  ;;  %p765_p2 = scmp.lt.s32.totalorder %s759_s17, %s759_s17 }
   0x5   :  { %p766_p3 = por %p765_p2, %p764_p1 }
   0x7   :  { %p767_p4 = pnand %p766_p3, %p760_p0 }
   0x9   :  { %770 = shalt.err (!%p767_p4)
}
   0xa   :  { %s774_s18 = smov 192   ;;  %s775_s19 = smov 12  }
   0xb   :  { %21 = dma.hbm_to_vmem [thread:$0]  %s935_s0, 1536, %s16_s16, [#allocation3], %s774_s18, %s774_s18, %s775_s19  }
   0xc   :  { %771 = dma.done.wait [#allocation3], 1536  }
   0xd   :  { %772 = vsyncadd [#allocation3], 4294965760  ;;  %v713_v0 = vld [vmem:[%s936_s1 + $0x78] sm:$0xff]   ;;  %v715_v2 = vld [vmem:[%s936_s1 + $0x70] sm:$0xff]   ;;  %vm252_vm0 = vcmask 261120  }
   0xe   :  { %v714_v1 = vld [vmem:[%s936_s1 + $0x38] sm:$0xff]   ;;  %633 = vmatprep.subr.bf16.mxu0 %v713_v0  ;;  %691 = vmatprep.subr.bf16.mxu1 %v713_v0  ;;  %v716_v3 = vld [vmem:[%s936_s1 + $0x30] sm:$0xff]   ;;  %v717_v4 = vld [vmem:[%s936_s1 + $0x68] sm:$0xff]  }
   0xf   :  { %634 = vmatpush3.bf16.msra.mxu0 %v714_v1  ;;  %699 = vmatpush3.bf16.msra.mxu1 %v714_v1  ;;  %v718_v5 = vld [vmem:[%s936_s1 + $0x28] sm:$0xff]   ;;  %v719_v6 = vld [vmem:[%s936_s1 + $0x60] sm:$0xff]   ;;  %v721_v8 = vld [vmem:[%s936_s1 + $0x58] sm:$0xff]  }
  0x10   :  { %635 = vmatprep.subr.bf16.mxu0 %v715_v2  ;;  %692 = vmatprep.subr.bf16.mxu1 %v715_v2  ;;  %v720_v7 = vld [vmem:[%s936_s1 + $0x20] sm:$0xff]   ;;  %v722_v9 = vld [vmem:[%s936_s1 + $0x18] sm:$0xff]   ;;  %v723_v10 = vld [vmem:[%s936_s1 + $0x50] sm:$0xff]  }
  0x11   :  { %v731_v11 = vld [vmem:[#allocation2 + $0x4] ss:$12 sps:$4 sm:$0xff]   ;;  %v734_v12 = vld [vmem:[#allocation2 + $0x4c] ss:$12 sps:$4 sm:$0xff]   ;;  %v732_v20 = vld [vmem:[#allocation2 + $0x48] ss:$12 sps:$4 sm:$0xff]  }
  0x12   :  { %v724_v13 = vld [vmem:[%s936_s1 + $0x10] sm:$0xff]   ;;  %v725_v14 = vld [vmem:[%s936_s1 + $0x48] sm:$0xff]   ;;  %297 = vmatprep.mubr.bf16.mxu0 %v731_v11  ;;  %321 = vmatprep.mubr.bf16.mxu1 %v734_v12  ;;  %v727_v16 = vld [vmem:[%s936_s1 + $0x40] sm:$0xff]  }
  0x13   :  { %636 = vmatpush3.bf16.msra.mxu0 %v716_v3  ;;  %700 = vmatpush3.bf16.msra.mxu1 %v716_v3  ;;  %v726_v15 = vld [vmem:[%s936_s1 + $0x8] sm:$0xff]   ;;  %v728_v17 = vld [vmem:[%s936_s1] sm:$0xff]   ;;  %v745_v28 = vld [vmem:[#allocation2 + $0x30] ss:$12 sps:$4 sm:$0xff]  }
  0x14   :  { %637 = vmatprep.subr.bf16.mxu0 %v717_v4  ;;  %693 = vmatprep.subr.bf16.mxu1 %v717_v4  ;;  %v735_v18 = vld [vmem:[%s936_s1 + $0x88] sm:$0xff]   ;;  %v736_v22 = vld [vmem:[%s936_s1 + $0x80] sm:$0xff]   ;;  %v746_v29 = vld [vmem:[#allocation2 + $0x50] ss:$12 sps:$4 sm:$0xff]  }
  0x15   :  { %v729_v19 = vld [vmem:[#allocation2] ss:$12 sps:$4 sm:$0xff]   ;;  %v737_v21 = vld [vmem:[#allocation2 + $0x1c] ss:$12 sps:$4 sm:$0xff]   ;;  %v740_v24 = vld [vmem:[#allocation2 + $0x18] ss:$12 sps:$4 sm:$0xff]  }
  0x16   :  { %v739_v23 = vld [vmem:[#allocation2 + $0x8] ss:$12 sps:$4 sm:$0xff]   ;;  %v741_v25 = vld [vmem:[#allocation2 + $0x20] ss:$12 sps:$4 sm:$0xff]   ;;  %v744_v27 = vld [vmem:[#allocation2 + $0x38] ss:$12 sps:$4 sm:$0xff]  }
  0x17   :  { %638 = vmatpush3.bf16.msra.mxu0 %v718_v5  ;;  %701 = vmatpush3.bf16.msra.mxu1 %v718_v5  ;;  %v742_v26 = vld [vmem:[#allocation2 + $0x34] ss:$12 sps:$4 sm:$0xff]  }
  0x18   :  { %639 = vmatprep.subr.bf16.mxu0 %v719_v6  ;;  %694 = vmatprep.subr.bf16.mxu1 %v719_v6 }
  0x1b   :  { %640 = vmatpush3.bf16.msra.mxu0 %v720_v7  ;;  %702 = vmatpush3.bf16.msra.mxu1 %v720_v7 }
  0x1c   :  { %641 = vmatprep.subr.bf16.mxu0 %v721_v8  ;;  %695 = vmatprep.subr.bf16.mxu1 %v721_v8 }
  0x1f   :  { %642 = vmatpush3.bf16.msra.mxu0 %v722_v9  ;;  %703 = vmatpush3.bf16.msra.mxu1 %v722_v9 }
  0x20   :  { %643 = vmatprep.subr.bf16.mxu0 %v723_v10  ;;  %696 = vmatprep.subr.bf16.mxu1 %v723_v10 }
  0x23   :  { %644 = vmatpush3.bf16.msra.mxu0 %v724_v13  ;;  %704 = vmatpush3.bf16.msra.mxu1 %v724_v13 }
  0x24   :  { %645 = vmatprep.subr.bf16.mxu0 %v725_v14  ;;  %697 = vmatprep.subr.bf16.mxu1 %v725_v14  ;;  %v776_v14 = vmov 0  }
  0x25   :  { %711 = vset.pattern.permute.xlu0 %v776_v14  ;;  %712 = vset.pattern.permute.xlu1 %v776_v14 }
  0x27   :  { %646 = vmatpush3.bf16.msra.mxu0 %v726_v15  ;;  %705 = vmatpush3.bf16.msra.mxu1 %v726_v15 }
  0x28   :  { %647 = vmatprep.subr.bf16.mxu0 %v727_v16  ;;  %698 = vmatprep.subr.bf16.mxu1 %v727_v16 }
  0x2b   :  { %648 = vmatpush3.bf16.msra.mxu0 %v728_v17  ;;  %706 = vmatpush3.bf16.msra.mxu1 %v728_v17 }
  0x2c   :  { %679 = vmatprep.subr.bf16.mxu1 %v735_v18 }
  0x2e   :  { %298 = vmatmul.mubr.bf16.vlgmr.msra.gmra.mxu0 %v729_v19  ;;  %322 = vmatmul.mubr.bf16.vlgmr.msra.gmra.mxu1 %v732_v20 }
  0x2f   :  { %680 = vmatpush3.bf16.msra.mxu1 %v735_v18  ;;  %305 = vmatprep.mubr.bf16.mxu0 %v737_v21 }
  0x30   :  { %681 = vmatprep.subr.bf16.mxu1 %v736_v22  ;;  %683 = vmatprep.mubr.msk.bf16.mxu1 %vm252_vm0, %v739_v23 }
  0x33   :  { %682 = vmatpush3.bf16.msra.mxu1 %v736_v22 }
  0x36   :  { %306 = vmatmul.mubr.bf16.gmra.mxu0 %v740_v24  ;;  %684 = vmatmul.mubr.msk.bf16.vlgmr.msra.gmra.mxu1 %vm252_vm0, %v741_v25 }
  0x37   :  { %313 = vmatprep.mubr.bf16.mxu0 %v742_v26  ;;  %687 = vmatprep.mubr.msk.bf16.mxu1 %vm252_vm0, %v744_v27 }
  0x3e   :  { %314 = vmatmul.mubr.bf16.gmra.mxu0 %v745_v28  ;;  %688 = vmatmul.mubr.msk.bf16.gmra.mxu1 %vm252_vm0, %v746_v29 }
  0xee   :  { %v649_v30 = vpop.f32.mrf.mxu0  ;;  %v667_v31 = vpop.f32.mrf.mxu1 }
  0xf0   :  { %v650_v32 = vpop.f32.mrf.mxu0  ;;  %v668_v33 = vpop.f32.mrf.mxu1 }
  0xf1   :  { %v651_v40 = vadd.f32 %v650_v32, %v649_v30  ;;  %v669_v62 = vadd.f32 %v668_v33, %v667_v31 }
  0xf2   :  { %v652_v34 = vpop.f32.mrf.mxu0  ;;  %v670_v35 = vpop.f32.mrf.mxu1 }
  0xf4   :  { %v653_v36 = vpop.f32.mrf.mxu0  ;;  %v671_v37 = vpop.f32.mrf.mxu1 }
  0xf5   :  { %v654_v50 = vadd.f32 %v653_v36, %v652_v34  ;;  %v672_v2 = vadd.f32 %v671_v37, %v670_v35 }
  0xf6   :  { %v655_v38 = vpop.f32.mrf.mxu0  ;;  %v685_v39 = vpop.f32.mrf.mxu1 }
  0xf8   :  { %v656_v41 = vpop.f32.mrf.mxu0  ;;  %v364_v42 = vpop.f32.mrf.mxu1 }
  0xf9   :  { %v657_v43 = vadd.f32 %v656_v41, %v655_v38  ;;  %v863_v44 = vadd.f32 %v651_v40, %v364_v42 }
  0xfa   :  { %v658_v45 = vpop.f32.mrf.mxu0  ;;  %v686_v46 = vpop.f32.mrf.mxu1 }
  0xfb   :  { %v865_v47 = vadd.f32 %v685_v39, %v657_v43  ;;  %395 = vadd.xlane.f32.xlu0 %v863_v44  ;;  %v399_v52 = vmul.f32 %v863_v44, %v863_v44 }
  0xfc   :  { %v659_v48 = vpop.f32.mrf.mxu0  ;;  %v367_v49 = vpop.f32.mrf.mxu1 }
  0xfd   :  { %v660_v51 = vadd.f32 %v659_v48, %v658_v45  ;;  %405 = vadd.xlane.f32.xlu1 %v865_v47  ;;  %v873_v55 = vadd.f32 %v654_v50, %v367_v49  ;;  %v409_v61 = vmul.f32 %v865_v47, %v865_v47 }
  0xfe   :  { %v661_v53 = vpop.f32.mrf.mxu0  ;;  %v689_v56 = vpop.f32.mrf.mxu1 }
  0xff   :  { %v871_v54 = vadd.f32 %v686_v46, %v660_v51  ;;  %401 = vadd.xlane.f32.xlu0 %v399_v52  ;;  %v400_v58 = vmul.f32 %v873_v55, %v873_v55  ;;  %v883_v3 = vadd.f32 %v689_v56, %v669_v62 }
 0x100   :  { %v662_v57 = vpop.f32.mrf.mxu0  ;;  %v380_v59 = vpop.f32.mrf.mxu1 }
 0x101   :  { %407 = vadd.xlane.f32.xlu1 %v871_v54  ;;  %v410_v63 = vmul.f32 %v871_v54, %v871_v54  ;;  %v663_v4 = vadd.f32 %v662_v57, %v661_v53  ;;  %v437_v12 = vmul.f32 %v883_v3, %v883_v3 }
 0x102   :  { %v664_v60 = vpop.f32.mrf.mxu0  ;;  %v690_v0 = vpop.f32.mrf.mxu1 }
 0x103   :  { %397 = vadd.xlane.f32.xlu0 %v873_v55  ;;  %v885_v5 = vadd.f32 %v690_v0, %v672_v2  ;;  %v888_v8 = vadd.f32 %v663_v4, %v380_v59  ;;  %v457_v59 = vld [vmem:[%s937_s2] sm:$0xff] }
 0x104   :  { %v665_v1 = vpop.f32.mrf.mxu0  ;;  %v383_v7 = vpop.f32.mrf.mxu1  ;;  %v465_v2 = vld [vmem:[%s938_s3] sm:$0xff] }
 0x105   :  { %403 = vadd.xlane.f32.xlu1 %v400_v58  ;;  %v666_v6 = vadd.f32 %v665_v1, %v664_v60  ;;  %v423_v10 = vmul.f32 %v888_v8, %v888_v8  ;;  %v438_v13 = vmul.f32 %v885_v5, %v885_v5 }
 0x107   :  { %411 = vadd.xlane.f32.xlu0 %v409_v61  ;;  %v891_v9 = vadd.f32 %v666_v6, %v383_v7  ;;  %v458_v61 = vld [vmem:[%s937_s2 + $0x8] sm:$0xff] }
 0x108   :  { %v466_v7 = vld [vmem:[%s938_s3 + $0x8] sm:$0xff] }
 0x109   :  { %413 = vadd.xlane.f32.xlu1 %v410_v63  ;;  %v424_v11 = vmul.f32 %v891_v9, %v891_v9 }
 0x10b   :  { %433 = vadd.xlane.f32.xlu0 %v883_v3 }
 0x10d   :  { %435 = vadd.xlane.f32.xlu1 %v885_v5 }
 0x10f   :  { %419 = vadd.xlane.f32.xlu0 %v888_v8 }
 0x111   :  { %421 = vadd.xlane.f32.xlu1 %v891_v9 }
 0x113   :  { %425 = vadd.xlane.f32.xlu0 %v423_v10 }
 0x115   :  { %427 = vadd.xlane.f32.xlu1 %v424_v11 }
 0x117   :  { %439 = vadd.xlane.f32.xlu0 %v437_v12 }
 0x119   :  { %441 = vadd.xlane.f32.xlu1 %v438_v13 }
 0x184   :  { %v396_v15 = vpop.xlane.xlu0 %395 }
 0x186   :  { %v406_v16 = vpop.xlane.xlu1 %405 }
 0x187   :  { %v415_v25 = vadd.f32 %v406_v16, %v396_v15 }
 0x188   :  { %v402_v17 = vpop.xlane.xlu0 %401 }
 0x18a   :  { %v408_v18 = vpop.xlane.xlu1 %407 }
 0x18c   :  { %v398_v19 = vpop.xlane.xlu0 %397 }
 0x18d   :  { %v416_v27 = vadd.f32 %v408_v18, %v398_v19 }
 0x18e   :  { %v404_v20 = vpop.xlane.xlu1 %403 }
 0x190   :  { %v412_v21 = vpop.xlane.xlu0 %411 }
 0x191   :  { %v417_v33 = vadd.f32 %v412_v21, %v402_v17 }
 0x192   :  { %v414_v22 = vpop.xlane.xlu1 %413 }
 0x193   :  { %v418_v36 = vadd.f32 %v414_v22, %v404_v20 }
 0x194   :  { %v434_v23 = vpop.xlane.xlu0 %433 }
 0x196   :  { %v436_v24 = vpop.xlane.xlu1 %435 }
 0x198   :  { %v420_v26 = vpop.xlane.xlu0 %419 }
 0x199   :  { %v429_v28 = vadd.f32 %v420_v26, %v415_v25 }
 0x19a   :  { %v422_v29 = vpop.xlane.xlu1 %421 }
 0x19b   :  { %v443_v30 = vadd.f32 %v434_v23, %v429_v28  ;;  %v430_v31 = vadd.f32 %v422_v29, %v416_v27 }
 0x19c   :  { %v426_v32 = vpop.xlane.xlu0 %425 }
 0x19d   :  { %v444_v34 = vadd.f32 %v436_v24, %v430_v31  ;;  %v447_v37 = vmul.f32 0.001953125, %v443_v30  ;;  %v431_v38 = vadd.f32 %v426_v32, %v417_v33 }
 0x19e   :  { %v428_v35 = vpop.xlane.xlu1 %427 }
 0x19f   :  { %v448_v40 = vmul.f32 0.001953125, %v444_v34  ;;  %v432_v41 = vadd.f32 %v428_v35, %v418_v36  ;;  %v451_v45 = vmul.f32 %v447_v37, %v447_v37 }
 0x1a0   :  { %v440_v39 = vpop.xlane.xlu0 %439 }
 0x1a1   :  { %v445_v42 = vadd.f32 %v440_v39, %v431_v38  ;;  %v452_v51 = vmul.f32 %v448_v40, %v448_v40 }
 0x1a2   :  { %v442_v43 = vpop.xlane.xlu1 %441 }
 0x1a3   :  { %v449_v46 = vmul.f32 0.001953125, %v445_v42  ;;  %v446_v48 = vadd.f32 %v442_v43, %v432_v41 }
 0x1a5   :  { %v453_v49 = vsub.f32 %v449_v46, %v451_v45  ;;  %v450_v50 = vmul.f32 0.001953125, %v446_v48 }
 0x1a7   :  { %v455_v52 = vmax.f32 %v453_v49, 0.0  ;;  %v454_v53 = vsub.f32 %v450_v50, %v452_v51 }
 0x1a9   :  { %v459_v56 = vadd.f32 1e-05, %v455_v52  ;;  %v456_v57 = vmax.f32 %v454_v53, 0.0 }
 0x1ab   :  { %747 = vrsqrt.f32 %v459_v56  ;;  %v460_v58 = vadd.f32 1e-05, %v456_v57 }
 0x1ad   :  { %749 = vrsqrt.f32 %v460_v58 }
 0x1b8   :  { %v748_v60 = vpop.eup %747 }
 0x1b9   :  { %v463_v62 = vmul.f32 %v748_v60, %v457_v59 }
 0x1ba   :  { %v750_v63 = vpop.eup %749 }
 0x1bb   :  { %473 = vperm.xlu0 %711, %v463_v62   ;;  %v464_v0 = vmul.f32 %v750_v63, %v458_v61  ;;  %v467_v1 = vmul.f32 %v463_v62, %v447_v37 }
 0x1bd   :  { %478 = vperm.xlu1 %712, %v464_v0   ;;  %v469_v4 = vsub.f32 %v465_v2, %v467_v1  ;;  %v468_v6 = vmul.f32 %v464_v0, %v448_v40 }
 0x1bf   :  { %v470_v10 = vsub.f32 %v466_v7, %v468_v6 }
 0x1c1   :  { %485 = vperm.xlu1 %712, %v469_v4  }
 0x1c5   :  { %490 = vperm.xlu1 %712, %v470_v10  }
 0x236   :  { %v474_v12 = vpop.permute.xlu0 %473 }
 0x237   :  { %v481_v13 = vmul.f32 %v474_v12, %v863_v44  ;;  %v507_v14 = vmul.f32 %v474_v12, %v865_v47  ;;  %v523_v15 = vmul.f32 %v474_v12, %v888_v8  ;;  %v539_v16 = vmul.f32 %v474_v12, %v883_v3 }
 0x238   :  { %v479_v11 = vpop.permute.xlu1 %478 }
 0x239   :  { %v482_v22 = vmul.f32 %v479_v11, %v873_v55  ;;  %v508_v23 = vmul.f32 %v479_v11, %v871_v54  ;;  %v524_v24 = vmul.f32 %v479_v11, %v891_v9  ;;  %v540_v25 = vmul.f32 %v479_v11, %v885_v5 }
 0x23c   :  { %v486_v17 = vpop.permute.xlu1 %485 }
 0x23d   :  { %v493_v18 = vadd.f32 %v486_v17, %v481_v13  ;;  %v509_v19 = vadd.f32 %v507_v14, %v486_v17  ;;  %v525_v20 = vadd.f32 %v523_v15, %v486_v17  ;;  %v541_v21 = vadd.f32 %v539_v16, %v486_v17 }
 0x23f   :  { %v495_v28 = vmax.f32 %v493_v18, 0.0  ;;  %v511_v3 = vmax.f32 %v509_v19, 0.0  ;;  %v527_v29 = vmax.f32 %v525_v20, 0.0  ;;  %v543_v30 = vmax.f32 %v541_v21, 0.0 }
 0x240   :  { %v491_v44 = vpop.permute.xlu1 %490 }
 0x241   :  { %v494_v26 = vadd.f32 %v491_v44, %v482_v22  ;;  %v510_v47 = vadd.f32 %v508_v23, %v491_v44  ;;  %v526_v27 = vadd.f32 %v524_v24, %v491_v44  ;;  %v542_v8 = vadd.f32 %v540_v25, %v491_v44 }
 0x243   :  { %v496_v31 = vmax.f32 %v494_v26, 0.0  ;;  %v512_v32 = vmax.f32 %v510_v47, 0.0  ;;  %v528_v33 = vmax.f32 %v526_v27, 0.0  ;;  %v544_v34 = vmax.f32 %v542_v8, 0.0 }
 0x245   :  { %v613_v55 = vpack.c.bf16 %v496_v31, %v495_v28  ;;  %v618_v35 = vpack.c.bf16 %v512_v32, %v511_v3  ;;  %v623_v54 = vpack.c.bf16 %v528_v33, %v527_v29  ;;  %v628_v36 = vpack.c.bf16 %v544_v34, %v543_v30 }
 0x247   :  { %614 = vst [vmem:[%s939_s4] sm:$0xff] %v613_v55   ;;  %630 = vst [vmem:[%s939_s4 + $0x8] sm:$0xff] %v618_v35  }
 0x248   :  { %631 = vst [vmem:[%s939_s4 + $0x10] sm:$0xff] %v623_v54   ;;  %632 = vst [vmem:[%s939_s4 + $0x18] sm:$0xff] %v628_v36  }
 0x249   :  { %559 = vsyncpa [#allocation3], 1 }

// kernel: cond_generator_forward.8
= control target key start
LH: loop header
LB: loop body
LE: loop exit
PB: predicated region body
PF: predicated region fallthrough
CT: control target
= control target key end

     0   :  { %9 = vsyncpa [#allocation3], 0  ;;  %s742_s15 = smov [#allocation2]   ;;  %s1012_s0 = inlined_call_operand.hbm [shape: bf16[32,144], index: 0, kind: input, shape index: {}]   ;;  %s1013_s1 = inlined_call_operand.vmem [shape: bf16[144,512], index: 1, kind: input, shape index: {}]   ;;  %s1014_s2 = inlined_call_operand.vmem [shape: f32[8,1], index: 2, kind: input, shape index: {}]   ;;  %s1015_s3 = inlined_call_operand.vmem [shape: f32[8,1], index: 3, kind: input, shape index: {}]   ;;  %s1016_s4 = inlined_call_operand.vmem [shape: bf16[32,512], index: 4, kind: output, shape index: {}]  }
   0x1   :  { %s15_s16 = sshll.u32 %s742_s15, 4  ;;  %s16_s16 = int_to_ptr.vmem [resolvable:$true] %s15_s16 }
   0x2   :  { %s728_s17 = scalar_lea.vmem %s16_s16, 512  ;;  %p733_p1 = scmp.lt.s32.totalorder %s16_s16, %s16_s16 }
   0x3   :  { %p729_p0 = scmp.ne.s32.totalorder %s16_s16, %s728_s17  ;;  %p734_p2 = scmp.lt.s32.totalorder %s728_s17, %s728_s17 }
   0x5   :  { %p735_p3 = por %p734_p2, %p733_p1 }
   0x7   :  { %p736_p4 = pnand %p735_p3, %p729_p0 }
   0x9   :  { %739 = shalt.err (!%p736_p4)
}
   0xa   :  { %s743_s18 = smov 128   ;;  %s744_s19 = smov 8  }
   0xb   :  { %21 = dma.hbm_to_vmem [thread:$0]  %s1012_s0, 512, %s16_s16, [#allocation3], %s743_s18, %s743_s18, %s744_s19  }
   0xc   :  { %740 = dma.done.wait [#allocation3], 512  }
   0xd   :  { %741 = vsyncadd [#allocation3], 4294966784  ;;  %v658_v0 = vld [vmem:[%s1013_s1 + $0xe4] ss:$16 sps:$4 sm:$0xff]   ;;  %v660_v1 = vld [vmem:[%s1013_s1 + $0xec] ss:$16 sps:$4 sm:$0xff]  }
   0xe   :  { %277 = vmatprep.subr.bf16.mxu0 %v658_v0  ;;  %v662_v2 = vld [vmem:[%s1013_s1 + $0xe0] ss:$16 sps:$4 sm:$0xff]   ;;  %v663_v3 = vld [vmem:[%s1013_s1 + $0xe8] ss:$16 sps:$4 sm:$0xff]   ;;  %330 = vmatprep.subr.bf16.mxu1 %v660_v1  ;;  %v664_v4 = vld [vmem:[%s1013_s1 + $0xc4] ss:$16 sps:$4 sm:$0xff]  }
   0xf   :  { %278 = vmatpush1.bf16.msra.mxu0 %v662_v2  ;;  %331 = vmatpush1.bf16.msra.mxu1 %v663_v3  ;;  %v666_v5 = vld [vmem:[%s1013_s1 + $0xcc] ss:$16 sps:$4 sm:$0xff]   ;;  %v668_v6 = vld [vmem:[%s1013_s1 + $0xc0] ss:$16 sps:$4 sm:$0xff]   ;;  %v669_v7 = vld [vmem:[%s1013_s1 + $0xc8] ss:$16 sps:$4 sm:$0xff]  }
  0x10   :  { %279 = vmatprep.subr.bf16.mxu0 %v664_v4  ;;  %332 = vmatprep.subr.bf16.mxu1 %v666_v5  ;;  %v670_v8 = vld [vmem:[%s1013_s1 + $0xa4] ss:$16 sps:$4 sm:$0xff]   ;;  %v672_v9 = vld [vmem:[%s1013_s1 + $0xac] ss:$16 sps:$4 sm:$0xff]   ;;  %v674_v10 = vld [vmem:[%s1013_s1 + $0xa0] ss:$16 sps:$4 sm:$0xff]  }
  0x11   :  { %v675_v11 = vld [vmem:[%s1013_s1 + $0xa8] ss:$16 sps:$4 sm:$0xff]   ;;  %v676_v12 = vld [vmem:[%s1013_s1 + $0x84] ss:$16 sps:$4 sm:$0xff]   ;;  %v678_v13 = vld [vmem:[%s1013_s1 + $0x8c] ss:$16 sps:$4 sm:$0xff]  }
  0x12   :  { %v680_v14 = vld [vmem:[%s1013_s1 + $0x80] ss:$16 sps:$4 sm:$0xff]   ;;  %v681_v15 = vld [vmem:[%s1013_s1 + $0x88] ss:$16 sps:$4 sm:$0xff]   ;;  %v682_v16 = vld [vmem:[%s1013_s1 + $0x64] ss:$16 sps:$4 sm:$0xff]  }
  0x13   :  { %280 = vmatpush1.bf16.msra.mxu0 %v668_v6  ;;  %333 = vmatpush1.bf16.msra.mxu1 %v669_v7  ;;  %v684_v17 = vld [vmem:[%s1013_s1 + $0x6c] ss:$16 sps:$4 sm:$0xff]   ;;  %v686_v18 = vld [vmem:[%s1013_s1 + $0x60] ss:$16 sps:$4 sm:$0xff]   ;;  %v687_v19 = vld [vmem:[%s1013_s1 + $0x68] ss:$16 sps:$4 sm:$0xff]  }
  0x14   :  { %281 = vmatprep.subr.bf16.mxu0 %v670_v8  ;;  %334 = vmatprep.subr.bf16.mxu1 %v672_v9  ;;  %v688_v20 = vld [vmem:[%s1013_s1 + $0x44] ss:$16 sps:$4 sm:$0xff]   ;;  %v690_v21 = vld [vmem:[%s1013_s1 + $0x4c] ss:$16 sps:$4 sm:$0xff]   ;;  %v692_v22 = vld [vmem:[%s1013_s1 + $0x40] ss:$16 sps:$4 sm:$0xff]  }
  0x15   :  { %v693_v23 = vld [vmem:[%s1013_s1 + $0x48] ss:$16 sps:$4 sm:$0xff]   ;;  %v694_v24 = vld [vmem:[%s1013_s1 + $0x24] ss:$16 sps:$4 sm:$0xff]   ;;  %v696_v25 = vld [vmem:[%s1013_s1 + $0x2c] ss:$16 sps:$4 sm:$0xff]  }
  0x16   :  { %v698_v26 = vld [vmem:[%s1013_s1 + $0x20] ss:$16 sps:$4 sm:$0xff]   ;;  %v699_v27 = vld [vmem:[%s1013_s1 + $0x28] ss:$16 sps:$4 sm:$0xff]   ;;  %v700_v28 = vld [vmem:[%s1013_s1 + $0x4] ss:$16 sps:$4 sm:$0xff]  }
  0x17   :  { %282 = vmatpush1.bf16.msra.mxu0 %v674_v10  ;;  %335 = vmatpush1.bf16.msra.mxu1 %v675_v11  ;;  %v702_v29 = vld [vmem:[%s1013_s1 + $0xc] ss:$16 sps:$4 sm:$0xff]   ;;  %vm270_vm0 = vcmask 130048   ;;  %v704_v31 = vld [vmem:[%s1013_s1] ss:$16 sps:$4 sm:$0xff]  }
  0x18   :  { %283 = vmatprep.subr.bf16.mxu0 %v676_v12  ;;  %336 = vmatprep.subr.bf16.mxu1 %v678_v13  ;;  %v714_v30 = vld [vmem:[#allocation2 + $0x4] ss:$8 sps:$4 sm:$0xff]   ;;  %v705_v32 = vld [vmem:[%s1013_s1 + $0x8] ss:$16 sps:$4 sm:$0xff]   ;;  %v710_v35 = vld [vmem:[%s1013_s1 + $0x100] ss:$16 sps:$4 sm:$0xff]  }
  0x19   :  { %632 = vmatprep.mubr.msk.bf16.mxu0 %vm270_vm0, %v714_v30  ;;  %634 = vmatprep.mubr.msk.bf16.mxu1 %vm270_vm0, %v714_v30  ;;  %v706_v33 = vld [vmem:[%s1013_s1 + $0x104] ss:$16 sps:$4 sm:$0xff]   ;;  %v708_v34 = vld [vmem:[%s1013_s1 + $0x10c] ss:$16 sps:$4 sm:$0xff]   ;;  %v711_v36 = vld [vmem:[%s1013_s1 + $0x108] ss:$16 sps:$4 sm:$0xff]  }
  0x1a   :  { %v712_v37 = vld [vmem:[#allocation2] ss:$8 sps:$4 sm:$0xff]   ;;  %v715_v38 = vld [vmem:[#allocation2 + $0x14] ss:$8 sps:$4 sm:$0xff]   ;;  %v717_v39 = vld [vmem:[#allocation2 + $0x10] ss:$8 sps:$4 sm:$0xff]  }
  0x1b   :  { %284 = vmatpush1.bf16.msra.mxu0 %v680_v14  ;;  %337 = vmatpush1.bf16.msra.mxu1 %v681_v15 }
  0x1c   :  { %285 = vmatprep.subr.bf16.mxu0 %v682_v16  ;;  %338 = vmatprep.subr.bf16.mxu1 %v684_v17 }
  0x1f   :  { %286 = vmatpush1.bf16.msra.mxu0 %v686_v18  ;;  %339 = vmatpush1.bf16.msra.mxu1 %v687_v19 }
  0x20   :  { %287 = vmatprep.subr.bf16.mxu0 %v688_v20  ;;  %340 = vmatprep.subr.bf16.mxu1 %v690_v21 }
  0x23   :  { %288 = vmatpush1.bf16.msra.mxu0 %v692_v22  ;;  %341 = vmatpush1.bf16.msra.mxu1 %v693_v23 }
  0x24   :  { %289 = vmatprep.subr.bf16.mxu0 %v694_v24  ;;  %342 = vmatprep.subr.bf16.mxu1 %v696_v25 }
  0x27   :  { %290 = vmatpush1.bf16.msra.mxu0 %v698_v26  ;;  %343 = vmatpush1.bf16.msra.mxu1 %v699_v27 }
  0x28   :  { %291 = vmatprep.subr.bf16.mxu0 %v700_v28  ;;  %344 = vmatprep.subr.bf16.mxu1 %v702_v29 }
  0x2b   :  { %292 = vmatpush1.bf16.msra.mxu0 %v704_v31  ;;  %345 = vmatpush1.bf16.msra.mxu1 %v705_v32  ;;  %v745_v32 = vmov 0  }
  0x2c   :  { %307 = vmatprep.subr.bf16.mxu0 %v706_v33  ;;  %360 = vmatprep.subr.bf16.mxu1 %v708_v34 }
  0x2d   :  { %656 = vset.pattern.permute.xlu0 %v745_v32  ;;  %657 = vset.pattern.permute.xlu1 %v745_v32 }
  0x2f   :  { %308 = vmatpush2.bf16.msra.mxu0 %v710_v35  ;;  %361 = vmatpush2.bf16.msra.mxu1 %v711_v36 }
  0x32   :  { %310 = vmatmul.mubr.bf16.vlgmr.msra.gmra.mxu0 %v712_v37  ;;  %363 = vmatmul.mubr.bf16.vlgmr.msra.gmra.mxu1 %v712_v37 }
  0x33   :  { %633 = vmatprep.mubr.msk.bf16.mxu0 %vm270_vm0, %v715_v38  ;;  %635 = vmatprep.mubr.msk.bf16.mxu1 %vm270_vm0, %v715_v38 }
  0x3a   :  { %320 = vmatmul.mubr.bf16.gmra.mxu0 %v717_v39  ;;  %373 = vmatmul.mubr.bf16.gmra.mxu1 %v717_v39 }
  0xf2   :  { %v886_v40 = vpop.f32.mrf.mxu0  ;;  %v888_v41 = vpop.f32.mrf.mxu1 }
  0xf3   :  { %v388_v44 = vmul.f32 %v886_v40, %v886_v40  ;;  %v390_v45 = vmul.f32 %v888_v41, %v888_v41 }
  0xf4   :  { %v890_v42 = vpop.f32.mrf.mxu0  ;;  %v892_v43 = vpop.f32.mrf.mxu1 }
  0xf5   :  { %v383_v46 = vadd.f32 %v890_v42, %v886_v40  ;;  %v389_v47 = vmul.f32 %v890_v42, %v890_v42  ;;  %v391_v54 = vmul.f32 %v892_v43, %v892_v43 }
  0xf6   :  { %v902_v48 = vpop.f32.mrf.mxu0  ;;  %v904_v49 = vpop.f32.mrf.mxu1 }
  0xf7   :  { %v384_v50 = vadd.f32 %v383_v46, %v888_v41  ;;  %v392_v51 = vadd.f32 %v389_v47, %v388_v44  ;;  %v402_v59 = vmul.f32 %v902_v48, %v902_v48  ;;  %v404_v0 = vmul.f32 %v904_v49, %v904_v49 }
  0xf8   :  { %v907_v52 = vpop.f32.mrf.mxu0  ;;  %v909_v53 = vpop.f32.mrf.mxu1 }
  0xf9   :  { %v397_v55 = vadd.f32 %v907_v52, %v902_v48  ;;  %v403_v56 = vmul.f32 %v907_v52, %v907_v52  ;;  %v385_v57 = vadd.f32 %v384_v50, %v892_v43  ;;  %v393_v58 = vadd.f32 %v392_v51, %v390_v45 }
  0xfa   :  { %v920_v60 = vpop.f32.mrf.mxu0  ;;  %v922_v61 = vpop.f32.mrf.mxu1  ;;  %v405_v11 = vmul.f32 %v909_v53, %v909_v53 }
  0xfb   :  { %386 = vadd.xlane.f32.xlu0 %v385_v57  ;;  %v394_v62 = vadd.f32 %v393_v58, %v391_v54  ;;  %v398_v63 = vadd.f32 %v397_v55, %v904_v49  ;;  %v406_v3 = vadd.f32 %v403_v56, %v402_v59  ;;  %v418_v4 = vmul.f32 %v920_v60, %v920_v60 }
  0xfc   :  { %v927_v1 = vpop.f32.mrf.mxu0  ;;  %v929_v2 = vpop.f32.mrf.mxu1  ;;  %v420_v8 = vmul.f32 %v922_v61, %v922_v61 }
  0xfd   :  { %v413_v5 = vadd.f32 %v927_v1, %v920_v60  ;;  %v419_v6 = vmul.f32 %v927_v1, %v927_v1  ;;  %395 = vadd.xlane.f32.xlu1 %v394_v62  ;;  %v399_v7 = vadd.f32 %v398_v63, %v909_v53  ;;  %v407_v12 = vadd.f32 %v406_v3, %v404_v0  ;;  %v450_v63 = vld [vmem:[%s1014_s2] sm:$0xff] }
  0xfe   :  { %v940_v9 = vpop.f32.mrf.mxu0  ;;  %v942_v10 = vpop.f32.mrf.mxu1  ;;  %v421_v22 = vmul.f32 %v929_v2, %v929_v2 }
  0xff   :  { %400 = vadd.xlane.f32.xlu0 %v399_v7  ;;  %v414_v13 = vadd.f32 %v413_v5, %v922_v61  ;;  %v422_v14 = vadd.f32 %v419_v6, %v418_v4  ;;  %v408_v16 = vadd.f32 %v407_v12, %v405_v11  ;;  %v434_v17 = vmul.f32 %v940_v9, %v940_v9  ;;  %v454_v4 = vld [vmem:[%s1015_s3] sm:$0xff] }
 0x100   :  { %v947_v15 = vpop.f32.mrf.mxu0  ;;  %v956_v21 = vpop.f32.mrf.mxu1  ;;  %v436_v24 = vmul.f32 %v942_v10, %v942_v10 }
 0x101   :  { %v429_v18 = vadd.f32 %v947_v15, %v940_v9  ;;  %v435_v19 = vmul.f32 %v947_v15, %v947_v15  ;;  %v415_v20 = vadd.f32 %v414_v13, %v929_v2  ;;  %409 = vadd.xlane.f32.xlu1 %v408_v16  ;;  %v423_v23 = vadd.f32 %v422_v14, %v420_v8 }
 0x102   :  { %v437_v28 = vmul.f32 %v956_v21, %v956_v21 }
 0x103   :  { %v438_v25 = vadd.f32 %v435_v19, %v434_v17  ;;  %416 = vadd.xlane.f32.xlu0 %v415_v20  ;;  %v430_v26 = vadd.f32 %v429_v18, %v942_v10  ;;  %v424_v27 = vadd.f32 %v423_v23, %v421_v22 }
 0x105   :  { %v431_v29 = vadd.f32 %v430_v26, %v956_v21  ;;  %v439_v30 = vadd.f32 %v438_v25, %v436_v24  ;;  %425 = vadd.xlane.f32.xlu1 %v424_v27 }
 0x107   :  { %432 = vadd.xlane.f32.xlu0 %v431_v29  ;;  %v440_v31 = vadd.f32 %v439_v30, %v437_v28 }
 0x109   :  { %441 = vadd.xlane.f32.xlu1 %v440_v31 }
 0x184   :  { %v387_v33 = vpop.xlane.xlu0 %386 }
 0x186   :  { %v396_v34 = vpop.xlane.xlu1 %395 }
 0x188   :  { %v401_v35 = vpop.xlane.xlu0 %400 }
 0x189   :  { %v411_v38 = vadd.f32 %v401_v35, %v387_v33 }
 0x18a   :  { %v410_v36 = vpop.xlane.xlu1 %409 }
 0x18b   :  { %v412_v45 = vadd.f32 %v410_v36, %v396_v34 }
 0x18c   :  { %v417_v37 = vpop.xlane.xlu0 %416 }
 0x18d   :  { %v427_v39 = vadd.f32 %v417_v37, %v411_v38 }
 0x18e   :  { %v426_v44 = vpop.xlane.xlu1 %425 }
 0x18f   :  { %v428_v50 = vadd.f32 %v426_v44, %v412_v45 }
 0x190   :  { %v433_v46 = vpop.xlane.xlu0 %432 }
 0x191   :  { %v443_v47 = vadd.f32 %v433_v46, %v427_v39 }
 0x192   :  { %v442_v54 = vpop.xlane.xlu1 %441 }
 0x193   :  { %v445_v51 = vmul.f32 0.00048828125, %v443_v47  ;;  %v444_v55 = vadd.f32 %v442_v54, %v428_v50 }
 0x195   :  { %v447_v56 = vmul.f32 %v445_v51, %v445_v51  ;;  %v446_v57 = vmul.f32 0.00048828125, %v444_v55 }
 0x197   :  { %v448_v58 = vsub.f32 %v446_v57, %v447_v56 }
 0x199   :  { %v449_v59 = vmax.f32 %v448_v58, 0.0 }
 0x19b   :  { %v451_v62 = vadd.f32 1e-05, %v449_v59 }
 0x19d   :  { %718 = vrsqrt.f32 %v451_v62 }
 0x1aa   :  { %v719_v0 = vpop.eup %718 }
 0x1ab   :  { %v453_v3 = vmul.f32 %v719_v0, %v450_v63 }
 0x1ad   :  { %459 = vperm.xlu0 %656, %v453_v3   ;;  %v455_v5 = vmul.f32 %v453_v3, %v445_v51 }
 0x1af   :  { %v456_v6 = vsub.f32 %v454_v4, %v455_v5 }
 0x1b1   :  { %468 = vperm.xlu1 %657, %v456_v6  }
 0x228   :  { %v460_v7 = vpop.permute.xlu0 %459 }
 0x229   :  { %v462_v8 = vmul.f32 %v460_v7, %v886_v40  ;;  %v463_v11 = vmul.f32 %v460_v7, %v890_v42  ;;  %v464_v12 = vmul.f32 %v460_v7, %v888_v41  ;;  %v465_v13 = vmul.f32 %v460_v7, %v892_v43 }
 0x22a   :  { %v497_v14 = vmul.f32 %v460_v7, %v902_v48  ;;  %v498_v16 = vmul.f32 %v460_v7, %v907_v52  ;;  %v499_v17 = vmul.f32 %v460_v7, %v904_v49  ;;  %v500_v18 = vmul.f32 %v460_v7, %v909_v53 }
 0x22b   :  { %v527_v19 = vmul.f32 %v460_v7, %v920_v60  ;;  %v528_v20 = vmul.f32 %v460_v7, %v927_v1  ;;  %v529_v40 = vmul.f32 %v460_v7, %v922_v61  ;;  %v530_v42 = vmul.f32 %v460_v7, %v929_v2 }
 0x22c   :  { %v557_v41 = vmul.f32 %v460_v7, %v940_v9  ;;  %v558_v43 = vmul.f32 %v460_v7, %v947_v15  ;;  %v559_v48 = vmul.f32 %v460_v7, %v942_v10  ;;  %v560_v52 = vmul.f32 %v460_v7, %v956_v21  ;;  %v469_v22 = vpop.permute.xlu1 %468 }
 0x22d   :  { %v471_v49 = vadd.f32 %v469_v22, %v462_v8  ;;  %v472_v23 = vadd.f32 %v469_v22, %v463_v11  ;;  %v473_v53 = vadd.f32 %v469_v22, %v464_v12  ;;  %v474_v24 = vadd.f32 %v469_v22, %v465_v13 }
 0x22e   :  { %v501_v60 = vadd.f32 %v497_v14, %v469_v22  ;;  %v502_v25 = vadd.f32 %v498_v16, %v469_v22  ;;  %v503_v1 = vadd.f32 %v499_v17, %v469_v22  ;;  %v504_v26 = vadd.f32 %v500_v18, %v469_v22 }
 0x22f   :  { %v475_v61 = vmax.f32 %v471_v49, 0.0  ;;  %v476_v27 = vmax.f32 %v472_v23, 0.0  ;;  %v477_v2 = vmax.f32 %v473_v53, 0.0  ;;  %v478_v28 = vmax.f32 %v474_v24, 0.0 }
 0x230   :  { %v505_v9 = vmax.f32 %v501_v60, 0.0  ;;  %v506_v29 = vmax.f32 %v502_v25, 0.0  ;;  %v507_v15 = vmax.f32 %v503_v1, 0.0  ;;  %v508_v30 = vmax.f32 %v504_v26, 0.0 }
 0x231   :  { %v644_v10 = vpack.c.bf16 %v476_v27, %v475_v61  ;;  %v645_v31 = vpack.c.bf16 %v478_v28, %v477_v2  ;;  %v531_v21 = vadd.f32 %v527_v19, %v469_v22  ;;  %v532_v32 = vadd.f32 %v528_v20, %v469_v22 }
 0x232   :  { %v646_v33 = vpack.c.bf16 %v506_v29, %v505_v9  ;;  %v647_v34 = vpack.c.bf16 %v508_v30, %v507_v15  ;;  %v533_v35 = vadd.f32 %v529_v40, %v469_v22  ;;  %v534_v36 = vadd.f32 %v530_v42, %v469_v22 }
 0x233   :  { %495 = vst [vmem:[%s1016_s4] sm:$0xff] %v644_v10  ;;  %496 = vst [vmem:[%s1016_s4 + $0x8] sm:$0xff] %v645_v31  ;;  %v535_v37 = vmax.f32 %v531_v21, 0.0  ;;  %v536_v38 = vmax.f32 %v532_v32, 0.0  ;;  %v561_v39 = vadd.f32 %v557_v41, %v469_v22  ;;  %v562_v44 = vadd.f32 %v558_v43, %v469_v22 }
 0x234   :  { %525 = vst [vmem:[%s1016_s4 + $0x10] sm:$0xff] %v646_v33  ;;  %526 = vst [vmem:[%s1016_s4 + $0x18] sm:$0xff] %v647_v34  ;;  %v537_v45 = vmax.f32 %v533_v35, 0.0  ;;  %v538_v46 = vmax.f32 %v534_v36, 0.0  ;;  %v563_v47 = vadd.f32 %v559_v48, %v469_v22  ;;  %v564_v50 = vadd.f32 %v560_v52, %v469_v22 }
 0x235   :  { %v648_v51 = vpack.c.bf16 %v536_v38, %v535_v37  ;;  %v565_v54 = vmax.f32 %v561_v39, 0.0  ;;  %v566_v55 = vmax.f32 %v562_v44, 0.0 }
 0x236   :  { %v649_v56 = vpack.c.bf16 %v538_v46, %v537_v45  ;;  %v567_v57 = vmax.f32 %v563_v47, 0.0  ;;  %v568_v58 = vmax.f32 %v564_v50, 0.0 }
 0x237   :  { %555 = vst [vmem:[%s1016_s4 + $0x20] sm:$0xff] %v648_v51  ;;  %v650_v59 = vpack.c.bf16 %v566_v55, %v565_v54 }
 0x238   :  { %556 = vst [vmem:[%s1016_s4 + $0x28] sm:$0xff] %v649_v56  ;;  %v651_v62 = vpack.c.bf16 %v568_v58, %v567_v57 }
 0x239   :  { %585 = vst [vmem:[%s1016_s4 + $0x30] sm:$0xff] %v650_v59 }
 0x23a   :  { %586 = vst [vmem:[%s1016_s4 + $0x38] sm:$0xff] %v651_v62 }
 0x23b   :  { %591 = vsyncpa [#allocation3], 1 }

// kernel: cond_generator_forward.9
= control target key start
LH: loop header
LB: loop body
LE: loop exit
PB: predicated region body
PF: predicated region fallthrough
CT: control target
= control target key end

     0   :  { %vm455_vm0 = vcmask 1043456   ;;  %v1095_v3 = vmov 0   ;;  %vm451_vm1 = vcmask 588800   ;;  %s1468_s1 = inlined_call_operand.vmem [shape: bf16[72,2048], index: 1, kind: input, shape index: {}]   ;;  %s1469_s0 = inlined_call_operand.vmem [shape: bf16[12,72], index: 0, kind: input, shape index: {}]   ;;  %s1470_s2 = inlined_call_operand.vmem [shape: f32[12,2048], index: 2, kind: output, shape index: {}]  }
   0x1   :  { %v78_v0 = vld [vmem:[%s1468_s1 + $0x200] sm:$0xff]  ;;  %v79_v1 = vld [vmem:[%s1468_s1 + $0x208] sm:$0xff]  ;;  %536 = vmatprep.mubr.bf16.mxu0 %v1095_v3  ;;  %579 = vmatprep.mubr.bf16.mxu1 %v1095_v3  ;;  %v80_v39 = vld [vmem:[%s1468_s1 + $0x210] sm:$0xff] }
   0x2   :  { %v62_v2 = vld [vmem:[%s1468_s1 + $0x180] sm:$0xff]  ;;  %v982_v4 = vcombine.high %v78_v0, %v78_v0  ;;  %v984_v5 = vcombine.high %v79_v1, %v79_v1  ;;  %v981_v6 = vcombine.low %v78_v0, %v78_v0  ;;  %v983_v7 = vcombine.low %v79_v1, %v79_v1  ;;  %v63_v9 = vld [vmem:[%s1468_s1 + $0x188] sm:$0xff]  ;;  %v81_v40 = vld [vmem:[%s1468_s1 + $0x218] sm:$0xff] }
   0x3   :  { %v70_v8 = vld [vmem:[%s1468_s1 + $0x1c0] sm:$0xff]  ;;  %v71_v10 = vld [vmem:[%s1468_s1 + $0x1c8] sm:$0xff]  ;;  %v986_v43 = vcombine.high %v80_v39, %v80_v39  ;;  %v988_v44 = vcombine.high %v81_v40, %v81_v40  ;;  %v985_v45 = vcombine.low %v80_v39, %v80_v39  ;;  %v987_v46 = vcombine.low %v81_v40, %v81_v40  ;;  %v64_v47 = vld [vmem:[%s1468_s1 + $0x190] sm:$0xff] }
   0x4   :  { %v966_v11 = vcombine.high %v62_v2, %v70_v8  ;;  %v968_v12 = vcombine.high %v63_v9, %v71_v10  ;;  %v46_v13 = vld [vmem:[%s1468_s1 + $0x100] sm:$0xff]  ;;  %v47_v15 = vld [vmem:[%s1468_s1 + $0x108] sm:$0xff]  ;;  %997 = vmatprep.subr.msk.bf16.mxu0 %vm455_vm0, %v982_v4  ;;  %999 = vmatprep.subr.msk.bf16.mxu1 %vm455_vm0, %v984_v5  ;;  %v457_v16 = vsel %vm455_vm0, %v981_v6, 0  ;;  %v463_v17 = vsel %vm455_vm0, %v983_v7, 0  ;;  %v72_v48 = vld [vmem:[%s1468_s1 + $0x1d0] sm:$0xff] }
   0x5   :  { %v54_v14 = vld [vmem:[%s1468_s1 + $0x140] sm:$0xff]  ;;  %v55_v18 = vld [vmem:[%s1468_s1 + $0x148] sm:$0xff]  ;;  %511 = vmatpush1.bf16.msra.mxu0 %v457_v16  ;;  %554 = vmatpush1.bf16.msra.mxu1 %v463_v17  ;;  %v965_v19 = vcombine.low %v62_v2, %v70_v8  ;;  %v967_v20 = vcombine.low %v63_v9, %v71_v10  ;;  %v65_v49 = vld [vmem:[%s1468_s1 + $0x198] sm:$0xff]  ;;  %v469_v52 = vsel %vm455_vm0, %v985_v45, 0  ;;  %v475_v53 = vsel %vm455_vm0, %v987_v46, 0 }
   0x6   :  { %512 = vmatprep.subr.bf16.mxu0 %v966_v11  ;;  %555 = vmatprep.subr.bf16.mxu1 %v968_v12  ;;  %v950_v21 = vcombine.high %v46_v13, %v54_v14  ;;  %v952_v22 = vcombine.high %v47_v15, %v55_v18  ;;  %v30_v23 = vld [vmem:[%s1468_s1 + $0x80] sm:$0xff]  ;;  %v31_v25 = vld [vmem:[%s1468_s1 + $0x88] sm:$0xff]  ;;  %v949_v27 = vcombine.low %v46_v13, %v54_v14  ;;  %v73_v50 = vld [vmem:[%s1468_s1 + $0x1d8] sm:$0xff] }
   0x7   :  { %v38_v24 = vld [vmem:[%s1468_s1 + $0xc0] sm:$0xff]  ;;  %v39_v26 = vld [vmem:[%s1468_s1 + $0xc8] sm:$0xff]  ;;  %v951_v28 = vcombine.low %v47_v15, %v55_v18  ;;  %v970_v54 = vcombine.high %v64_v47, %v72_v48  ;;  %v972_v55 = vcombine.high %v65_v49, %v73_v50  ;;  %v48_v56 = vld [vmem:[%s1468_s1 + $0x110] sm:$0xff]  ;;  %v969_v60 = vcombine.low %v64_v47, %v72_v48 }
   0x8   :  { %v934_v29 = vcombine.high %v30_v23, %v38_v24  ;;  %v936_v30 = vcombine.high %v31_v25, %v39_v26  ;;  %v14_v31 = vld [vmem:[%s1468_s1] sm:$0xff]  ;;  %v15_v33 = vld [vmem:[%s1468_s1 + $0x8] sm:$0xff]  ;;  %v933_v35 = vcombine.low %v30_v23, %v38_v24  ;;  %v935_v36 = vcombine.low %v31_v25, %v39_v26  ;;  %v56_v57 = vld [vmem:[%s1468_s1 + $0x150] sm:$0xff] }
   0x9   :  { %513 = vmatpush1.bf16.msra.mxu0 %v965_v19  ;;  %556 = vmatpush1.bf16.msra.mxu1 %v967_v20  ;;  %v22_v32 = vld [vmem:[%s1468_s1 + $0x40] sm:$0xff]  ;;  %v23_v34 = vld [vmem:[%s1468_s1 + $0x48] sm:$0xff]  ;;  %v49_v58 = vld [vmem:[%s1468_s1 + $0x118] sm:$0xff]  ;;  %v971_v61 = vcombine.low %v65_v49, %v73_v50  ;;  %v954_v62 = vcombine.high %v48_v56, %v56_v57  ;;  %v953_v5 = vcombine.low %v48_v56, %v56_v57 }
   0xa   :  { %514 = vmatprep.subr.bf16.mxu0 %v950_v21  ;;  %557 = vmatprep.subr.bf16.mxu1 %v952_v22  ;;  %v918_v37 = vcombine.high %v14_v31, %v22_v32  ;;  %v920_v38 = vcombine.high %v15_v33, %v23_v34  ;;  %v917_v41 = vcombine.low %v14_v31, %v22_v32  ;;  %v1192_v51 = vld [vmem:[%s1469_s0] sm:$0x3f]   ;;  %v57_v59 = vld [vmem:[%s1468_s1 + $0x158] sm:$0xff]  ;;  %v32_v0 = vld [vmem:[%s1468_s1 + $0x90] sm:$0xff] }
   0xb   :  { %v919_v42 = vcombine.low %v15_v33, %v23_v34  ;;  %v956_v63 = vcombine.high %v49_v58, %v57_v59  ;;  %v40_v1 = vld [vmem:[%s1468_s1 + $0xd0] sm:$0xff]  ;;  %v33_v2 = vld [vmem:[%s1468_s1 + $0x98] sm:$0xff]  ;;  %v955_v6 = vcombine.low %v49_v58, %v57_v59  ;;  %v82_v17 = vld [vmem:[%s1468_s1 + $0x220] sm:$0xff] }
   0xc   :  { %v41_v4 = vld [vmem:[%s1468_s1 + $0xd8] sm:$0xff]  ;;  %v938_v7 = vcombine.high %v32_v0, %v40_v1  ;;  %v16_v9 = vld [vmem:[%s1468_s1 + $0x10] sm:$0xff]  ;;  %v937_v13 = vcombine.low %v32_v0, %v40_v1  ;;  %v83_v18 = vld [vmem:[%s1468_s1 + $0x228] sm:$0xff]  ;;  %v990_v21 = vcombine.high %v82_v17, %v82_v17  ;;  %v989_v23 = vcombine.low %v82_v17, %v82_v17 }
   0xd   :  { %515 = vmatpush1.bf16.msra.mxu0 %v949_v27  ;;  %558 = vmatpush1.bf16.msra.mxu1 %v951_v28  ;;  %v940_v8 = vcombine.high %v33_v2, %v41_v4  ;;  %v24_v10 = vld [vmem:[%s1468_s1 + $0x50] sm:$0xff]  ;;  %v17_v11 = vld [vmem:[%s1468_s1 + $0x18] sm:$0xff]  ;;  %v939_v14 = vcombine.low %v33_v2, %v41_v4  ;;  %v992_v22 = vcombine.high %v83_v18, %v83_v18  ;;  %v66_v25 = vld [vmem:[%s1468_s1 + $0x1a0] sm:$0xff] }
   0xe   :  { %516 = vmatprep.subr.bf16.mxu0 %v934_v29  ;;  %559 = vmatprep.subr.bf16.mxu1 %v936_v30  ;;  %v25_v12 = vld [vmem:[%s1468_s1 + $0x58] sm:$0xff]  ;;  %v922_v15 = vcombine.high %v16_v9, %v24_v10  ;;  %v921_v19 = vcombine.low %v16_v9, %v24_v10  ;;  %v991_v24 = vcombine.low %v83_v18, %v83_v18  ;;  %v74_v26 = vld [vmem:[%s1468_s1 + $0x1e0] sm:$0xff]  ;;  %v67_v27 = vld [vmem:[%s1468_s1 + $0x1a8] sm:$0xff]  ;;  %v481_v29 = vsel %vm455_vm0, %v989_v23, 0 }
   0xf   :  { %v924_v16 = vcombine.high %v17_v11, %v25_v12  ;;  %v923_v20 = vcombine.low %v17_v11, %v25_v12  ;;  %v75_v28 = vld [vmem:[%s1468_s1 + $0x1e8] sm:$0xff]  ;;  %v974_v31 = vcombine.high %v66_v25, %v74_v26  ;;  %v50_v33 = vld [vmem:[%s1468_s1 + $0x120] sm:$0xff]  ;;  %v84_v58 = vld [vmem:[%s1468_s1 + $0x230] sm:$0xff] }
  0x10   :  { %v487_v30 = vsel %vm455_vm0, %v991_v24, 0  ;;  %v976_v32 = vcombine.high %v67_v27, %v75_v28  ;;  %v58_v34 = vld [vmem:[%s1468_s1 + $0x160] sm:$0xff]  ;;  %v85_v59 = vld [vmem:[%s1468_s1 + $0x238] sm:$0xff]  ;;  %v993_v0 = vcombine.low %v84_v58, %v84_v58  ;;  %v68_v2 = vld [vmem:[%s1468_s1 + $0x1b0] sm:$0xff] }
  0x11   :  { %517 = vmatpush1.bf16.msra.mxu0 %v933_v35  ;;  %560 = vmatpush1.bf16.msra.mxu1 %v935_v36  ;;  %v51_v35 = vld [vmem:[%s1468_s1 + $0x128] sm:$0xff]  ;;  %v958_v39 = vcombine.high %v50_v33, %v58_v34  ;;  %v957_v45 = vcombine.low %v50_v33, %v58_v34  ;;  %v18_v49 = vld [vmem:[%s1468_s1 + $0x20] sm:$0xff]  ;;  %v995_v1 = vcombine.low %v85_v59, %v85_v59  ;;  %v76_v4 = vld [vmem:[%s1468_s1 + $0x1f0] sm:$0xff] }
  0x12   :  { %518 = vmatprep.subr.bf16.mxu0 %v918_v37  ;;  %561 = vmatprep.subr.bf16.mxu1 %v920_v38  ;;  %v59_v36 = vld [vmem:[%s1468_s1 + $0x168] sm:$0xff]  ;;  %v973_v37 = vcombine.low %v66_v25, %v74_v26  ;;  %v975_v38 = vcombine.low %v67_v27, %v75_v28  ;;  %v26_v50 = vld [vmem:[%s1468_s1 + $0x60] sm:$0xff]  ;;  %v978_v9 = vcombine.high %v68_v2, %v76_v4  ;;  %v52_v11 = vld [vmem:[%s1468_s1 + $0x130] sm:$0xff] }
  0x13   :  { %v960_v40 = vcombine.high %v51_v35, %v59_v36  ;;  %v959_v46 = vcombine.low %v51_v35, %v59_v36  ;;  %v926_v56 = vcombine.high %v18_v49, %v26_v50  ;;  %v60_v12 = vld [vmem:[%s1468_s1 + $0x170] sm:$0xff] }
  0x14   :  { %v962_v17 = vcombine.high %v52_v11, %v60_v12  ;;  %v961_v23 = vcombine.low %v52_v11, %v60_v12  ;;  %v20_v27 = vld [vmem:[%s1468_s1 + $0x30] sm:$0xff] }
  0x15   :  { %519 = vmatpush1.bf16.msra.mxu0 %v917_v41  ;;  %562 = vmatpush1.bf16.msra.mxu1 %v919_v42  ;;  %v34_v41 = vld [vmem:[%s1468_s1 + $0xa0] sm:$0xff]  ;;  %v28_v28 = vld [vmem:[%s1468_s1 + $0x70] sm:$0xff] }
  0x16   :  { %1001 = vmatprep.subr.msk.bf16.mxu0 %vm455_vm0, %v986_v43  ;;  %1003 = vmatprep.subr.msk.bf16.mxu1 %vm455_vm0, %v988_v44  ;;  %v42_v42 = vld [vmem:[%s1468_s1 + $0xe0] sm:$0xff]  ;;  %v35_v43 = vld [vmem:[%s1468_s1 + $0xa8] sm:$0xff]  ;;  %v929_v34 = vcombine.low %v20_v27, %v28_v28 }
  0x17   :  { %v43_v44 = vld [vmem:[%s1468_s1 + $0xe8] sm:$0xff]  ;;  %v942_v47 = vcombine.high %v34_v41, %v42_v42 }
  0x18   :  { %998 = vmatmul.mubr.msk.bf16.vlgmr.msra.gmra.mxu0 %vm451_vm1, %v1192_v51  ;;  %1000 = vmatmul.mubr.msk.bf16.vlgmr.msra.gmra.mxu1 %vm451_vm1, %v1192_v51  ;;  %v944_v48 = vcombine.high %v35_v43, %v43_v44 }
  0x19   :  { %597 = vmatpush1.bf16.msra.mxu0 %v469_v52  ;;  %640 = vmatpush1.bf16.msra.mxu1 %v475_v53  ;;  %v19_v52 = vld [vmem:[%s1468_s1 + $0x28] sm:$0xff] }
  0x1a   :  { %598 = vmatprep.subr.bf16.mxu0 %v970_v54  ;;  %641 = vmatprep.subr.bf16.mxu1 %v972_v55  ;;  %v27_v53 = vld [vmem:[%s1468_s1 + $0x68] sm:$0xff]  ;;  %v941_v54 = vcombine.low %v34_v41, %v42_v42  ;;  %v943_v55 = vcombine.low %v35_v43, %v43_v44 }
  0x1b   :  { %622 = vmatprep.mubr.bf16.mxu0 %v1095_v3  ;;  %665 = vmatprep.mubr.bf16.mxu1 %v1095_v3  ;;  %v928_v57 = vcombine.high %v19_v52, %v27_v53 }
  0x1d   :  { %599 = vmatpush1.bf16.msra.mxu0 %v969_v60  ;;  %642 = vmatpush1.bf16.msra.mxu1 %v971_v61  ;;  %v925_v60 = vcombine.low %v18_v49, %v26_v50  ;;  %v927_v61 = vcombine.low %v19_v52, %v27_v53 }
  0x1e   :  { %600 = vmatprep.subr.bf16.mxu0 %v954_v62  ;;  %643 = vmatprep.subr.bf16.mxu1 %v956_v63  ;;  %v994_v62 = vcombine.high %v84_v58, %v84_v58  ;;  %v996_v63 = vcombine.high %v85_v59, %v85_v59 }
  0x21   :  { %601 = vmatpush1.bf16.msra.mxu0 %v953_v5  ;;  %644 = vmatpush1.bf16.msra.mxu1 %v955_v6  ;;  %v69_v5 = vld [vmem:[%s1468_s1 + $0x1b8] sm:$0xff] }
  0x22   :  { %602 = vmatprep.subr.bf16.mxu0 %v938_v7  ;;  %645 = vmatprep.subr.bf16.mxu1 %v940_v8  ;;  %v77_v6 = vld [vmem:[%s1468_s1 + $0x1f8] sm:$0xff]  ;;  %v493_v7 = vsel %vm455_vm0, %v993_v0, 0  ;;  %v499_v8 = vsel %vm455_vm0, %v995_v1, 0 }
  0x23   :  { %v980_v10 = vcombine.high %v69_v5, %v77_v6 }
  0x25   :  { %603 = vmatpush1.bf16.msra.mxu0 %v937_v13  ;;  %646 = vmatpush1.bf16.msra.mxu1 %v939_v14  ;;  %v53_v13 = vld [vmem:[%s1468_s1 + $0x138] sm:$0xff] }
  0x26   :  { %604 = vmatprep.subr.bf16.mxu0 %v922_v15  ;;  %647 = vmatprep.subr.bf16.mxu1 %v924_v16  ;;  %v61_v14 = vld [vmem:[%s1468_s1 + $0x178] sm:$0xff]  ;;  %v977_v15 = vcombine.low %v68_v2, %v76_v4  ;;  %v979_v16 = vcombine.low %v69_v5, %v77_v6 }
  0x27   :  { %v964_v18 = vcombine.high %v53_v13, %v61_v14  ;;  %v963_v24 = vcombine.low %v53_v13, %v61_v14 }
  0x29   :  { %605 = vmatpush1.bf16.msra.mxu0 %v921_v19  ;;  %648 = vmatpush1.bf16.msra.mxu1 %v923_v20  ;;  %v36_v19 = vld [vmem:[%s1468_s1 + $0xb0] sm:$0xff] }
  0x2a   :  { %1005 = vmatprep.subr.msk.bf16.mxu0 %vm455_vm0, %v990_v21  ;;  %1007 = vmatprep.subr.msk.bf16.mxu1 %vm455_vm0, %v992_v22  ;;  %v44_v20 = vld [vmem:[%s1468_s1 + $0xf0] sm:$0xff]  ;;  %v37_v21 = vld [vmem:[%s1468_s1 + $0xb8] sm:$0xff] }
  0x2b   :  { %v45_v22 = vld [vmem:[%s1468_s1 + $0xf8] sm:$0xff]  ;;  %v946_v25 = vcombine.high %v36_v19, %v44_v20 }
  0x2c   :  { %1002 = vmatmul.mubr.msk.bf16.vlgmr.msra.gmra.mxu0 %vm451_vm1, %v1192_v51  ;;  %1004 = vmatmul.mubr.msk.bf16.vlgmr.msra.gmra.mxu1 %vm451_vm1, %v1192_v51  ;;  %v948_v26 = vcombine.high %v37_v21, %v45_v22 }
  0x2d   :  { %683 = vmatpush1.bf16.msra.mxu0 %v481_v29  ;;  %726 = vmatpush1.bf16.msra.mxu1 %v487_v30  ;;  %v29_v29 = vld [vmem:[%s1468_s1 + $0x78] sm:$0xff]  ;;  %v945_v30 = vcombine.low %v36_v19, %v44_v20 }
  0x2e   :  { %684 = vmatprep.subr.bf16.mxu0 %v974_v31  ;;  %727 = vmatprep.subr.bf16.mxu1 %v976_v32  ;;  %v947_v31 = vcombine.low %v37_v21, %v45_v22  ;;  %v930_v32 = vcombine.high %v20_v27, %v28_v28 }
  0x2f   :  { %708 = vmatprep.mubr.bf16.mxu0 %v1095_v3  ;;  %751 = vmatprep.mubr.bf16.mxu1 %v1095_v3 }
  0x31   :  { %685 = vmatpush1.bf16.msra.mxu0 %v973_v37  ;;  %728 = vmatpush1.bf16.msra.mxu1 %v975_v38 }
  0x32   :  { %686 = vmatprep.subr.bf16.mxu0 %v958_v39  ;;  %729 = vmatprep.subr.bf16.mxu1 %v960_v40 }
  0x35   :  { %687 = vmatpush1.bf16.msra.mxu0 %v957_v45  ;;  %730 = vmatpush1.bf16.msra.mxu1 %v959_v46 }
  0x36   :  { %688 = vmatprep.subr.bf16.mxu0 %v942_v47  ;;  %731 = vmatprep.subr.bf16.mxu1 %v944_v48 }
  0x39   :  { %689 = vmatpush1.bf16.msra.mxu0 %v941_v54  ;;  %732 = vmatpush1.bf16.msra.mxu1 %v943_v55 }
  0x3a   :  { %690 = vmatprep.subr.bf16.mxu0 %v926_v56  ;;  %733 = vmatprep.subr.bf16.mxu1 %v928_v57 }
  0x3d   :  { %691 = vmatpush1.bf16.msra.mxu0 %v925_v60  ;;  %734 = vmatpush1.bf16.msra.mxu1 %v927_v61 }
  0x3e   :  { %1009 = vmatprep.subr.msk.bf16.mxu0 %vm455_vm0, %v994_v62  ;;  %1011 = vmatprep.subr.msk.bf16.mxu1 %vm455_vm0, %v996_v63 }
  0x40   :  { %1006 = vmatmul.mubr.msk.bf16.vlgmr.msra.gmra.mxu0 %vm451_vm1, %v1192_v51  ;;  %1008 = vmatmul.mubr.msk.bf16.vlgmr.msra.gmra.mxu1 %vm451_vm1, %v1192_v51 }
  0x41   :  { %769 = vmatpush1.bf16.msra.mxu0 %v493_v7  ;;  %812 = vmatpush1.bf16.msra.mxu1 %v499_v8 }
  0x42   :  { %770 = vmatprep.subr.bf16.mxu0 %v978_v9  ;;  %813 = vmatprep.subr.bf16.mxu1 %v980_v10 }
  0x43   :  { %794 = vmatprep.mubr.bf16.mxu0 %v1095_v3  ;;  %837 = vmatprep.mubr.bf16.mxu1 %v1095_v3  ;;  %v21_v3 = vld [vmem:[%s1468_s1 + $0x38] sm:$0xff] }
  0x44   :  { %v932_v33 = vcombine.high %v21_v3, %v29_v29  ;;  %v931_v35 = vcombine.low %v21_v3, %v29_v29 }
  0x45   :  { %771 = vmatpush1.bf16.msra.mxu0 %v977_v15  ;;  %814 = vmatpush1.bf16.msra.mxu1 %v979_v16 }
  0x46   :  { %772 = vmatprep.subr.bf16.mxu0 %v962_v17  ;;  %815 = vmatprep.subr.bf16.mxu1 %v964_v18 }
  0x49   :  { %773 = vmatpush1.bf16.msra.mxu0 %v961_v23  ;;  %816 = vmatpush1.bf16.msra.mxu1 %v963_v24 }
  0x4a   :  { %774 = vmatprep.subr.bf16.mxu0 %v946_v25  ;;  %817 = vmatprep.subr.bf16.mxu1 %v948_v26 }
  0x4d   :  { %775 = vmatpush1.bf16.msra.mxu0 %v945_v30  ;;  %818 = vmatpush1.bf16.msra.mxu1 %v947_v31 }
  0x4e   :  { %776 = vmatprep.subr.bf16.mxu0 %v930_v32  ;;  %819 = vmatprep.subr.bf16.mxu1 %v932_v33 }
  0x51   :  { %777 = vmatpush1.bf16.msra.mxu0 %v929_v34  ;;  %820 = vmatpush1.bf16.msra.mxu1 %v931_v35 }
  0x54   :  { %1010 = vmatmul.mubr.msk.bf16.vlgmr.msra.gmra.mxu0 %vm451_vm1, %v1192_v51  ;;  %1012 = vmatmul.mubr.msk.bf16.vlgmr.msra.gmra.mxu1 %vm451_vm1, %v1192_v51 }
  0xd8   :  { %v538_v36 = vpop.f32.mrf.mxu0  ;;  %v581_v37 = vpop.f32.mrf.mxu1 }
  0xd9   :  { %1031 = vtanh.f32 %v538_v36 }
  0xda   :  { %1033 = vtanh.f32 %v581_v37  ;;  %v540_v38 = vpop.f32.mrf.mxu0  ;;  %v583_v39 = vpop.f32.mrf.mxu1 }
  0xdb   :  { %1035 = vtanh.f32 %v540_v38 }
  0xdc   :  { %1037 = vtanh.f32 %v583_v39  ;;  %v542_v40 = vpop.f32.mrf.mxu0  ;;  %v585_v41 = vpop.f32.mrf.mxu1 }
  0xdd   :  { %1039 = vtanh.f32 %v542_v40 }
  0xde   :  { %1041 = vtanh.f32 %v585_v41  ;;  %v544_v42 = vpop.f32.mrf.mxu0  ;;  %v587_v43 = vpop.f32.mrf.mxu1 }
  0xdf   :  { %1043 = vtanh.f32 %v544_v42 }
  0xe0   :  { %1045 = vtanh.f32 %v587_v43 }
  0xe6   :  { %v1032_v44 = vpop.eup %1031 }
  0xe7   :  { %v1034_v45 = vpop.eup %1033  ;;  %880 = vst [vmem:[%s1470_s2] sm:$0xff] %v1032_v44 }
  0xe8   :  { %v1036_v51 = vpop.eup %1035  ;;  %882 = vst [vmem:[%s1470_s2 + $0x10] sm:$0xff] %v1034_v45 }
  0xe9   :  { %v1038_v46 = vpop.eup %1037  ;;  %881 = vst [vmem:[%s1470_s2 + $0x8] sm:$0xff] %v1036_v51 }
  0xea   :  { %v1040_v47 = vpop.eup %1039  ;;  %883 = vst [vmem:[%s1470_s2 + $0x18] sm:$0xff] %v1038_v46 }
  0xeb   :  { %v1042_v48 = vpop.eup %1041  ;;  %896 = vst [vmem:[%s1470_s2 + $0x80] sm:$0xf] %v1040_v47 }
  0xec   :  { %v1044_v49 = vpop.eup %1043  ;;  %898 = vst [vmem:[%s1470_s2 + $0x90] sm:$0xf] %v1042_v48  ;;  %v624_v50 = vpop.f32.mrf.mxu0 }
  0xed   :  { %v667_v52 = vpop.f32.mrf.mxu1  ;;  %v1046_v53 = vpop.eup %1045  ;;  %897 = vst [vmem:[%s1470_s2 + $0x88] sm:$0xf] %v1044_v49  ;;  %1047 = vtanh.f32 %v624_v50 }
  0xee   :  { %899 = vst [vmem:[%s1470_s2 + $0x98] sm:$0xf] %v1046_v53  ;;  %1049 = vtanh.f32 %v667_v52  ;;  %v626_v54 = vpop.f32.mrf.mxu0 }
  0xef   :  { %v669_v55 = vpop.f32.mrf.mxu1  ;;  %1051 = vtanh.f32 %v626_v54 }
  0xf0   :  { %1053 = vtanh.f32 %v669_v55  ;;  %v628_v56 = vpop.f32.mrf.mxu0 }
  0xf1   :  { %v671_v57 = vpop.f32.mrf.mxu1  ;;  %1055 = vtanh.f32 %v628_v56 }
  0xf2   :  { %1057 = vtanh.f32 %v671_v57  ;;  %v630_v58 = vpop.f32.mrf.mxu0 }
  0xf3   :  { %v673_v59 = vpop.f32.mrf.mxu1  ;;  %1059 = vtanh.f32 %v630_v58 }
  0xf4   :  { %1061 = vtanh.f32 %v673_v59 }
  0xfa   :  { %v1048_v60 = vpop.eup %1047 }
  0xfb   :  { %v1050_v61 = vpop.eup %1049  ;;  %884 = vst [vmem:[%s1470_s2 + $0x20] sm:$0xff] %v1048_v60 }
  0xfc   :  { %v1052_v62 = vpop.eup %1051  ;;  %886 = vst [vmem:[%s1470_s2 + $0x30] sm:$0xff] %v1050_v61 }
  0xfd   :  { %v1054_v63 = vpop.eup %1053  ;;  %885 = vst [vmem:[%s1470_s2 + $0x28] sm:$0xff] %v1052_v62 }
  0xfe   :  { %v1056_v0 = vpop.eup %1055  ;;  %887 = vst [vmem:[%s1470_s2 + $0x38] sm:$0xff] %v1054_v63 }
  0xff   :  { %v1058_v1 = vpop.eup %1057  ;;  %900 = vst [vmem:[%s1470_s2 + $0xa0] sm:$0xf] %v1056_v0 }
 0x100   :  { %v1060_v2 = vpop.eup %1059  ;;  %902 = vst [vmem:[%s1470_s2 + $0xb0] sm:$0xf] %v1058_v1  ;;  %v710_v4 = vpop.f32.mrf.mxu0 }
 0x101   :  { %v753_v5 = vpop.f32.mrf.mxu1  ;;  %v1062_v6 = vpop.eup %1061  ;;  %901 = vst [vmem:[%s1470_s2 + $0xa8] sm:$0xf] %v1060_v2  ;;  %1063 = vtanh.f32 %v710_v4 }
 0x102   :  { %903 = vst [vmem:[%s1470_s2 + $0xb8] sm:$0xf] %v1062_v6  ;;  %1065 = vtanh.f32 %v753_v5  ;;  %v712_v7 = vpop.f32.mrf.mxu0 }
 0x103   :  { %v755_v8 = vpop.f32.mrf.mxu1  ;;  %1067 = vtanh.f32 %v712_v7 }
 0x104   :  { %1069 = vtanh.f32 %v755_v8  ;;  %v714_v9 = vpop.f32.mrf.mxu0 }
 0x105   :  { %v757_v10 = vpop.f32.mrf.mxu1  ;;  %1071 = vtanh.f32 %v714_v9 }
 0x106   :  { %1073 = vtanh.f32 %v757_v10  ;;  %v716_v11 = vpop.f32.mrf.mxu0 }
 0x107   :  { %v759_v12 = vpop.f32.mrf.mxu1  ;;  %1075 = vtanh.f32 %v716_v11 }
 0x108   :  { %1077 = vtanh.f32 %v759_v12 }
 0x10e   :  { %v1064_v13 = vpop.eup %1063 }
 0x10f   :  { %v1066_v14 = vpop.eup %1065  ;;  %888 = vst [vmem:[%s1470_s2 + $0x40] sm:$0xff] %v1064_v13 }
 0x110   :  { %v1068_v15 = vpop.eup %1067  ;;  %890 = vst [vmem:[%s1470_s2 + $0x50] sm:$0xff] %v1066_v14 }
 0x111   :  { %v1070_v16 = vpop.eup %1069  ;;  %889 = vst [vmem:[%s1470_s2 + $0x48] sm:$0xff] %v1068_v15 }
 0x112   :  { %v1072_v17 = vpop.eup %1071  ;;  %891 = vst [vmem:[%s1470_s2 + $0x58] sm:$0xff] %v1070_v16 }
 0x113   :  { %v1074_v18 = vpop.eup %1073  ;;  %904 = vst [vmem:[%s1470_s2 + $0xc0] sm:$0xf] %v1072_v17 }
 0x114   :  { %v1076_v19 = vpop.eup %1075  ;;  %906 = vst [vmem:[%s1470_s2 + $0xd0] sm:$0xf] %v1074_v18  ;;  %v796_v20 = vpop.f32.mrf.mxu0 }
 0x115   :  { %v839_v21 = vpop.f32.mrf.mxu1  ;;  %v1078_v22 = vpop.eup %1077  ;;  %905 = vst [vmem:[%s1470_s2 + $0xc8] sm:$0xf] %v1076_v19  ;;  %1079 = vtanh.f32 %v796_v20 }
 0x116   :  { %907 = vst [vmem:[%s1470_s2 + $0xd8] sm:$0xf] %v1078_v22  ;;  %1081 = vtanh.f32 %v839_v21  ;;  %v798_v23 = vpop.f32.mrf.mxu0 }
 0x117   :  { %v841_v24 = vpop.f32.mrf.mxu1  ;;  %1083 = vtanh.f32 %v798_v23 }
 0x118   :  { %1085 = vtanh.f32 %v841_v24  ;;  %v800_v25 = vpop.f32.mrf.mxu0 }
 0x119   :  { %v843_v26 = vpop.f32.mrf.mxu1  ;;  %1087 = vtanh.f32 %v800_v25 }
 0x11a   :  { %1089 = vtanh.f32 %v843_v26  ;;  %v802_v27 = vpop.f32.mrf.mxu0 }
 0x11b   :  { %v845_v28 = vpop.f32.mrf.mxu1  ;;  %1091 = vtanh.f32 %v802_v27 }
 0x11c   :  { %1093 = vtanh.f32 %v845_v28 }
 0x122   :  { %v1080_v3 = vpop.eup %1079 }
 0x123   :  { %v1082_v29 = vpop.eup %1081  ;;  %892 = vst [vmem:[%s1470_s2 + $0x60] sm:$0xff] %v1080_v3 }
 0x124   :  { %v1084_v30 = vpop.eup %1083  ;;  %894 = vst [vmem:[%s1470_s2 + $0x70] sm:$0xff] %v1082_v29 }
 0x125   :  { %v1086_v31 = vpop.eup %1085  ;;  %893 = vst [vmem:[%s1470_s2 + $0x68] sm:$0xff] %v1084_v30 }
 0x126   :  { %v1088_v32 = vpop.eup %1087  ;;  %895 = vst [vmem:[%s1470_s2 + $0x78] sm:$0xff] %v1086_v31 }
 0x127   :  { %v1090_v33 = vpop.eup %1089  ;;  %908 = vst [vmem:[%s1470_s2 + $0xe0] sm:$0xf] %v1088_v32 }
 0x128   :  { %v1092_v34 = vpop.eup %1091  ;;  %910 = vst [vmem:[%s1470_s2 + $0xf0] sm:$0xf] %v1090_v33 }
 0x129   :  { %v1094_v35 = vpop.eup %1093  ;;  %909 = vst [vmem:[%s1470_s2 + $0xe8] sm:$0xf] %v1092_v34 }
 0x12a   :  { %911 = vst [vmem:[%s1470_s2 + $0xf8] sm:$0xf] %v1094_v35 }

</bundles_post_ra>
